<compile_context>
chip_gen: v6e
topology: v6e:2x2x1
jax: 0.10.0
libtpu: 0.0.40
codegen_flags: <defaults>
</compile_context>

<pallas_src>
import functools

import jax
import jax.numpy as jnp
from jax import lax
from jax.experimental import pallas as pl
from jax.experimental.pallas import tpu as pltpu


def _mha_kernel(xq_ref, xf_ref, wq_ref, bq_ref, wkv_ref, bkv_ref,
                wot_ref, bo_ref, o_ref, e_scr, *, n_heads, head_dim, hid):
    # xq_ref block: (1, C_in, TQ)  -- query-position tile of x (channels-first)
    # xf_ref block: (1, C_in, L)   -- full x slab (needed for K / V)
    xq = xq_ref[0]                                                   # (C_in, TQ)
    xf = xf_ref[0]                                                   # (C_in, L)

    # 1x1 convs == channel matmuls on the MXU.  K and V share the LHS -> fused.
    q = jnp.dot(wq_ref[...], xq,
                preferred_element_type=jnp.float32) + bq_ref[...]    # (hid, TQ)
    kv = jnp.dot(wkv_ref[...], xf,
                 preferred_element_type=jnp.float32) + bkv_ref[...]  # (2*hid, L)

    # ---- pass 1: per-head energies -> VMEM scratch, running max over heads.
    # energy_h[l, m] = sum_d Q[l, d] * K[m, d]  (contract the head_dim sublanes)
    m = None
    for h in range(n_heads):
        qh = q[h * head_dim:(h + 1) * head_dim, :]                   # (hd, TQ)
        kh = kv[h * head_dim:(h + 1) * head_dim, :]                  # (hd, L)
        e = lax.dot_general(qh, kh, (((0,), (0,)), ((), ())),
                            preferred_element_type=jnp.float32)      # (TQ, L)
        e_scr[h] = e
        m = e if m is None else jnp.maximum(m, e)

    # ---- pass 2: softmax over the HEADS axis (elementwise in (l, m)).
    den = None
    for h in range(n_heads):
        p = jnp.exp(e_scr[h] - m)
        e_scr[h] = p                                 # overwrite energy with exp
        den = p if den is None else den + p
    inv_den = pl.reciprocal(den, approx=True)                        # (TQ, L)

    # ---- pass 3: attn @ V per head with the output projection fused in.
    # acc starts as conv_out bias + residual shortcut (c_out == C_in).
    acc = bo_ref[...] + xq                                           # (c_out, TQ)
    for h in range(n_heads):
        attn = (e_scr[h] * inv_den).astype(jnp.bfloat16)             # (TQ, L)
        vh = kv[hid + h * head_dim: hid + (h + 1) * head_dim, :]     # (hd, L)
        ov = lax.dot_general(vh.astype(jnp.bfloat16), attn,
                             (((1,), (1,)), ((), ())),
                             preferred_element_type=jnp.float32)     # (hd, TQ)
        acc = acc + jnp.dot(wot_ref[:, h * head_dim:(h + 1) * head_dim], ov,
                            preferred_element_type=jnp.float32)      # (c_out, TQ)

    o_ref[0] = acc.astype(o_ref.dtype)


def multi_head_attention(x_nchw, params, *, n_heads):
    """x_nchw: (B, C_in, H, W) float32.  Requires out_channels == in_channels
    (the residual add in the reference module forces it anyway)."""
    wq, bq, wk, bk, wv, bv, wo, bo = params
    B, C_in, H, W = x_nchw.shape
    hid = wq.shape[1]
    c_out = wo.shape[1]
    assert c_out == C_in, "residual add requires out_channels == in_channels"
    head_dim = hid // n_heads
    L = H * W
    TQ = 128 if L % 128 == 0 else L          # lane-aligned query tile
    n_q = L // TQ

    # Channels-first, flattened spatial: free reshape (no transposes).
    x_cf = x_nchw.reshape(B, C_in, L)

    # Pre-transposed weights (tiny, one-time, outside the kernel).
    wq_t = wq.T                                              # (hid, C_in)
    wkv_t = jnp.concatenate([wk, wv], axis=1).T              # (2*hid, C_in)
    wo_t = wo.T                                              # (c_out, hid)
    bq2 = bq.reshape(hid, 1)
    bkv2 = jnp.concatenate([bk, bv]).reshape(2 * hid, 1)
    bo2 = bo.reshape(c_out, 1)

    kernel = functools.partial(_mha_kernel, n_heads=n_heads,
                               head_dim=head_dim, hid=hid)

    full = lambda shape: pl.BlockSpec(shape, lambda b, j: (0,) * len(shape))

    out_cf = pl.pallas_call(
        kernel,
        out_shape=jax.ShapeDtypeStruct((B, c_out, L), jnp.float32),
        grid_spec=pltpu.PrefetchScalarGridSpec(
            num_scalar_prefetch=0,
            grid=(B, n_q),
            in_specs=[
                pl.BlockSpec((1, C_in, TQ), lambda b, j: (b, 0, j)),  # x (q tile)
                pl.BlockSpec((1, C_in, L), lambda b, j: (b, 0, 0)),   # x (full, K/V)
                full((hid, C_in)), full((hid, 1)),                    # Wq^T, bq
                full((2 * hid, C_in)), full((2 * hid, 1)),            # [Wk|Wv]^T, bkv
                full((c_out, hid)), full((c_out, 1)),                 # Wo^T, bo
            ],
            out_specs=pl.BlockSpec((1, c_out, TQ), lambda b, j: (b, 0, j)),
            scratch_shapes=[pltpu.VMEM((n_heads, TQ, L), jnp.float32)],
        ),
        compiler_params=pltpu.CompilerParams(
            dimension_semantics=("parallel", "parallel"),
            vmem_limit_bytes=32 * 1024 * 1024,
        ),
    )(x_cf, x_cf, wq_t, bq2, wkv_t, bkv2, wo_t, bo2)

    return out_cf.reshape(B, c_out, H, W)


def ref_forward(x, params, *, n_heads):
    """Pure-JAX faithful port of the PyTorch forward (NCHW)."""
    wq, bq, wk, bk, wv, bv, wo, bo = params
    B, C, H, W = x.shape
    hid = wq.shape[1]
    hd = hid // n_heads
    L = H * W

    def conv1x1(inp, w, b):
        return jnp.einsum('bihw,io->bohw', inp, w) + b[None, :, None, None]

    query = jnp.transpose(conv1x1(x, wq, bq), (0, 2, 3, 1))
    key = jnp.transpose(conv1x1(x, wk, bk), (0, 2, 3, 1))
    value = jnp.transpose(conv1x1(x, wv, bv), (0, 2, 3, 1))

    Q = query.reshape(B, L, n_heads, hd).transpose(0, 2, 1, 3)
    K = key.reshape(B, L, n_heads, hd).transpose(0, 2, 1, 3)
    V = value.reshape(B, L, n_heads, hd).transpose(0, 2, 1, 3)

    energy = jnp.einsum('bnld,bnmd->bnlm', Q, K)
    attention = jax.nn.softmax(energy, axis=1)          # softmax over HEADS (dim=1)
    xo = jnp.einsum('bnlm,bnmd->bnld', attention, V)
    xo = jnp.transpose(xo, (0, 1, 3, 2)).reshape(B, hid, H, W)
    xo = conv1x1(xo, wo, bo)
    return xo + x


if __name__ == "__main__":
    # Module config: in_channels=out_channels=4, hid_dim=32, n_heads=4, dropout=0.0
    B, C, H, W = 2, 4, 16, 16
    HID, N_HEADS = 32, 4

    key = jax.random.PRNGKey(0)
    ks = jax.random.split(key, 9)
    x = jax.random.normal(ks[0], (B, C, H, W), jnp.float32)
    wq = jax.random.normal(ks[1], (C, HID), jnp.float32) * 0.1
    bq = jax.random.normal(ks[2], (HID,), jnp.float32) * 0.1
    wk = jax.random.normal(ks[3], (C, HID), jnp.float32) * 0.1
    bk = jax.random.normal(ks[4], (HID,), jnp.float32) * 0.1
    wv = jax.random.normal(ks[5], (C, HID), jnp.float32) * 0.1
    bv = jax.random.normal(ks[6], (HID,), jnp.float32) * 0.1
    wo = jax.random.normal(ks[7], (HID, C), jnp.float32) * 0.1
    bo = jax.random.normal(ks[8], (C,), jnp.float32) * 0.1
    params = (wq, bq, wk, bk, wv, bv, wo, bo)

    out = multi_head_attention(x, params, n_heads=N_HEADS)
    out = jax.block_until_ready(out)

    ref = ref_forward(x, params, n_heads=N_HEADS)
    assert out.shape == ref.shape == (B, C, H, W)
    # Tolerance relaxed vs the pure-f32 version: attn@V runs in bf16 with f32
    # accumulation and the softmax reciprocal uses the approximate EUP op.
    assert jnp.allclose(out, ref, atol=3e-2, rtol=3e-2), \
        float(jnp.max(jnp.abs(out - ref)))

    print("KERNEL_OK")
</pallas_src>

<mosaic_0001>
module attributes {stable_mosaic.version = 11 : i64} {
  func.func @_mha_kernel(%arg0: i32, %arg1: i32, %arg2: memref<1x4x128xf32, #tpu.memory_space<vmem>>, %arg3: memref<1x4x256xf32, #tpu.memory_space<vmem>>, %arg4: memref<32x4xf32, #tpu.memory_space<vmem>>, %arg5: memref<32x1xf32, #tpu.memory_space<vmem>>, %arg6: memref<64x4xf32, #tpu.memory_space<vmem>>, %arg7: memref<64x1xf32, #tpu.memory_space<vmem>>, %arg8: memref<4x32xf32, #tpu.memory_space<vmem>>, %arg9: memref<4x1xf32, #tpu.memory_space<vmem>>, %arg10: memref<1x4x128xf32, #tpu.memory_space<vmem>>, %arg11: memref<4x128x256xf32, #tpu.memory_space<vmem>>) attributes {dimension_semantics = [#tpu.dimension_semantics<parallel>, #tpu.dimension_semantics<parallel>], iteration_bounds = array<i64: 2, 2>, scalar_prefetch = 0 : i64, scratch_operands = 1 : i64, tpu.core_type = #tpu.core_type<tc>, window_params = [{transform_indices = @transform_0, window_bounds = array<i64: 1, 4, 128>}, {transform_indices = @transform_1, window_bounds = array<i64: 1, 4, 256>}, {pipeline_mode = #tpu.pipeline_mode<synchronous>, transform_indices = @transform_2, window_bounds = array<i64: 32, 4>}, {pipeline_mode = #tpu.pipeline_mode<synchronous>, transform_indices = @transform_3, window_bounds = array<i64: 32, 1>}, {pipeline_mode = #tpu.pipeline_mode<synchronous>, transform_indices = @transform_4, window_bounds = array<i64: 64, 4>}, {pipeline_mode = #tpu.pipeline_mode<synchronous>, transform_indices = @transform_5, window_bounds = array<i64: 64, 1>}, {pipeline_mode = #tpu.pipeline_mode<synchronous>, transform_indices = @transform_6, window_bounds = array<i64: 4, 32>}, {pipeline_mode = #tpu.pipeline_mode<synchronous>, transform_indices = @transform_7, window_bounds = array<i64: 4, 1>}, {transform_indices = @transform_8, window_bounds = array<i64: 1, 4, 128>}]} {
    %c0 = arith.constant 0 : index
    %c0_0 = arith.constant 0 : index
    %c0_1 = arith.constant 0 : index
    %0 = vector.load %arg2[%c0, %c0_0, %c0_1] : memref<1x4x128xf32, #tpu.memory_space<vmem>>, vector<1x4x128xf32>
    %1 = vector.shape_cast %0 : vector<1x4x128xf32> to vector<4x128xf32>
    %c0_2 = arith.constant 0 : index
    %c0_3 = arith.constant 0 : index
    %c0_4 = arith.constant 0 : index
    %2 = vector.load %arg3[%c0_2, %c0_3, %c0_4] : memref<1x4x256xf32, #tpu.memory_space<vmem>>, vector<1x4x256xf32>
    %3 = vector.shape_cast %2 : vector<1x4x256xf32> to vector<4x256xf32>
    %c0_5 = arith.constant 0 : index
    %c0_6 = arith.constant 0 : index
    %4 = vector.load %arg4[%c0_5, %c0_6] : memref<32x4xf32, #tpu.memory_space<vmem>>, vector<32x4xf32>
    %cst = arith.constant dense<0.000000e+00> : vector<32x128xf32>
    %5 = tpu.matmul %4, %1, %cst {dimension_numbers = #tpu.dot_dimension_numbers<[1], [0], [0], [1], [0, 0, 1, 1], [], []>} : vector<32x4xf32>, vector<4x128xf32>, vector<32x128xf32> -> vector<32x128xf32>
    %c0_7 = arith.constant 0 : index
    %c0_8 = arith.constant 0 : index
    %6 = vector.load %arg5[%c0_7, %c0_8] : memref<32x1xf32, #tpu.memory_space<vmem>>, vector<32x1xf32>
    %7 = vector.broadcast %6 : vector<32x1xf32> to vector<32x128xf32>
    %8 = arith.addf %5, %7 : vector<32x128xf32>
    %c0_9 = arith.constant 0 : index
    %c0_10 = arith.constant 0 : index
    %9 = vector.load %arg6[%c0_9, %c0_10] : memref<64x4xf32, #tpu.memory_space<vmem>>, vector<64x4xf32>
    %cst_11 = arith.constant dense<0.000000e+00> : vector<64x256xf32>
    %10 = tpu.matmul %9, %3, %cst_11 {dimension_numbers = #tpu.dot_dimension_numbers<[1], [0], [0], [1], [0, 0, 1, 1], [], []>} : vector<64x4xf32>, vector<4x256xf32>, vector<64x256xf32> -> vector<64x256xf32>
    %c0_12 = arith.constant 0 : index
    %c0_13 = arith.constant 0 : index
    %11 = vector.load %arg7[%c0_12, %c0_13] : memref<64x1xf32, #tpu.memory_space<vmem>>, vector<64x1xf32>
    %12 = vector.broadcast %11 : vector<64x1xf32> to vector<64x256xf32>
    %13 = arith.addf %10, %12 : vector<64x256xf32>
    %14 = vector.extract_strided_slice %8 {offsets = [0, 0], sizes = [8, 128], strides = [1, 1]} : vector<32x128xf32> to vector<8x128xf32>
    %15 = vector.extract_strided_slice %13 {offsets = [0, 0], sizes = [8, 256], strides = [1, 1]} : vector<64x256xf32> to vector<8x256xf32>
    %cst_14 = arith.constant dense<0.000000e+00> : vector<128x256xf32>
    %16 = tpu.matmul %14, %15, %cst_14 {dimension_numbers = #tpu.dot_dimension_numbers<[0], [0], [1], [1], [0, 1, 1, 1], [], []>} : vector<8x128xf32>, vector<8x256xf32>, vector<128x256xf32> -> vector<128x256xf32>
    %c0_15 = arith.constant 0 : index
    %c0_16 = arith.constant 0 : index
    %c0_17 = arith.constant 0 : index
    %17 = vector.load %arg11[%c0_15, %c0_16, %c0_17] : memref<4x128x256xf32, #tpu.memory_space<vmem>>, vector<1x128x256xf32>
    %18 = vector.shape_cast %17 : vector<1x128x256xf32> to vector<128x256xf32>
    %19 = vector.shape_cast %16 : vector<128x256xf32> to vector<1x128x256xf32>
    tpu.vector_store %arg11[%c0_15, %c0_16, %c0_17], %19 {strides = array<i32>} : memref<4x128x256xf32, #tpu.memory_space<vmem>>, vector<1x128x256xf32>,
    %20 = vector.extract_strided_slice %8 {offsets = [8, 0], sizes = [8, 128], strides = [1, 1]} : vector<32x128xf32> to vector<8x128xf32>
    %21 = vector.extract_strided_slice %13 {offsets = [8, 0], sizes = [8, 256], strides = [1, 1]} : vector<64x256xf32> to vector<8x256xf32>
    %cst_18 = arith.constant dense<0.000000e+00> : vector<128x256xf32>
    %22 = tpu.matmul %20, %21, %cst_18 {dimension_numbers = #tpu.dot_dimension_numbers<[0], [0], [1], [1], [0, 1, 1, 1], [], []>} : vector<8x128xf32>, vector<8x256xf32>, vector<128x256xf32> -> vector<128x256xf32>
    %c1 = arith.constant 1 : index
    %c0_19 = arith.constant 0 : index
    %c0_20 = arith.constant 0 : index
    %23 = vector.load %arg11[%c1, %c0_19, %c0_20] : memref<4x128x256xf32, #tpu.memory_space<vmem>>, vector<1x128x256xf32>
    %24 = vector.shape_cast %23 : vector<1x128x256xf32> to vector<128x256xf32>
    %25 = vector.shape_cast %22 : vector<128x256xf32> to vector<1x128x256xf32>
    tpu.vector_store %arg11[%c1, %c0_19, %c0_20], %25 {strides = array<i32>} : memref<4x128x256xf32, #tpu.memory_space<vmem>>, vector<1x128x256xf32>,
    %26 = arith.maximumf %16, %22 : vector<128x256xf32>
    %27 = vector.extract_strided_slice %8 {offsets = [16, 0], sizes = [8, 128], strides = [1, 1]} : vector<32x128xf32> to vector<8x128xf32>
    %28 = vector.extract_strided_slice %13 {offsets = [16, 0], sizes = [8, 256], strides = [1, 1]} : vector<64x256xf32> to vector<8x256xf32>
    %cst_21 = arith.constant dense<0.000000e+00> : vector<128x256xf32>
    %29 = tpu.matmul %27, %28, %cst_21 {dimension_numbers = #tpu.dot_dimension_numbers<[0], [0], [1], [1], [0, 1, 1, 1], [], []>} : vector<8x128xf32>, vector<8x256xf32>, vector<128x256xf32> -> vector<128x256xf32>
    %c2 = arith.constant 2 : index
    %c0_22 = arith.constant 0 : index
    %c0_23 = arith.constant 0 : index
    %30 = vector.load %arg11[%c2, %c0_22, %c0_23] : memref<4x128x256xf32, #tpu.memory_space<vmem>>, vector<1x128x256xf32>
    %31 = vector.shape_cast %30 : vector<1x128x256xf32> to vector<128x256xf32>
    %32 = vector.shape_cast %29 : vector<128x256xf32> to vector<1x128x256xf32>
    tpu.vector_store %arg11[%c2, %c0_22, %c0_23], %32 {strides = array<i32>} : memref<4x128x256xf32, #tpu.memory_space<vmem>>, vector<1x128x256xf32>,
    %33 = arith.maximumf %26, %29 : vector<128x256xf32>
    %34 = vector.extract_strided_slice %8 {offsets = [24, 0], sizes = [8, 128], strides = [1, 1]} : vector<32x128xf32> to vector<8x128xf32>
    %35 = vector.extract_strided_slice %13 {offsets = [24, 0], sizes = [8, 256], strides = [1, 1]} : vector<64x256xf32> to vector<8x256xf32>
    %cst_24 = arith.constant dense<0.000000e+00> : vector<128x256xf32>
    %36 = tpu.matmul %34, %35, %cst_24 {dimension_numbers = #tpu.dot_dimension_numbers<[0], [0], [1], [1], [0, 1, 1, 1], [], []>} : vector<8x128xf32>, vector<8x256xf32>, vector<128x256xf32> -> vector<128x256xf32>
    %c3 = arith.constant 3 : index
    %c0_25 = arith.constant 0 : index
    %c0_26 = arith.constant 0 : index
    %37 = vector.load %arg11[%c3, %c0_25, %c0_26] : memref<4x128x256xf32, #tpu.memory_space<vmem>>, vector<1x128x256xf32>
    %38 = vector.shape_cast %37 : vector<1x128x256xf32> to vector<128x256xf32>
    %39 = vector.shape_cast %36 : vector<128x256xf32> to vector<1x128x256xf32>
    tpu.vector_store %arg11[%c3, %c0_25, %c0_26], %39 {strides = array<i32>} : memref<4x128x256xf32, #tpu.memory_space<vmem>>, vector<1x128x256xf32>,
    %40 = arith.maximumf %33, %36 : vector<128x256xf32>
    %c0_27 = arith.constant 0 : index
    %c0_28 = arith.constant 0 : index
    %c0_29 = arith.constant 0 : index
    %41 = vector.load %arg11[%c0_27, %c0_28, %c0_29] : memref<4x128x256xf32, #tpu.memory_space<vmem>>, vector<1x128x256xf32>
    %42 = vector.shape_cast %41 : vector<1x128x256xf32> to vector<128x256xf32>
    %43 = arith.subf %42, %40 : vector<128x256xf32>
    %44 = math.exp %43 : vector<128x256xf32>
    %c0_30 = arith.constant 0 : index
    %c0_31 = arith.constant 0 : index
    %c0_32 = arith.constant 0 : index
    %45 = vector.load %arg11[%c0_30, %c0_31, %c0_32] : memref<4x128x256xf32, #tpu.memory_space<vmem>>, vector<1x128x256xf32>
    %46 = vector.shape_cast %45 : vector<1x128x256xf32> to vector<128x256xf32>
    %47 = vector.shape_cast %44 : vector<128x256xf32> to vector<1x128x256xf32>
    tpu.vector_store %arg11[%c0_30, %c0_31, %c0_32], %47 {strides = array<i32>} : memref<4x128x256xf32, #tpu.memory_space<vmem>>, vector<1x128x256xf32>,
    %c1_33 = arith.constant 1 : index
    %c0_34 = arith.constant 0 : index
    %c0_35 = arith.constant 0 : index
    %48 = vector.load %arg11[%c1_33, %c0_34, %c0_35] : memref<4x128x256xf32, #tpu.memory_space<vmem>>, vector<1x128x256xf32>
    %49 = vector.shape_cast %48 : vector<1x128x256xf32> to vector<128x256xf32>
    %50 = arith.subf %49, %40 : vector<128x256xf32>
    %51 = math.exp %50 : vector<128x256xf32>
    %c1_36 = arith.constant 1 : index
    %c0_37 = arith.constant 0 : index
    %c0_38 = arith.constant 0 : index
    %52 = vector.load %arg11[%c1_36, %c0_37, %c0_38] : memref<4x128x256xf32, #tpu.memory_space<vmem>>, vector<1x128x256xf32>
    %53 = vector.shape_cast %52 : vector<1x128x256xf32> to vector<128x256xf32>
    %54 = vector.shape_cast %51 : vector<128x256xf32> to vector<1x128x256xf32>
    tpu.vector_store %arg11[%c1_36, %c0_37, %c0_38], %54 {strides = array<i32>} : memref<4x128x256xf32, #tpu.memory_space<vmem>>, vector<1x128x256xf32>,
    %55 = arith.addf %44, %51 : vector<128x256xf32>
    %c2_39 = arith.constant 2 : index
    %c0_40 = arith.constant 0 : index
    %c0_41 = arith.constant 0 : index
    %56 = vector.load %arg11[%c2_39, %c0_40, %c0_41] : memref<4x128x256xf32, #tpu.memory_space<vmem>>, vector<1x128x256xf32>
    %57 = vector.shape_cast %56 : vector<1x128x256xf32> to vector<128x256xf32>
    %58 = arith.subf %57, %40 : vector<128x256xf32>
    %59 = math.exp %58 : vector<128x256xf32>
    %c2_42 = arith.constant 2 : index
    %c0_43 = arith.constant 0 : index
    %c0_44 = arith.constant 0 : index
    %60 = vector.load %arg11[%c2_42, %c0_43, %c0_44] : memref<4x128x256xf32, #tpu.memory_space<vmem>>, vector<1x128x256xf32>
    %61 = vector.shape_cast %60 : vector<1x128x256xf32> to vector<128x256xf32>
    %62 = vector.shape_cast %59 : vector<128x256xf32> to vector<1x128x256xf32>
    tpu.vector_store %arg11[%c2_42, %c0_43, %c0_44], %62 {strides = array<i32>} : memref<4x128x256xf32, #tpu.memory_space<vmem>>, vector<1x128x256xf32>,
    %63 = arith.addf %55, %59 : vector<128x256xf32>
    %c3_45 = arith.constant 3 : index
    %c0_46 = arith.constant 0 : index
    %c0_47 = arith.constant 0 : index
    %64 = vector.load %arg11[%c3_45, %c0_46, %c0_47] : memref<4x128x256xf32, #tpu.memory_space<vmem>>, vector<1x128x256xf32>
    %65 = vector.shape_cast %64 : vector<1x128x256xf32> to vector<128x256xf32>
    %66 = arith.subf %65, %40 : vector<128x256xf32>
    %67 = math.exp %66 : vector<128x256xf32>
    %c3_48 = arith.constant 3 : index
    %c0_49 = arith.constant 0 : index
    %c0_50 = arith.constant 0 : index
    %68 = vector.load %arg11[%c3_48, %c0_49, %c0_50] : memref<4x128x256xf32, #tpu.memory_space<vmem>>, vector<1x128x256xf32>
    %69 = vector.shape_cast %68 : vector<1x128x256xf32> to vector<128x256xf32>
    %70 = vector.shape_cast %67 : vector<128x256xf32> to vector<1x128x256xf32>
    tpu.vector_store %arg11[%c3_48, %c0_49, %c0_50], %70 {strides = array<i32>} : memref<4x128x256xf32, #tpu.memory_space<vmem>>, vector<1x128x256xf32>,
    %71 = arith.addf %63, %67 : vector<128x256xf32>
    %72 = tpu.reciprocal %71 {approx = true} : vector<128x256xf32> -> vector<128x256xf32>
    %c0_51 = arith.constant 0 : index
    %c0_52 = arith.constant 0 : index
    %73 = vector.load %arg9[%c0_51, %c0_52] : memref<4x1xf32, #tpu.memory_space<vmem>>, vector<4x1xf32>
    %74 = vector.broadcast %73 : vector<4x1xf32> to vector<4x128xf32>
    %75 = arith.addf %74, %1 : vector<4x128xf32>
    %c0_53 = arith.constant 0 : index
    %c0_54 = arith.constant 0 : index
    %c0_55 = arith.constant 0 : index
    %76 = vector.load %arg11[%c0_53, %c0_54, %c0_55] : memref<4x128x256xf32, #tpu.memory_space<vmem>>, vector<1x128x256xf32>
    %77 = vector.shape_cast %76 : vector<1x128x256xf32> to vector<128x256xf32>
    %78 = arith.mulf %77, %72 : vector<128x256xf32>
    %79 = arith.truncf %78 : vector<128x256xf32> to vector<128x256xbf16>
    %80 = vector.extract_strided_slice %13 {offsets = [32, 0], sizes = [8, 256], strides = [1, 1]} : vector<64x256xf32> to vector<8x256xf32>
    %81 = arith.truncf %80 : vector<8x256xf32> to vector<8x256xbf16>
    %cst_56 = arith.constant dense<0.000000e+00> : vector<8x128xf32>
    %82 = tpu.matmul %81, %79, %cst_56 {dimension_numbers = #tpu.dot_dimension_numbers<[1], [1], [0], [0], [0, 0, 1, 0], [], []>} : vector<8x256xbf16>, vector<128x256xbf16>, vector<8x128xf32> -> vector<8x128xf32>
    %c0_57 = arith.constant 0 : index
    %c0_58 = arith.constant 0 : index
    %83 = vector.load %arg8[%c0_57, %c0_58] : memref<4x32xf32, #tpu.memory_space<vmem>>, vector<4x8xf32>
    %cst_59 = arith.constant dense<0.000000e+00> : vector<4x128xf32>
    %84 = tpu.matmul %83, %82, %cst_59 {dimension_numbers = #tpu.dot_dimension_numbers<[1], [0], [0], [1], [0, 0, 1, 1], [], []>} : vector<4x8xf32>, vector<8x128xf32>, vector<4x128xf32> -> vector<4x128xf32>
    %85 = arith.addf %75, %84 : vector<4x128xf32>
    %c1_60 = arith.constant 1 : index
    %c0_61 = arith.constant 0 : index
    %c0_62 = arith.constant 0 : index
    %86 = vector.load %arg11[%c1_60, %c0_61, %c0_62] : memref<4x128x256xf32, #tpu.memory_space<vmem>>, vector<1x128x256xf32>
    %87 = vector.shape_cast %86 : vector<1x128x256xf32> to vector<128x256xf32>
    %88 = arith.mulf %87, %72 : vector<128x256xf32>
    %89 = arith.truncf %88 : vector<128x256xf32> to vector<128x256xbf16>
    %90 = vector.extract_strided_slice %13 {offsets = [40, 0], sizes = [8, 256], strides = [1, 1]} : vector<64x256xf32> to vector<8x256xf32>
    %91 = arith.truncf %90 : vector<8x256xf32> to vector<8x256xbf16>
    %cst_63 = arith.constant dense<0.000000e+00> : vector<8x128xf32>
    %92 = tpu.matmul %91, %89, %cst_63 {dimension_numbers = #tpu.dot_dimension_numbers<[1], [1], [0], [0], [0, 0, 1, 0], [], []>} : vector<8x256xbf16>, vector<128x256xbf16>, vector<8x128xf32> -> vector<8x128xf32>
    %c0_64 = arith.constant 0 : index
    %c8 = arith.constant 8 : index
    %93 = vector.load %arg8[%c0_64, %c8] : memref<4x32xf32, #tpu.memory_space<vmem>>, vector<4x8xf32>
    %cst_65 = arith.constant dense<0.000000e+00> : vector<4x128xf32>
    %94 = tpu.matmul %93, %92, %cst_65 {dimension_numbers = #tpu.dot_dimension_numbers<[1], [0], [0], [1], [0, 0, 1, 1], [], []>} : vector<4x8xf32>, vector<8x128xf32>, vector<4x128xf32> -> vector<4x128xf32>
    %95 = arith.addf %85, %94 : vector<4x128xf32>
    %c2_66 = arith.constant 2 : index
    %c0_67 = arith.constant 0 : index
    %c0_68 = arith.constant 0 : index
    %96 = vector.load %arg11[%c2_66, %c0_67, %c0_68] : memref<4x128x256xf32, #tpu.memory_space<vmem>>, vector<1x128x256xf32>
    %97 = vector.shape_cast %96 : vector<1x128x256xf32> to vector<128x256xf32>
    %98 = arith.mulf %97, %72 : vector<128x256xf32>
    %99 = arith.truncf %98 : vector<128x256xf32> to vector<128x256xbf16>
    %100 = vector.extract_strided_slice %13 {offsets = [48, 0], sizes = [8, 256], strides = [1, 1]} : vector<64x256xf32> to vector<8x256xf32>
    %101 = arith.truncf %100 : vector<8x256xf32> to vector<8x256xbf16>
    %cst_69 = arith.constant dense<0.000000e+00> : vector<8x128xf32>
    %102 = tpu.matmul %101, %99, %cst_69 {dimension_numbers = #tpu.dot_dimension_numbers<[1], [1], [0], [0], [0, 0, 1, 0], [], []>} : vector<8x256xbf16>, vector<128x256xbf16>, vector<8x128xf32> -> vector<8x128xf32>
    %c0_70 = arith.constant 0 : index
    %c16 = arith.constant 16 : index
    %103 = vector.load %arg8[%c0_70, %c16] : memref<4x32xf32, #tpu.memory_space<vmem>>, vector<4x8xf32>
    %cst_71 = arith.constant dense<0.000000e+00> : vector<4x128xf32>
    %104 = tpu.matmul %103, %102, %cst_71 {dimension_numbers = #tpu.dot_dimension_numbers<[1], [0], [0], [1], [0, 0, 1, 1], [], []>} : vector<4x8xf32>, vector<8x128xf32>, vector<4x128xf32> -> vector<4x128xf32>
    %105 = arith.addf %95, %104 : vector<4x128xf32>
    %c3_72 = arith.constant 3 : index
    %c0_73 = arith.constant 0 : index
    %c0_74 = arith.constant 0 : index
    %106 = vector.load %arg11[%c3_72, %c0_73, %c0_74] : memref<4x128x256xf32, #tpu.memory_space<vmem>>, vector<1x128x256xf32>
    %107 = vector.shape_cast %106 : vector<1x128x256xf32> to vector<128x256xf32>
    %108 = arith.mulf %107, %72 : vector<128x256xf32>
    %109 = arith.truncf %108 : vector<128x256xf32> to vector<128x256xbf16>
    %110 = vector.extract_strided_slice %13 {offsets = [56, 0], sizes = [8, 256], strides = [1, 1]} : vector<64x256xf32> to vector<8x256xf32>
    %111 = arith.truncf %110 : vector<8x256xf32> to vector<8x256xbf16>
    %cst_75 = arith.constant dense<0.000000e+00> : vector<8x128xf32>
    %112 = tpu.matmul %111, %109, %cst_75 {dimension_numbers = #tpu.dot_dimension_numbers<[1], [1], [0], [0], [0, 0, 1, 0], [], []>} : vector<8x256xbf16>, vector<128x256xbf16>, vector<8x128xf32> -> vector<8x128xf32>
    %c0_76 = arith.constant 0 : index
    %c24 = arith.constant 24 : index
    %113 = vector.load %arg8[%c0_76, %c24] : memref<4x32xf32, #tpu.memory_space<vmem>>, vector<4x8xf32>
    %cst_77 = arith.constant dense<0.000000e+00> : vector<4x128xf32>
    %114 = tpu.matmul %113, %112, %cst_77 {dimension_numbers = #tpu.dot_dimension_numbers<[1], [0], [0], [1], [0, 0, 1, 1], [], []>} : vector<4x8xf32>, vector<8x128xf32>, vector<4x128xf32> -> vector<4x128xf32>
    %115 = arith.addf %105, %114 : vector<4x128xf32>
    %c0_78 = arith.constant 0 : index
    %c0_79 = arith.constant 0 : index
    %c0_80 = arith.constant 0 : index
    %116 = vector.load %arg10[%c0_78, %c0_79, %c0_80] : memref<1x4x128xf32, #tpu.memory_space<vmem>>, vector<1x4x128xf32>
    %117 = vector.shape_cast %116 : vector<1x4x128xf32> to vector<4x128xf32>
    %118 = vector.shape_cast %115 : vector<4x128xf32> to vector<1x4x128xf32>
    tpu.vector_store %arg10[%c0_78, %c0_79, %c0_80], %118 {strides = array<i32>} : memref<1x4x128xf32, #tpu.memory_space<vmem>>, vector<1x4x128xf32>,
    return
  }
  func.func @transform_0(%arg0: i32, %arg1: i32) -> (i32, i32, i32) {
    %c0_i32 = arith.constant 0 : i32
    %c0_i32_0 = arith.constant 0 : i32
    return %arg0, %c0_i32, %arg1 : i32, i32, i32
  }
  func.func @transform_1(%arg0: i32, %arg1: i32) -> (i32, i32, i32) {
    %c0_i32 = arith.constant 0 : i32
    %c0_i32_0 = arith.constant 0 : i32
    %c0_i32_1 = arith.constant 0 : i32
    return %arg0, %c0_i32, %c0_i32_0 : i32, i32, i32
  }
  func.func @transform_2(%arg0: i32, %arg1: i32) -> (i32, i32) {
    %c0_i32 = arith.constant 0 : i32
    %c0_i32_0 = arith.constant 0 : i32
    %c0_i32_1 = arith.constant 0 : i32
    return %c0_i32, %c0_i32_0 : i32, i32
  }
  func.func @transform_3(%arg0: i32, %arg1: i32) -> (i32, i32) {
    %c0_i32 = arith.constant 0 : i32
    %c0_i32_0 = arith.constant 0 : i32
    %c0_i32_1 = arith.constant 0 : i32
    return %c0_i32, %c0_i32_0 : i32, i32
  }
  func.func @transform_4(%arg0: i32, %arg1: i32) -> (i32, i32) {
    %c0_i32 = arith.constant 0 : i32
    %c0_i32_0 = arith.constant 0 : i32
    %c0_i32_1 = arith.constant 0 : i32
    return %c0_i32, %c0_i32_0 : i32, i32
  }
  func.func @transform_5(%arg0: i32, %arg1: i32) -> (i32, i32) {
    %c0_i32 = arith.constant 0 : i32
    %c0_i32_0 = arith.constant 0 : i32
    %c0_i32_1 = arith.constant 0 : i32
    return %c0_i32, %c0_i32_0 : i32, i32
  }
  func.func @transform_6(%arg0: i32, %arg1: i32) -> (i32, i32) {
    %c0_i32 = arith.constant 0 : i32
    %c0_i32_0 = arith.constant 0 : i32
    %c0_i32_1 = arith.constant 0 : i32
    return %c0_i32, %c0_i32_0 : i32, i32
  }
  func.func @transform_7(%arg0: i32, %arg1: i32) -> (i32, i32) {
    %c0_i32 = arith.constant 0 : i32
    %c0_i32_0 = arith.constant 0 : i32
    %c0_i32_1 = arith.constant 0 : i32
    return %c0_i32, %c0_i32_0 : i32, i32
  }
  func.func @transform_8(%arg0: i32, %arg1: i32) -> (i32, i32, i32) {
    %c0_i32 = arith.constant 0 : i32
    %c0_i32_0 = arith.constant 0 : i32
    return %arg0, %c0_i32, %arg1 : i32, i32, i32
  }
}

</mosaic_0001>

<bundles_post_ra>
// kernel: tpu_custom_call.1
= control target key start
LH: loop header
LB: loop body
LE: loop exit
PB: predicated region body
PF: predicated region fallthrough
CT: control target
= control target key end

     0   :  { %13 = vsyncpa [#allocation4], 0  ;;  %s6401_s0 = inlined_call_operand.vmem [shape: f32[2,4,256], index: 0, kind: input, shape index: {}]   ;;  %s6402_s1 = inlined_call_operand.vmem [shape: f32[2,4,256], index: 1, kind: input, shape index: {}]   ;;  %s6403_s2 = inlined_call_operand.vmem [shape: f32[32,4], index: 2, kind: input, shape index: {}]   ;;  %s6404_s3 = inlined_call_operand.vmem [shape: f32[32,1], index: 3, kind: input, shape index: {}]   ;;  %s6405_s4 = inlined_call_operand.vmem [shape: f32[64,4], index: 4, kind: input, shape index: {}]   ;;  %s6406_s5 = inlined_call_operand.vmem [shape: f32[64,1], index: 5, kind: input, shape index: {}]   ;;  %s6407_s6 = inlined_call_operand.vmem [shape: f32[4,32], index: 6, kind: input, shape index: {}]   ;;  %s6408_s7 = inlined_call_operand.vmem [shape: f32[4,1], index: 7, kind: input, shape index: {}]   ;;  %s6409_s8 = inlined_call_operand.hbm [shape: f32[2,4,256], index: 8, kind: output, shape index: {}]  }
   0x1   :  { %15 = vsyncpa [#allocation4 + $0x1], 0  ;;  %s4233_s27 = smov 0   ;;  %s4235_s28 = smov 0  }
   0x2   :  { %s4237_s29 = smov 0   ;;  %s4239_s30 = smov 0  }
   0x3   :  { %s4241_s9 = smov 0   ;;  %s4243_s10 = smov 0  }
   0x4   :  { %s4245_s11 = smov 0   ;;  %s4247_s12 = smov 0  }
   0x5 LB: > { %6611 = sst [smem:[#allocation6_spill]] %s4159_s29  ;;  %s3543_s13 = sadd.s32 4294967295, %s4179_s12   ;;  %s4179_s12 = sphi %s4247_s12, %s21_s12   ;;  %s4175_s11 = sphi %s4245_s11, %s7088_s11   ;;  %s4171_s10 = sphi %s4243_s10, %s7087_s10   ;;  %s4167_s9 = sphi %s4241_s9, %s7086_s9   ;;  %s4163_s30 = sphi %s4239_s30, %s7085_s30   ;;  %s4159_s29 = sphi %s4237_s29, %s7084_s29   ;;  %s4155_s28 = sphi %s4235_s28, %s7090_s28   ;;  %s4151_s27 = sphi %s4233_s27, %s7089_s27  }
   0x6   : > { %6612 = sst [smem:[#allocation7_spill]] %s4171_s10  ;;  %s3544_s14 = sadd.s32 4294967294, %s4179_s12  }
   0x7   : > { %6613 = sst [smem:[#allocation8_spill]] %s4175_s11  ;;  %s30_s15 = sadd.s32 1, %s4171_s10 }
   0x8   : > { %p31_p0 = scmp.ge.s32.totalorder %s30_s15, 2  ;;  %s33_s16 = sadd.s32 1, %s4175_s11 }
   0x9   : > { %p232_p1 = scmp.ne.s32.totalorder %s4159_s29, %s4155_s28  ;;  %p233_p2 = scmp.eq.s32.totalorder %s3543_s13, 3 }
   0xa   : > { %s7092_s15 = smov (%p31_p0, %s30_s15), 0  ;;  %s7094_s16 = smov (!%p31_p0, %s33_s16), %s4175_s11 }
   0xb   : > { %6614 = sst [smem:[#allocation9_spill]] %s7092_s15  ;;  %s218_s17 = ssub.s32 %s4171_s10, %s7092_s15 }
   0xc   : > { %p4284_p3 = por %p233_p2, %p232_p1  ;;  %p35_p4 = scmp.ge.s32.totalorder %s7094_s16, 2 }
   0xd   : > { %p238_p5 = scmp.ne.s32.totalorder %s4155_s28, %s4151_s27  ;;  %p239_p6 = scmp.eq.s32.totalorder %s3544_s14, 3 }
   0xe   : > { %p3547_p7 = scmp.ge.s32.totalorder %s4179_s12, 1  ;;  %s7096_s16 = smov (%p35_p4, %s7094_s16), 0 }
   0xf   : > { %6616 = sst [smem:[#allocation10_spill]] %s7096_s16  ;;  %p4293_p8 = por %p239_p6, %p238_p5 }
  0x10   : > { %p294_p9 = scmp.lt.s32.totalorder %s4179_s12, 5  ;;  %s217_s20 = ssub.s32 %s4175_s11, %s7096_s16 }
  0x11   : > { %s222_s21 = sadd.s32 1, %s4159_s29  ;;  %s219_s22 = sor.u32 %s218_s17, %s217_s20 }
  0x12   : > { %p295_p10 = pnand %p3547_p7, %p294_p9  ;;  %p220_p11 = scmp.eq.s32.totalorder %s219_s22, 0 }
  0x14   : > { %s4302_s23 = scalar_select %p220_p11, %s4159_s29, %s222_s21  }
  0x15   : > { %298 = sbr.rel (%p295_p10) target bundleno = 1869 (0x74d), region = 52 }
  0x16   : > { %6618 = sst [smem:[#allocation11_spill]] %s4302_s23 }
  0x1a   : > { %p336_p12 = scmp.lt.s32.totalorder %s4167_s9, 1  ;;  %p338_p13 = scmp.lt.s32.totalorder %s4163_s30, 1  ;;  %v352_v0 = vld [vmem:[%s6403_s2] sm:$0xff]  ;;  %vm380_vm0 = vcmask 31744   ;;  %v4181_v2 = vmov 0   ;;  %v6415_v4 = vmov 0.0  }
  0x1b   : > { %3657 = vmatprep.mubr.msk.f32.mxu0 %vm380_vm0, %v352_v0  ;;  %v356_v1 = vld [vmem:[%s6404_s3] sm:$0xff]  ;;  %3762 = vset.pattern.permute.xlu0 %v4181_v2  ;;  %v357_v5 = vld [vmem:[%s6404_s3 + $0x8] sm:$0xff]  ;;  %vm393_vm1 = vcmask 1043456   ;;  %v358_v11 = vld [vmem:[%s6404_s3 + $0x10] sm:$0xff]  ;;  %vm713_vm2 = vcmask 64512   ;;  %s4183_s29 = smov 120  }
  0x1c   : > { %s337_s14 = scalar_select %p336_p12, %s4167_s9, 1  ;;  %3763 = vset.pattern.permute.xlu1 %v4181_v2  ;;  %362 = vperm.xlu0 %3762, %v356_v1   ;;  %v490_v3 = vld [vmem:[%s6406_s5] sm:$0xff]  ;;  %v491_v6 = vld [vmem:[%s6406_s5 + $0x8] sm:$0xff]  ;;  %v354_v12 = vld [vmem:[%s6403_s2 + $0x10] sm:$0xff]  ;;  %vm4184_vm3 = vmmov 0  }
  0x1d   : > { %s339_s17 = scalar_select %p338_p13, %s4163_s30, 1  ;;  %644 = vmatprep.mubr.f32.mxu1 %v6415_v4  ;;  %500 = vperm.xlu1 %3763, %v490_v3   ;;  %v353_v10 = vld [vmem:[%s6403_s2 + $0x8] sm:$0xff]  ;;  %v355_v13 = vld [vmem:[%s6403_s2 + $0x18] sm:$0xff]  ;;  %v482_v15 = vld [vmem:[%s6405_s4] sm:$0xff] }
  0x1e   : > { %s3549_s22 = sshll.u32 %s337_s14, 1  ;;  %s3641_s24 = sshll.u32 %s337_s14, 3  ;;  %v359_v14 = vld [vmem:[%s6404_s3 + $0x18] sm:$0xff]  ;;  %v483_v16 = vld [vmem:[%s6405_s4 + $0x8] sm:$0xff]  ;;  %v484_v17 = vld [vmem:[%s6405_s4 + $0x10] sm:$0xff] }
  0x1f   : > { %s341_s26 = sadd.s32 %s3549_s22, %s339_s17  ;;  %s348_s11 = scalar_lea.vmem %s6402_s1, %s3641_s24  ;;  %v485_v18 = vld [vmem:[%s6405_s4 + $0x18] sm:$0xff]  ;;  %v486_v29 = vld [vmem:[%s6405_s4 + $0x20] sm:$0xff]  ;;  %v487_v32 = vld [vmem:[%s6405_s4 + $0x28] sm:$0xff] }
  0x20   : > { %s3550_s20 = sshll.u32 %s341_s26, 2  ;;  %v351_v7 = vld [vmem:[%s348_s11] sm:$0xff]  ;;  %367 = vperm.xlu0 %3762, %v357_v5   ;;  %v488_v38 = vld [vmem:[%s6405_s4 + $0x30] sm:$0xff]  ;;  %v489_v40 = vld [vmem:[%s6405_s4 + $0x38] sm:$0xff]  ;;  %s4185_s22 = smov 112  }
  0x21   : > { %s4331_s14 = scalar_lea.vmem %s6401_s0, %s3550_s20  ;;  %v539_v8 = vcombine.high %v351_v7, %v351_v7  ;;  %505 = vperm.xlu1 %3763, %v491_v6   ;;  %v493_v41 = vld [vmem:[%s6406_s5 + $0x18] sm:$0xff]  ;;  %v492_v42 = vld [vmem:[%s6406_s5 + $0x10] sm:$0xff]  ;;  %s4186_s10 = smov 104  }
  0x22   : > { %v350_v9 = vld [vmem:[%s4331_s14] sm:$0xf] }
  0x23   : > { %3655 = vmatprep.subr.msk.mxu0 %vm393_vm1, %v350_v9  ;;  %3683 = vmatprep.subr.msk.mxu1 %vm393_vm1, %v539_v8 }
  0x24   : > { %3656 = vmatpush3.msk.msra.mxu0 %vm393_vm1, %v350_v9  ;;  %3684 = vmatpush1.msk.msra.mxu1 %vm393_vm1, %v351_v7 }
  0x25   : > { %3658 = vmatmul.mubr.msk.f32.vlgmr.msra.gmra.mxu0 %vm380_vm0, %v353_v10  ;;  %372 = vperm.xlu0 %3762, %v358_v11  }
  0x26   : > { %3660 = vmatprep.mubr.msk.f32.mxu0 %vm380_vm0, %v354_v12  ;;  %3558 = vmatprep.subr.msk.mxu0 %vm393_vm1, %v539_v8 }
  0x27   : > { %3559 = vmatpush1.msk.msra.mxu0 %vm393_vm1, %v351_v7  ;;  %3562 = vmatmul.mubr.msk.f32.vlgmr.msra.gmra.mxu1 %vm380_vm0, %v484_v17 }
  0x28   : > { %650 = vmatprep.mubr.f32.mxu1 %v6415_v4 }
  0x29   : > { %3661 = vmatmul.mubr.msk.f32.gmra.mxu0 %vm380_vm0, %v355_v13  ;;  %377 = vperm.xlu0 %3762, %v359_v14  }
  0x2a   : > { %632 = vmatprep.mubr.f32.mxu0 %v6415_v4 }
  0x2b   : > { %3563 = vmatmul.mubr.msk.f32.gmra.mxu1 %vm380_vm0, %v485_v18 }
  0x2c   : > { %656 = vmatprep.mubr.f32.mxu1 %v6415_v4 }
  0x2d   : > { %3560 = vmatmul.mubr.msk.f32.vlgmr.msra.gmra.mxu0 %vm380_vm0, %v482_v15 }
  0x2e   : > { %638 = vmatprep.mubr.f32.mxu0 %v6415_v4 }
  0x2f   : > { %3564 = vmatmul.mubr.msk.f32.gmra.mxu1 %vm380_vm0, %v486_v29  ;;  %v494_v29 = vld [vmem:[%s6406_s5 + $0x20] sm:$0xff] }
  0x30   : > { %662 = vmatprep.mubr.f32.mxu1 %v6415_v4 }
  0x31   : > { %3561 = vmatmul.mubr.msk.f32.gmra.mxu0 %vm380_vm0, %v483_v16 }
  0x32   : > { %826 = vmatprep.mubr.f32.mxu0 %v6415_v4 }
  0x33   : > { %3565 = vmatmul.mubr.msk.f32.gmra.mxu1 %vm380_vm0, %v487_v32 }
  0x34   : > { %668 = vmatprep.mubr.f32.mxu1 %v6415_v4 }
  0x37   : > { %3566 = vmatmul.mubr.msk.f32.gmra.mxu1 %vm380_vm0, %v488_v38 }
  0x38   : > { %674 = vmatprep.mubr.f32.mxu1 %v6415_v4 }
  0x3b   : > { %3567 = vmatmul.mubr.msk.f32.gmra.mxu1 %vm380_vm0, %v489_v40 }
  0x3c   : > { %1099 = vmatprep.mubr.f32.mxu1 %v6415_v4 }
  0x97   : > { %v363_v19 = vpop.permute.xlu0 %362 }
  0x98   : > { %v501_v26 = vpop.permute.xlu1 %500 }
  0x9b   : > { %v368_v20 = vpop.permute.xlu0 %367 }
  0x9c   : > { %v506_v34 = vpop.permute.xlu1 %505 }
  0xa0   : > { %v373_v43 = vpop.permute.xlu0 %372 }
  0xa4   : > { %v378_v44 = vpop.permute.xlu0 %377 }
  0xe5   : > { %v3659_v21 = vpop.f32.mrf.mxu0 }
  0xe6   : > { %v469_v22 = vadd.f32 %v3659_v21, %v368_v20 }
  0xe7   : > { %v463_v23 = vpop.f32.mrf.mxu0  ;;  %v646_v16 = vpop.f32.mrf.mxu1 }
  0xe8   : > { %v464_v24 = vadd.f32 %v463_v23, %v363_v19  ;;  %955 = vxpose.xlu0.b32.start.end [1/1] (short) %v469_v22, 128  ;;  %v495_v23 = vld [vmem:[%s6406_s5 + $0x28] sm:$0xff] }
  0xe9   : > { %v3662_v25 = vpop.f32.mrf.mxu0  ;;  %v648_v17 = vpop.f32.mrf.mxu1 }
  0xea   : > { %681 = vxpose.xlu1.b32.start.end [1/1] (short) %v464_v24, 128  ;;  %v479_v48 = vadd.f32 %v3662_v25, %v378_v44  ;;  %v2770_v25 = vld [vmem:[%s6407_s6] sm:$0xf] }
  0xeb   : > { %v473_v27 = vpop.f32.mrf.mxu0  ;;  %v652_v18 = vpop.f32.mrf.mxu1 }
  0xec   : > { %v474_v50 = vadd.f32 %v473_v27, %v373_v43 }
  0xed   : > { %v634_v28 = vpop.f32.mrf.mxu0  ;;  %v654_v19 = vpop.f32.mrf.mxu1 }
  0xee   : > { %v635_v30 = vadd.f32 %v634_v28, %v501_v26  ;;  %v496_v28 = vld [vmem:[%s6406_s5 + $0x30] sm:$0xff] }
  0xef   : > { %v636_v31 = vpop.f32.mrf.mxu0 }
  0xf0   : > { %v637_v33 = vadd.f32 %v636_v31, %v501_v26  ;;  %v2641_v31 = vld [vmem:[%s6408_s7] sm:$0xf] }
  0xf1   : > { %v640_v35 = vpop.f32.mrf.mxu0 }
  0xf2   : > { %792 = vmatprep.subr.mxu0 %v637_v33  ;;  %v641_v36 = vadd.f32 %v640_v35, %v506_v34 }
  0xf3   : > { %v642_v37 = vpop.f32.mrf.mxu0  ;;  %793 = vmatpush1.msra.mxu0 %v635_v30  ;;  %v497_v30 = vld [vmem:[%s6406_s5 + $0x38] sm:$0xff] }
  0xf4   : > { %v643_v39 = vadd.f32 %v642_v37, %v506_v34 }
  0xf6   : > { %1065 = vmatprep.subr.mxu1 %v643_v39 }
  0xf7   : > { %1066 = vmatpush1.msra.mxu1 %v641_v36 }
 0x144   : > { %515 = vperm.xlu1 %3763, %v493_v41  }
 0x14d   : > { %510 = vperm.xlu0 %3762, %v492_v42  }
 0x164   : > { %v971_v45 = vpop.trf.xlu0 }
 0x165   : > { %3584 = vmatmul.mubr.msk.f32.vlgmr.msra.gmra.mxu1 %vm713_vm2, %v971_v45 }
 0x166   : > { %v697_v46 = vpop.trf.xlu1  ;;  %1105 = vmatprep.mubr.f32.mxu1 %v6415_v4 }
 0x167   : > { %3568 = vmatmul.mubr.msk.f32.vlgmr.msra.gmra.mxu0 %vm713_vm2, %v697_v46 }
 0x168   : > { %v972_v47 = vpop.trf.xlu0  ;;  %832 = vmatprep.mubr.f32.mxu0 %v6415_v4 }
 0x169   : > { %3585 = vmatmul.mubr.msk.f32.gmra.mxu1 %vm713_vm2, %v972_v47 }
 0x16a   : > { %v698_v49 = vpop.trf.xlu1  ;;  %1111 = vmatprep.mubr.f32.mxu1 %v6415_v4 }
 0x16b   : > { %1567 = vxpose.xlu0.b32.start.end [1/1] (short) %v479_v48, 128  ;;  %3569 = vmatmul.mubr.msk.f32.gmra.mxu0 %vm713_vm2, %v698_v49 }
 0x16c   : > { %v973_v51 = vpop.trf.xlu0  ;;  %838 = vmatprep.mubr.f32.mxu0 %v6415_v4 }
 0x16d   : > { %1261 = vxpose.xlu1.b32.start.end [1/1] (short) %v474_v50, 128  ;;  %3586 = vmatmul.mubr.msk.f32.gmra.mxu1 %vm713_vm2, %v973_v51 }
 0x16e   : > { %v699_v52 = vpop.trf.xlu1  ;;  %1117 = vmatprep.mubr.f32.mxu1 %v6415_v4 }
 0x16f   : > { %3570 = vmatmul.mubr.msk.f32.gmra.mxu0 %vm713_vm2, %v699_v52  ;;  %v4526_v52 = vpop.f32.mrf.mxu1 }
 0x170   : > { %v974_v53 = vpop.trf.xlu0  ;;  %844 = vmatprep.mubr.f32.mxu0 %v6415_v4  ;;  %6619 = vst [vmem:[#allocation12_spill] sm:$0xff] %v4526_v52 }
 0x171   : > { %3587 = vmatmul.mubr.msk.f32.gmra.mxu1 %vm713_vm2, %v974_v53 }
 0x172   : > { %v700_v54 = vpop.trf.xlu1  ;;  %1123 = vmatprep.mubr.f32.mxu1 %v6415_v4 }
 0x173   : > { %3571 = vmatmul.mubr.msk.f32.gmra.mxu0 %vm713_vm2, %v700_v54 }
 0x174   : > { %v975_v55 = vpop.trf.xlu0  ;;  %850 = vmatprep.mubr.f32.mxu0 %v6415_v4 }
 0x175   : > { %3588 = vmatmul.mubr.msk.f32.gmra.mxu1 %vm713_vm2, %v975_v55  ;;  %v660_v55 = vpop.f32.mrf.mxu1 }
 0x176   : > { %v701_v56 = vpop.trf.xlu1  ;;  %1129 = vmatprep.mubr.f32.mxu1 %v6415_v4 }
 0x177   : > { %3572 = vmatmul.mubr.msk.f32.gmra.mxu0 %vm713_vm2, %v701_v56 }
 0x178   : > { %v976_v57 = vpop.trf.xlu0  ;;  %856 = vmatprep.mubr.f32.mxu0 %v6415_v4 }
 0x179   : > { %3589 = vmatmul.mubr.msk.f32.gmra.mxu1 %vm713_vm2, %v976_v57 }
 0x17a   : > { %v702_v58 = vpop.trf.xlu1  ;;  %1135 = vmatprep.mubr.f32.mxu1 %v6415_v4 }
 0x17b   : > { %3573 = vmatmul.mubr.msk.f32.gmra.mxu0 %vm713_vm2, %v702_v58  ;;  %v4536_v58 = vpop.f32.mrf.mxu1 }
 0x17c   : > { %v977_v59 = vpop.trf.xlu0  ;;  %862 = vmatprep.mubr.f32.mxu0 %v6415_v4  ;;  %6620 = vst [vmem:[#allocation13_spill] sm:$0xff] %v4536_v58 }
 0x17d   : > { %3590 = vmatmul.mubr.msk.f32.gmra.mxu1 %vm713_vm2, %v977_v59 }
 0x17e   : > { %v703_v60 = vpop.trf.xlu1  ;;  %1141 = vmatprep.mubr.f32.mxu1 %v6415_v4 }
 0x17f   : > { %3574 = vmatmul.mubr.msk.f32.gmra.mxu0 %vm713_vm2, %v703_v60 }
 0x180   : > { %v978_v61 = vpop.trf.xlu0  ;;  %868 = vmatprep.mubr.f32.mxu0 %v6415_v4 }
 0x181   : > { %3591 = vmatmul.mubr.msk.f32.gmra.mxu1 %vm713_vm2, %v978_v61  ;;  %v666_v61 = vpop.f32.mrf.mxu1 }
 0x182   : > { %v704_v62 = vpop.trf.xlu1  ;;  %1147 = vmatprep.mubr.f32.mxu1 %v6415_v4 }
 0x183   : > { %3575 = vmatmul.mubr.msk.f32.gmra.mxu0 %vm713_vm2, %v704_v62 }
 0x184   : > { %v979_v63 = vpop.trf.xlu0  ;;  %874 = vmatprep.mubr.f32.mxu0 %v6415_v4 }
 0x185   : > { %3592 = vmatmul.mubr.msk.f32.gmra.mxu1 %vm713_vm2, %v979_v63  ;;  %v4544_v63 = vpop.f32.mrf.mxu1 }
 0x186   : > { %v705_v0 = vpop.trf.xlu1  ;;  %1153 = vmatprep.mubr.f32.mxu1 %v6415_v4  ;;  %6621 = vst [vmem:[#allocation14_spill] sm:$0xff] %v4544_v63 }
 0x187   : > { %3576 = vmatmul.mubr.msk.f32.gmra.mxu0 %vm713_vm2, %v705_v0 }
 0x188   : > { %v980_v1 = vpop.trf.xlu0  ;;  %880 = vmatprep.mubr.f32.mxu0 %v6415_v4 }
 0x189   : > { %3593 = vmatmul.mubr.msk.f32.gmra.mxu1 %vm713_vm2, %v980_v1 }
 0x18a   : > { %v706_v2 = vpop.trf.xlu1  ;;  %1159 = vmatprep.mubr.f32.mxu1 %v6415_v4 }
 0x18b   : > { %3577 = vmatmul.mubr.msk.f32.gmra.mxu0 %vm713_vm2, %v706_v2  ;;  %v4550_v2 = vpop.f32.mrf.mxu1 }
 0x18c   : > { %v981_v3 = vpop.trf.xlu0  ;;  %886 = vmatprep.mubr.f32.mxu0 %v6415_v4  ;;  %6622 = vst [vmem:[#allocation15_spill] sm:$0xff] %v4550_v2 }
 0x18d   : > { %3594 = vmatmul.mubr.msk.f32.gmra.mxu1 %vm713_vm2, %v981_v3 }
 0x18e   : > { %v707_v5 = vpop.trf.xlu1  ;;  %1165 = vmatprep.mubr.f32.mxu1 %v6415_v4 }
 0x18f   : > { %3578 = vmatmul.mubr.msk.f32.gmra.mxu0 %vm713_vm2, %v707_v5 }
 0x190   : > { %v982_v6 = vpop.trf.xlu0  ;;  %892 = vmatprep.mubr.f32.mxu0 %v6415_v4 }
 0x191   : > { %3595 = vmatmul.mubr.msk.f32.gmra.mxu1 %vm713_vm2, %v982_v6  ;;  %v4556_v6 = vpop.f32.mrf.mxu1 }
 0x192   : > { %v708_v7 = vpop.trf.xlu1  ;;  %1171 = vmatprep.mubr.f32.mxu1 %v6415_v4  ;;  %6623 = vst [vmem:[#allocation16_spill] sm:$0xff] %v4556_v6 }
 0x193   : > { %3579 = vmatmul.mubr.msk.f32.gmra.mxu0 %vm713_vm2, %v708_v7 }
 0x194   : > { %v983_v8 = vpop.trf.xlu0  ;;  %898 = vmatprep.mubr.f32.mxu0 %v6415_v4 }
 0x195   : > { %3596 = vmatmul.mubr.msk.f32.gmra.mxu1 %vm713_vm2, %v983_v8  ;;  %v4559_v8 = vpop.f32.mrf.mxu1 }
 0x196   : > { %v709_v9 = vpop.trf.xlu1  ;;  %1177 = vmatprep.mubr.f32.mxu1 %v6415_v4  ;;  %6624 = vst [vmem:[#allocation17_spill] sm:$0xff] %v4559_v8 }
 0x197   : > { %3580 = vmatmul.mubr.msk.f32.gmra.mxu0 %vm713_vm2, %v709_v9 }
 0x198   : > { %v984_v10 = vpop.trf.xlu0  ;;  %904 = vmatprep.mubr.f32.mxu0 %v6415_v4 }
 0x199   : > { %3597 = vmatmul.mubr.msk.f32.gmra.mxu1 %vm713_vm2, %v984_v10 }
 0x19a   : > { %v710_v11 = vpop.trf.xlu1  ;;  %1183 = vmatprep.mubr.f32.mxu1 %v6415_v4 }
 0x19b   : > { %3581 = vmatmul.mubr.msk.f32.gmra.mxu0 %vm713_vm2, %v710_v11 }
 0x19c   : > { %v985_v12 = vpop.trf.xlu0  ;;  %910 = vmatprep.mubr.f32.mxu0 %v6415_v4 }
 0x19d   : > { %3598 = vmatmul.mubr.msk.f32.gmra.mxu1 %vm713_vm2, %v985_v12 }
 0x19e   : > { %v711_v13 = vpop.trf.xlu1  ;;  %1189 = vmatprep.mubr.f32.mxu1 %v6415_v4 }
 0x19f   : > { %3582 = vmatmul.mubr.msk.f32.gmra.mxu0 %vm713_vm2, %v711_v13 }
 0x1a0   : > { %v986_v14 = vpop.trf.xlu0  ;;  %916 = vmatprep.mubr.f32.mxu0 %v6415_v4 }
 0x1a1   : > { %3599 = vmatmul.mubr.msk.f32.gmra.mxu1 %vm713_vm2, %v986_v14 }
 0x1a2   : > { %v712_v15 = vpop.trf.xlu1  ;;  %1711 = vmatprep.mubr.f32.mxu1 %v6415_v4 }
 0x1a3   : > { %3583 = vmatmul.mubr.msk.f32.gmra.mxu0 %vm713_vm2, %v712_v15 }
 0x1a4   : > { %1405 = vmatprep.mubr.f32.mxu0 %v6415_v4 }
 0x1bf   : > { %v516_v20 = vpop.permute.xlu1 %515 }
 0x1c0   : > { %v653_v21 = vadd.f32 %v652_v18, %v516_v20  ;;  %v655_v22 = vadd.f32 %v654_v19, %v516_v20 }
 0x1c2   : > { %1677 = vmatprep.subr.mxu1 %v655_v22 }
 0x1c3   : > { %1678 = vmatpush1.msra.mxu1 %v653_v21 }
 0x1c7   : > { %525 = vperm.xlu1 %3763, %v495_v23  }
 0x1c8   : > { %v511_v24 = vpop.permute.xlu0 %510 }
 0x1c9   : > { %v647_v26 = vadd.f32 %v646_v16, %v511_v24  ;;  %v649_v27 = vadd.f32 %v648_v17, %v511_v24 }
 0x1cb   : > { %1371 = vmatprep.subr.mxu0 %v649_v27  ;;  %2967 = vrot.lane.b32.xlu1 %v2770_v25, %s4183_s29  ;;  %s3637_s29 = sshll.u32 %s4167_s9, 1 }
 0x1cc   : > { %1372 = vmatpush1.msra.mxu0 %v647_v26  ;;  %s3449_s23 = sadd.s32 %s4163_s30, %s3637_s29  ;;  %s4187_s30 = smov [#allocation3]  }
 0x1cd   : > { %s3638_s24 = sshll.u32 %s3449_s23, 6  ;;  %s4091_s9 = sshll.u32 %s4187_s30, 4  ;;  %s4092_s9 = int_to_ptr.vmem [resolvable:$false] %s4091_s9 }
 0x1ce   : > { %s6355_s21 = scalar_lea.hbm %s6409_s8, %s3638_s24  ;;  %s4093_s15 = scalar_lea.vmem %s4092_s9, 128 }
 0x1cf   : > { %530 = vperm.xlu1 %3763, %v496_v28  }
 0x1d0   : > { %520 = vperm.xlu0 %3762, %v494_v29  }
 0x1d3   : > { %535 = vperm.xlu1 %3763, %v497_v30  }
 0x1d7   : > { %2644 = vperm.xlu1 %3763, %v2641_v31  }
 0x1e7   : > { %v1583_v32 = vpop.trf.xlu0 }
 0x1e8   : > { %3616 = vmatmul.mubr.msk.f32.vlgmr.msra.gmra.mxu1 %vm713_vm2, %v1583_v32 }
 0x1e9   : > { %v1277_v33 = vpop.trf.xlu1  ;;  %1717 = vmatprep.mubr.f32.mxu1 %v6415_v4 }
 0x1ea   : > { %3600 = vmatmul.mubr.msk.f32.vlgmr.msra.gmra.mxu0 %vm713_vm2, %v1277_v33 }
 0x1eb   : > { %1411 = vmatprep.mubr.f32.mxu0 %v6415_v4  ;;  %v1584_v34 = vpop.trf.xlu0 }
 0x1ec   : > { %3617 = vmatmul.mubr.msk.f32.gmra.mxu1 %vm713_vm2, %v1584_v34 }
 0x1ed   : > { %v1278_v35 = vpop.trf.xlu1  ;;  %1723 = vmatprep.mubr.f32.mxu1 %v6415_v4 }
 0x1ee   : > { %3601 = vmatmul.mubr.msk.f32.gmra.mxu0 %vm713_vm2, %v1278_v35 }
 0x1ef   : > { %1417 = vmatprep.mubr.f32.mxu0 %v6415_v4  ;;  %v1585_v36 = vpop.trf.xlu0 }
 0x1f0   : > { %3618 = vmatmul.mubr.msk.f32.gmra.mxu1 %vm713_vm2, %v1585_v36 }
 0x1f1   : > { %v1279_v37 = vpop.trf.xlu1  ;;  %1729 = vmatprep.mubr.f32.mxu1 %v6415_v4 }
 0x1f2   : > { %3602 = vmatmul.mubr.msk.f32.gmra.mxu0 %vm713_vm2, %v1279_v37 }
 0x1f3   : > { %1423 = vmatprep.mubr.f32.mxu0 %v6415_v4  ;;  %v1586_v38 = vpop.trf.xlu0 }
 0x1f4   : > { %3619 = vmatmul.mubr.msk.f32.gmra.mxu1 %vm713_vm2, %v1586_v38 }
 0x1f5   : > { %v1280_v39 = vpop.trf.xlu1  ;;  %1735 = vmatprep.mubr.f32.mxu1 %v6415_v4 }
 0x1f6   : > { %3603 = vmatmul.mubr.msk.f32.gmra.mxu0 %vm713_vm2, %v1280_v39 }
 0x1f7   : > { %1429 = vmatprep.mubr.f32.mxu0 %v6415_v4  ;;  %v1587_v40 = vpop.trf.xlu0 }
 0x1f8   : > { %3620 = vmatmul.mubr.msk.f32.gmra.mxu1 %vm713_vm2, %v1587_v40 }
 0x1f9   : > { %v1281_v41 = vpop.trf.xlu1  ;;  %1741 = vmatprep.mubr.f32.mxu1 %v6415_v4 }
 0x1fa   : > { %3604 = vmatmul.mubr.msk.f32.gmra.mxu0 %vm713_vm2, %v1281_v41 }
 0x1fb   : > { %1435 = vmatprep.mubr.f32.mxu0 %v6415_v4  ;;  %v1588_v42 = vpop.trf.xlu0 }
 0x1fc   : > { %3621 = vmatmul.mubr.msk.f32.gmra.mxu1 %vm713_vm2, %v1588_v42 }
 0x1fd   : > { %v1282_v43 = vpop.trf.xlu1  ;;  %1747 = vmatprep.mubr.f32.mxu1 %v6415_v4 }
 0x1fe   : > { %3605 = vmatmul.mubr.msk.f32.gmra.mxu0 %vm713_vm2, %v1282_v43 }
 0x1ff   : > { %1441 = vmatprep.mubr.f32.mxu0 %v6415_v4  ;;  %v1589_v44 = vpop.trf.xlu0 }
 0x200   : > { %3622 = vmatmul.mubr.msk.f32.gmra.mxu1 %vm713_vm2, %v1589_v44 }
 0x201   : > { %v1283_v45 = vpop.trf.xlu1  ;;  %1753 = vmatprep.mubr.f32.mxu1 %v6415_v4 }
 0x202   : > { %3606 = vmatmul.mubr.msk.f32.gmra.mxu0 %vm713_vm2, %v1283_v45 }
 0x203   : > { %1447 = vmatprep.mubr.f32.mxu0 %v6415_v4  ;;  %v1590_v46 = vpop.trf.xlu0 }
 0x204   : > { %3623 = vmatmul.mubr.msk.f32.gmra.mxu1 %vm713_vm2, %v1590_v46 }
 0x205   : > { %v1284_v47 = vpop.trf.xlu1  ;;  %1759 = vmatprep.mubr.f32.mxu1 %v6415_v4 }
 0x206   : > { %3607 = vmatmul.mubr.msk.f32.gmra.mxu0 %vm713_vm2, %v1284_v47 }
 0x207   : > { %1453 = vmatprep.mubr.f32.mxu0 %v6415_v4  ;;  %v1591_v48 = vpop.trf.xlu0 }
 0x208   : > { %3624 = vmatmul.mubr.msk.f32.gmra.mxu1 %vm713_vm2, %v1591_v48 }
 0x209   : > { %v1285_v49 = vpop.trf.xlu1  ;;  %1765 = vmatprep.mubr.f32.mxu1 %v6415_v4 }
 0x20a   : > { %3608 = vmatmul.mubr.msk.f32.gmra.mxu0 %vm713_vm2, %v1285_v49 }
 0x20b   : > { %1459 = vmatprep.mubr.f32.mxu0 %v6415_v4  ;;  %v1592_v50 = vpop.trf.xlu0 }
 0x20c   : > { %3625 = vmatmul.mubr.msk.f32.gmra.mxu1 %vm713_vm2, %v1592_v50 }
 0x20d   : > { %v1286_v51 = vpop.trf.xlu1  ;;  %1771 = vmatprep.mubr.f32.mxu1 %v6415_v4 }
 0x20e   : > { %3609 = vmatmul.mubr.msk.f32.gmra.mxu0 %vm713_vm2, %v1286_v51 }
 0x20f   : > { %1465 = vmatprep.mubr.f32.mxu0 %v6415_v4  ;;  %v1593_v53 = vpop.trf.xlu0 }
 0x210   : > { %3626 = vmatmul.mubr.msk.f32.gmra.mxu1 %vm713_vm2, %v1593_v53 }
 0x211   : > { %v1287_v54 = vpop.trf.xlu1  ;;  %1777 = vmatprep.mubr.f32.mxu1 %v6415_v4 }
 0x212   : > { %3610 = vmatmul.mubr.msk.f32.gmra.mxu0 %vm713_vm2, %v1287_v54 }
 0x213   : > { %1471 = vmatprep.mubr.f32.mxu0 %v6415_v4  ;;  %v1594_v56 = vpop.trf.xlu0 }
 0x214   : > { %3627 = vmatmul.mubr.msk.f32.gmra.mxu1 %vm713_vm2, %v1594_v56 }
 0x215   : > { %v1288_v57 = vpop.trf.xlu1  ;;  %1783 = vmatprep.mubr.f32.mxu1 %v6415_v4 }
 0x216   : > { %3611 = vmatmul.mubr.msk.f32.gmra.mxu0 %vm713_vm2, %v1288_v57 }
 0x217   : > { %1477 = vmatprep.mubr.f32.mxu0 %v6415_v4  ;;  %v1595_v59 = vpop.trf.xlu0 }
 0x218   : > { %3628 = vmatmul.mubr.msk.f32.gmra.mxu1 %vm713_vm2, %v1595_v59 }
 0x219   : > { %v1289_v60 = vpop.trf.xlu1  ;;  %1789 = vmatprep.mubr.f32.mxu1 %v6415_v4 }
 0x21a   : > { %3612 = vmatmul.mubr.msk.f32.gmra.mxu0 %vm713_vm2, %v1289_v60 }
 0x21b   : > { %1483 = vmatprep.mubr.f32.mxu0 %v6415_v4  ;;  %v1596_v62 = vpop.trf.xlu0 }
 0x21c   : > { %3629 = vmatmul.mubr.msk.f32.gmra.mxu1 %vm713_vm2, %v1596_v62 }
 0x21d   : > { %v1290_v0 = vpop.trf.xlu1  ;;  %1795 = vmatprep.mubr.f32.mxu1 %v6415_v4 }
 0x21e   : > { %3613 = vmatmul.mubr.msk.f32.gmra.mxu0 %vm713_vm2, %v1290_v0 }
 0x21f   : > { %1489 = vmatprep.mubr.f32.mxu0 %v6415_v4  ;;  %v1597_v1 = vpop.trf.xlu0 }
 0x220   : > { %3630 = vmatmul.mubr.msk.f32.gmra.mxu1 %vm713_vm2, %v1597_v1 }
 0x221   : > { %v1291_v3 = vpop.trf.xlu1  ;;  %1801 = vmatprep.mubr.f32.mxu1 %v6415_v4 }
 0x222   : > { %3614 = vmatmul.mubr.msk.f32.gmra.mxu0 %vm713_vm2, %v1291_v3 }
 0x223   : > { %1495 = vmatprep.mubr.f32.mxu0 %v6415_v4  ;;  %v1598_v5 = vpop.trf.xlu0 }
 0x224   : > { %3631 = vmatmul.mubr.msk.f32.gmra.mxu1 %vm713_vm2, %v1598_v5 }
 0x225   : > { %v1292_v7 = vpop.trf.xlu1  ;;  %v4561_v9 = vpop.f32.mrf.mxu1 }
 0x226   : > { %3615 = vmatmul.mubr.msk.f32.gmra.mxu0 %vm713_vm2, %v1292_v7 }
 0x227   : > { %v4563_v10 = vpop.f32.mrf.mxu0  ;;  %v4565_v11 = vpop.f32.mrf.mxu1 }
 0x229   : > { %v4567_v12 = vpop.f32.mrf.mxu0  ;;  %v4569_v13 = vpop.f32.mrf.mxu1 }
 0x22b   : > { %v4571_v14 = vpop.f32.mrf.mxu0  ;;  %v4573_v15 = vpop.f32.mrf.mxu1 }
 0x22d   : > { %v4575_v16 = vpop.f32.mrf.mxu0  ;;  %v4577_v17 = vpop.f32.mrf.mxu1 }
 0x22f   : > { %v4579_v18 = vpop.f32.mrf.mxu0  ;;  %v4581_v19 = vpop.f32.mrf.mxu1 }
 0x231   : > { %v4583_v20 = vpop.f32.mrf.mxu0  ;;  %v4587_v22 = vpop.f32.mrf.mxu1 }
 0x233   : > { %v4590_v24 = vpop.f32.mrf.mxu0  ;;  %v4592_v26 = vpop.f32.mrf.mxu1 }
 0x235   : > { %v4594_v27 = vpop.f32.mrf.mxu0  ;;  %v4596_v28 = vpop.f32.mrf.mxu1 }
 0x237   : > { %v4601_v31 = vpop.f32.mrf.mxu0  ;;  %v4603_v33 = vpop.f32.mrf.mxu1 }
 0x239   : > { %v4605_v34 = vpop.f32.mrf.mxu0  ;;  %v4607_v35 = vpop.f32.mrf.mxu1 }
 0x23b   : > { %v4609_v36 = vpop.f32.mrf.mxu0  ;;  %v4611_v37 = vpop.f32.mrf.mxu1 }
 0x23d   : > { %v4613_v38 = vpop.f32.mrf.mxu0  ;;  %v4615_v39 = vpop.f32.mrf.mxu1 }
 0x23f   : > { %v4617_v40 = vpop.f32.mrf.mxu0  ;;  %v4619_v41 = vpop.f32.mrf.mxu1 }
 0x241   : > { %v4621_v42 = vpop.f32.mrf.mxu0  ;;  %v4623_v43 = vpop.f32.mrf.mxu1 }
 0x242   : > { %v4585_v21 = vpop.permute.xlu1 %525 }
 0x243   : > { %6625 = vst [vmem:[#allocation18_spill] sm:$0xff] %v4585_v21  ;;  %v667_v23 = vadd.f32 %v666_v61, %v4585_v21  ;;  %v4625_v44 = vpop.f32.mrf.mxu0  ;;  %v4627_v45 = vpop.f32.mrf.mxu1 }
 0x245   : > { %v2926_v25 = vpack.c.bf16 %v667_v23, %v667_v23  ;;  %v4629_v46 = vpop.f32.mrf.mxu0  ;;  %v4631_v47 = vpop.f32.mrf.mxu1 }
 0x247   : > { %2959 = vmatprep.mubr.bf16.mxu1 %v2926_v25  ;;  %v4633_v48 = vpop.f32.mrf.mxu0  ;;  %v4635_v49 = vpop.f32.mrf.mxu1 }
 0x249   : > { %v4637_v50 = vpop.f32.mrf.mxu0  ;;  %v4639_v51 = vpop.f32.mrf.mxu1 }
 0x24b   : > { %v4598_v29 = vpop.permute.xlu0 %520  ;;  %v4641_v53 = vpop.f32.mrf.mxu0 }
 0x24c   : > { %6626 = vst [vmem:[#allocation19_spill] sm:$0xff] %v4598_v29  ;;  %v661_v30 = vadd.f32 %v660_v55, %v4598_v29  ;;  %6627 = vst [vmem:[#allocation20_spill] sm:$0xff] %v4641_v53  ;;  %v4643_v54 = vpop.f32.mrf.mxu1 }
 0x24d   : > { %6628 = vst [vmem:[#allocation21_spill] sm:$0xff] %v4643_v54  ;;  %v4645_v55 = vpop.f32.mrf.mxu0 }
 0x24e   : > { %v2729_v32 = vpack.c.bf16 %v661_v30, %v661_v30  ;;  %6629 = vst [vmem:[#allocation22_spill] sm:$0xff] %v4645_v55  ;;  %v4647_v56 = vpop.f32.mrf.mxu1 }
 0x24f   : > { %6630 = vst [vmem:[#allocation23_spill] sm:$0xff] %v4647_v56  ;;  %v4649_v57 = vpop.f32.mrf.mxu0 }
 0x250   : > { %2762 = vmatprep.mubr.bf16.mxu0 %v2729_v32  ;;  %6631 = vst [vmem:[#allocation24_spill] sm:$0xff] %v4649_v57  ;;  %v4651_v59 = vpop.f32.mrf.mxu1 }
 0x251   : > { %6632 = vst [vmem:[#allocation25_spill] sm:$0xff] %v4651_v59  ;;  %v4653_v60 = vpop.f32.mrf.mxu0 }
 0x252   : > { %6633 = vst [vmem:[#allocation26_spill] sm:$0xff] %v4653_v60  ;;  %v4655_v61 = vpop.f32.mrf.mxu1 }
 0x253   : > { %6634 = vst [vmem:[#allocation27_spill] sm:$0xff] %v4655_v61  ;;  %v4657_v62 = vpop.f32.mrf.mxu0 }
 0x254   : > { %6635 = vst [vmem:[#allocation28_spill] sm:$0xff] %v4657_v62  ;;  %v4659_v0 = vpop.f32.mrf.mxu1 }
 0x255   : > { %6636 = vst [vmem:[#allocation29_spill] sm:$0xff] %v4659_v0  ;;  %v4661_v1 = vpop.f32.mrf.mxu0 }
 0x256   : > { %6637 = vst [vmem:[#allocation30_spill] sm:$0xff] %v4661_v1  ;;  %v4663_v3 = vpop.f32.mrf.mxu1 }
 0x257   : > { %6638 = vst [vmem:[#allocation31_spill] sm:$0xff] %v4663_v3  ;;  %v4665_v5 = vpop.f32.mrf.mxu0 }
 0x258   : > { %6639 = vst [vmem:[#allocation32_spill] sm:$0xff] %v4665_v5  ;;  %v4667_v7 = vpop.f32.mrf.mxu1 }
 0x259   : > { %6640 = vst [vmem:[#allocation33_spill] sm:$0xff] %v4667_v7  ;;  %v4669_v23 = vpop.f32.mrf.mxu0 }
 0x25a   : > { %6641 = vst [vmem:[#allocation34_spill] sm:$0xff] %v4669_v23  ;;  %v4671_v25 = vpop.f32.mrf.mxu1 }
 0x25b   : > { %6642 = vst [vmem:[#allocation35_spill] sm:$0xff] %v4671_v25  ;;  %v4673_v30 = vpop.f32.mrf.mxu0 }
 0x25c   : > { %6643 = vst [vmem:[#allocation36_spill] sm:$0xff] %v4673_v30  ;;  %v4675_v32 = vpop.f32.mrf.mxu1 }
 0x25d   : > { %6644 = vst [vmem:[#allocation37_spill] sm:$0xff] %v4675_v32  ;;  %v4677_v4 = vpop.f32.mrf.mxu0 }
 0x25e   : > { %6645 = vst [vmem:[#allocation38_spill] sm:$0xff] %v4677_v4  ;;  %v4679_v6 = vpop.f32.mrf.mxu1  ;;  %v1229_v4 = vmax.f32 %v4563_v10, %v4561_v9 }
 0x25f   : > { %6646 = vst [vmem:[#allocation39_spill] sm:$0xff] %v4679_v6  ;;  %v4681_v8 = vpop.f32.mrf.mxu0 }
 0x260   : > { %6647 = vst [vmem:[#allocation40_spill] sm:$0xff] %v4681_v8  ;;  %v4683_v63 = vpop.f32.mrf.mxu1  ;;  %v1230_v8 = vmax.f32 %v4567_v12, %v4565_v11 }
 0x261   : > { %6648 = vst [vmem:[#allocation41_spill] sm:$0xff] %v4683_v63  ;;  %v4685_v2 = vpop.f32.mrf.mxu0 }
 0x262   : > { %6649 = vst [vmem:[#allocation42_spill] sm:$0xff] %v4685_v2  ;;  %v4687_v52 = vpop.f32.mrf.mxu1 }
 0x263   : > { %6650 = vst [vmem:[#allocation43_spill] sm:$0xff] %v4687_v52  ;;  %v4689_v29 = vpop.f32.mrf.mxu0 }
 0x264   : > { %6651 = vst [vmem:[#allocation44_spill] sm:$0xff] %v4689_v29  ;;  %v4691_v58 = vpop.f32.mrf.mxu1  ;;  %v1231_v29 = vmax.f32 %v4571_v14, %v4569_v13 }
 0x265   : > { %6652 = vst [vmem:[#allocation45_spill] sm:$0xff] %v4691_v58  ;;  %v4693_v21 = vpop.f32.mrf.mxu0 }
 0x266   : > { %6653 = vst [vmem:[#allocation46_spill] sm:$0xff] %v4693_v21  ;;  %v1232_v21 = vmax.f32 %v4575_v16, %v4573_v15 }
 0x2a8   : > { %v1713_v30 = vpop.f32.mrf.mxu1 }
 0x2aa   : > { %v1407_v32 = vpop.f32.mrf.mxu0  ;;  %v1715_v6 = vpop.f32.mrf.mxu1 }
 0x2ab   : > { %v1535_v63 = vmax.f32 %v1229_v4, %v1407_v32  ;;  %v1233_v4 = vmax.f32 %v4579_v18, %v4577_v17 }
 0x2ac   : > { %v1409_v25 = vpop.f32.mrf.mxu0  ;;  %v1719_v2 = vpop.f32.mrf.mxu1 }
 0x2ad   : > { %v1536_v23 = vmax.f32 %v1230_v8, %v1409_v25  ;;  %v1841_v52 = vmax.f32 %v1535_v63, %v1713_v30  ;;  %v1234_v8 = vmax.f32 %v4583_v20, %v4581_v19 }
 0x2ae   : > { %v1413_v58 = vpop.f32.mrf.mxu0  ;;  %v4709_v61 = vpop.f32.mrf.mxu1 }
 0x2af   : > { %v1905_v7 = vsub.f32 %v4563_v10, %v1841_v52  ;;  %v2065_v5 = vsub.f32 %v4561_v9, %v1841_v52  ;;  %v2257_v3 = vsub.f32 %v1407_v32, %v1841_v52  ;;  %v2449_v1 = vsub.f32 %v1713_v30, %v1841_v52 }
 0x2b0   : > { %v1537_v63 = vmax.f32 %v1231_v29, %v1413_v58  ;;  %v1842_v0 = vmax.f32 %v1536_v23, %v1715_v6  ;;  %v1415_v62 = vpop.f32.mrf.mxu0 }
 0x2b1   : > { %v1937_v60 = vmul.f32 1.442695, %v1905_v7  ;;  %v2097_v59 = vmul.f32 1.442695, %v2065_v5  ;;  %v2289_v57 = vmul.f32 1.442695, %v2257_v3  ;;  %v1538_v56 = vmax.f32 %v1232_v21, %v1415_v62  ;;  %v4718_v21 = vpop.f32.mrf.mxu1 }
 0x2b2   : > { %v2481_v10 = vmul.f32 1.442695, %v2449_v1  ;;  %v1906_v9 = vsub.f32 %v4567_v12, %v1842_v0  ;;  %v2066_v52 = vsub.f32 %v4565_v11, %v1842_v0  ;;  %v2258_v30 = vsub.f32 %v1409_v25, %v1842_v0  ;;  %v4713_v32 = vpop.f32.mrf.mxu0 }
 0x2b3   : > { %3765 = vpow2.f32 %v1937_v60  ;;  %v2450_v55 = vsub.f32 %v1715_v6, %v1842_v0  ;;  %v1843_v54 = vmax.f32 %v1537_v63, %v1719_v2  ;;  %v1539_v29 = vmax.f32 %v1233_v4, %v4713_v32 }
 0x2b4   : > { %3767 = vpow2.f32 %v2097_v59  ;;  %v1939_v23 = vmul.f32 1.442695, %v1906_v9  ;;  %v2099_v53 = vmul.f32 1.442695, %v2066_v52  ;;  %v2291_v7 = vmul.f32 1.442695, %v2258_v30  ;;  %v4716_v5 = vpop.f32.mrf.mxu0 }
 0x2b5   : > { %3769 = vpow2.f32 %v2289_v57  ;;  %v2483_v12 = vmul.f32 1.442695, %v2450_v55  ;;  %v1907_v11 = vsub.f32 %v4571_v14, %v1843_v54  ;;  %v2067_v1 = vsub.f32 %v4569_v13, %v1843_v54  ;;  %v4729_v13 = vpop.f32.mrf.mxu1 }
 0x2b6   : > { %3771 = vpow2.f32 %v2481_v10  ;;  %v2259_v60 = vsub.f32 %v1413_v58, %v1843_v54  ;;  %v2451_v6 = vsub.f32 %v1719_v2, %v1843_v54  ;;  %v1844_v0 = vmax.f32 %v1538_v56, %v4709_v61  ;;  %v4723_v3 = vpop.f32.mrf.mxu0 }
 0x2b7   : > { %v1235_v59 = vmax.f32 %v4590_v24, %v4587_v22  ;;  %3773 = vpow2.f32 %v1939_v23  ;;  %v1941_v25 = vmul.f32 1.442695, %v1907_v11  ;;  %v2101_v4 = vmul.f32 1.442695, %v2067_v1  ;;  %v4742_v52 = vpop.f32.mrf.mxu1 }
 0x2b8   : > { %3775 = vpow2.f32 %v2099_v53  ;;  %v2293_v57 = vmul.f32 1.442695, %v2259_v60  ;;  %v1908_v55 = vsub.f32 %v4575_v16, %v1844_v0  ;;  %v1540_v14 = vmax.f32 %v1234_v8, %v4716_v5  ;;  %v4733_v56 = vpop.f32.mrf.mxu0 }
 0x2b9   : > { %3777 = vpow2.f32 %v2291_v7  ;;  %v2068_v58 = vsub.f32 %v4573_v15, %v1844_v0  ;;  %v2260_v2 = vsub.f32 %v1415_v62, %v1844_v0  ;;  %v2452_v54 = vsub.f32 %v4709_v61, %v1844_v0 }
 0x2ba   : > { %v1236_v63 = vmax.f32 %v4594_v27, %v4592_v26  ;;  %3779 = vpow2.f32 %v2483_v12  ;;  %v2485_v53 = vmul.f32 1.442695, %v2451_v6  ;;  %v1845_v10 = vmax.f32 %v1539_v29, %v4718_v21  ;;  %v4746_v7 = vpop.f32.mrf.mxu0 }
 0x2bb   : > { %3781 = vpow2.f32 %v1941_v25  ;;  %v1943_v16 = vmul.f32 1.442695, %v1908_v55  ;;  %v2103_v8 = vmul.f32 1.442695, %v2068_v58  ;;  %v1541_v9 = vmax.f32 %v1235_v59, %v4723_v3  ;;  %v4759_v59 = vpop.f32.mrf.mxu1 }
 0x2bc   : > { %3783 = vpow2.f32 %v2101_v4  ;;  %v1909_v15 = vsub.f32 %v4579_v18, %v1845_v10  ;;  %v2069_v62 = vsub.f32 %v4577_v17, %v1845_v10  ;;  %v2261_v61 = vsub.f32 %v4713_v32, %v1845_v10  ;;  %v4766_v55 = vpop.f32.mrf.mxu0 }
 0x2bd   : > { %3785 = vpow2.f32 %v2293_v57  ;;  %v2295_v30 = vmul.f32 1.442695, %v2260_v2  ;;  %v2453_v23 = vsub.f32 %v4718_v21, %v1845_v10  ;;  %v1846_v29 = vmax.f32 %v1540_v14, %v4729_v13 }
 0x2be   : > { %v1237_v12 = vmax.f32 %v4601_v31, %v4596_v28  ;;  %3787 = vpow2.f32 %v2485_v53  ;;  %v2487_v11 = vmul.f32 1.442695, %v2452_v54  ;;  %v1542_v18 = vmax.f32 %v1236_v63, %v4733_v56 }
 0x2bf   : > { %3789 = vpow2.f32 %v1943_v16  ;;  %v1945_v17 = vmul.f32 1.442695, %v1909_v15  ;;  %v2105_v32 = vmul.f32 1.442695, %v2069_v62  ;;  %v1910_v1 = vsub.f32 %v4583_v20, %v1846_v29 }
 0x2c0   : > { %v4752_v60 = vpop.eup %3765  ;;  %3791 = vpow2.f32 %v2103_v8  ;;  %v2262_v21 = vsub.f32 %v4716_v5, %v1846_v29  ;;  %v2454_v6 = vsub.f32 %v4729_v13, %v1846_v29  ;;  %v4757_v0 = vmax.f32 %v1541_v9, %v4742_v52  ;;  %v4788_v9 = vpop.f32.mrf.mxu1 }
 0x2c1   : > { %6654 = vst [vmem:[#allocation47_spill] sm:$0xff] %v4752_v60  ;;  %v4761_v25 = vpop.eup %3767  ;;  %v1238_v4 = vmax.f32 %v4605_v34, %v4603_v33  ;;  %3793 = vpow2.f32 %v2295_v30  ;;  %v2297_v57 = vmul.f32 1.442695, %v2261_v61  ;;  %v2070_v20 = vsub.f32 %v4581_v19, %v1846_v29  ;;  %v4794_v30 = vpop.f32.mrf.mxu0 }
 0x2c2   : > { %6655 = vst [vmem:[#allocation48_spill] sm:$0xff] %v4761_v25  ;;  %v4768_v14 = vpop.eup %3769  ;;  %v1239_v5 = vmax.f32 %v4609_v36, %v4607_v35  ;;  %v2193_v13 = vadd.f32 %v4761_v25, %v4752_v60  ;;  %3795 = vpow2.f32 %v2487_v11  ;;  %v2489_v58 = vmul.f32 1.442695, %v2453_v23  ;;  %v6701_v25 = vld [vmem:[#allocation25_spill] sm:$0xff] }
 0x2c3   : > { %6656 = vst [vmem:[#allocation49_spill] sm:$0xff] %v4768_v14  ;;  %v4774_v2 = vpop.eup %3771  ;;  %3797 = vpow2.f32 %v1945_v17  ;;  %v1947_v63 = vmul.f32 1.442695, %v1910_v1  ;;  %v2263_v19 = vsub.f32 %v4723_v3, %v4757_v0  ;;  %v2455_v16 = vsub.f32 %v4742_v52, %v4757_v0 }
 0x2c4   : > { %6657 = vst [vmem:[#allocation50_spill] sm:$0xff] %v4774_v2  ;;  %v4780_v53 = vpop.eup %3773  ;;  %v2385_v10 = vadd.f32 %v4768_v14, %v2193_v13  ;;  %3799 = vpow2.f32 %v2105_v32  ;;  %v4786_v8 = vmax.f32 %v1542_v18, %v4759_v59  ;;  %v2107_v62 = vmul.f32 1.442695, %v2070_v20  ;;  %v4822_v13 = vpop.f32.mrf.mxu0 }
 0x2c5   : > { %6658 = vst [vmem:[#allocation51_spill] sm:$0xff] %v4780_v53  ;;  %v4790_v15 = vpop.eup %3775  ;;  %3801 = vpow2.f32 %v2297_v57  ;;  %v2299_v61 = vmul.f32 1.442695, %v2262_v21  ;;  %v1911_v3 = vsub.f32 %v4590_v24, %v4757_v0  ;;  %v2071_v11 = vsub.f32 %v4587_v22, %v4757_v0  ;;  %v4814_v22 = vpop.f32.mrf.mxu1 }
 0x2c6   : > { %6659 = vst [vmem:[#allocation52_spill] sm:$0xff] %v4790_v15  ;;  %v4796_v23 = vpop.eup %3777  ;;  %v2577_v29 = vadd.f32 %v4774_v2, %v2385_v10  ;;  %v2194_v52 = vadd.f32 %v4790_v15, %v4780_v53  ;;  %3803 = vpow2.f32 %v2489_v58  ;;  %v2491_v17 = vmul.f32 1.442695, %v2454_v6 }
 0x2c7   : > { %6660 = vst [vmem:[#allocation53_spill] sm:$0xff] %v4796_v23  ;;  %v4803_v18 = vpop.eup %3779  ;;  %3805 = vpow2.f32 %v1947_v63  ;;  %v1543_v32 = vmax.f32 %v1237_v12, %v4746_v7  ;;  %v2264_v24 = vsub.f32 %v4733_v56, %v4786_v8  ;;  %v2456_v57 = vsub.f32 %v4759_v59, %v4786_v8 }
 0x2c8   : > { %6661 = vst [vmem:[#allocation54_spill] sm:$0xff] %v4803_v18  ;;  %v4808_v1 = vpop.eup %3781  ;;  %3807 = vrcp.f32 %v2577_v29  ;;  %v2386_v21 = vadd.f32 %v4796_v23, %v2194_v52  ;;  %v1544_v20 = vmax.f32 %v1238_v4, %v4766_v55  ;;  %v1949_v6 = vmul.f32 1.442695, %v1911_v3 }
 0x2c9   : > { %6662 = vst [vmem:[#allocation55_spill] sm:$0xff] %v4808_v1  ;;  %v4816_v0 = vpop.eup %3783  ;;  %3809 = vpow2.f32 %v2107_v62  ;;  %v1912_v12 = vsub.f32 %v4594_v27, %v4786_v8  ;;  %v2072_v56 = vsub.f32 %v4592_v26, %v4786_v8  ;;  %v2109_v63 = vmul.f32 1.442695, %v2071_v11 }
 0x2ca   : > { %6663 = vst [vmem:[#allocation56_spill] sm:$0xff] %v4816_v0  ;;  %v4824_v58 = vpop.eup %3785  ;;  %v2578_v59 = vadd.f32 %v4803_v18, %v2386_v21  ;;  %v2195_v4 = vadd.f32 %v4816_v0, %v4808_v1  ;;  %3811 = vpow2.f32 %v2299_v61  ;;  %v2301_v62 = vmul.f32 1.442695, %v2263_v19  ;;  %v4840_v61 = vpop.f32.mrf.mxu1 }
 0x2cb   : > { %6664 = vst [vmem:[#allocation57_spill] sm:$0xff] %v4824_v58  ;;  %v4829_v10 = vpop.eup %3787  ;;  %3813 = vpow2.f32 %v2491_v17  ;;  %v1849_v27 = vmax.f32 %v1543_v32, %v4788_v9  ;;  %v4833_v3 = vmax.f32 %v1544_v20, %v4814_v22  ;;  %v1241_v8 = vmax.f32 %v4617_v40, %v4615_v39  ;;  %v4845_v21 = vpop.f32.mrf.mxu0 }
 0x2cc   : > { %6665 = vst [vmem:[#allocation58_spill] sm:$0xff] %v4829_v10  ;;  %v4835_v26 = vpop.eup %3789  ;;  %3815 = vrcp.f32 %v2578_v59  ;;  %v2387_v29 = vadd.f32 %v4824_v58, %v2195_v4  ;;  %v2493_v52 = vmul.f32 1.442695, %v2455_v16  ;;  %v1951_v19 = vmul.f32 1.442695, %v1912_v12 }
 0x2cd   : > { %6666 = vst [vmem:[#allocation59_spill] sm:$0xff] %v4835_v26  ;;  %v4842_v11 = vpop.eup %3791  ;;  %3817 = vpow2.f32 %v1949_v6  ;;  %v2111_v17 = vmul.f32 1.442695, %v2072_v56  ;;  %v2265_v32 = vsub.f32 %v4746_v7, %v1849_v27  ;;  %v2457_v16 = vsub.f32 %v4788_v9, %v1849_v27 }
 0x2ce   : > { %6667 = vst [vmem:[#allocation60_spill] sm:$0xff] %v4842_v11  ;;  %v4847_v20 = vpop.eup %3793  ;;  %v2579_v54 = vadd.f32 %v4829_v10, %v2387_v29  ;;  %v2196_v59 = vadd.f32 %v4842_v11, %v4835_v26  ;;  %3819 = vpow2.f32 %v2109_v63  ;;  %v2303_v6 = vmul.f32 1.442695, %v2264_v24  ;;  %v4868_v24 = vpop.f32.mrf.mxu1 }
 0x2cf   : > { %6668 = vst [vmem:[#allocation61_spill] sm:$0xff] %v4847_v20  ;;  %v4853_v4 = vpop.eup %3795  ;;  %3821 = vpow2.f32 %v2301_v62  ;;  %v1913_v12 = vsub.f32 %v4601_v31, %v1849_v27  ;;  %v1545_v7 = vmax.f32 %v1239_v5, %v4794_v30  ;;  %v6671_v9 = vmax.f32 %v4613_v38, %v4611_v37 }
 0x2d0   : > { %6669 = vst [vmem:[#allocation62_spill] sm:$0xff] %v4853_v4  ;;  %v4860_v56 = vpop.eup %3797  ;;  %3823 = vrcp.f32 %v2579_v54  ;;  %v2388_v29 = vadd.f32 %v4847_v20, %v2196_v59  ;;  %v1547_v62 = vmax.f32 %v1241_v8, %v4845_v21  ;;  %v2073_v10 = vsub.f32 %v4596_v28, %v1849_v27 }
 0x2d1   : > { %6670 = vst [vmem:[#allocation63_spill] sm:$0xff] %v4860_v56  ;;  %v1546_v63 = vmax.f32 %v6671_v9, %v4822_v13  ;;  %v4870_v31 = vpop.eup %3799  ;;  %3825 = vpow2.f32 %v2493_v52  ;;  %v2266_v5 = vsub.f32 %v4766_v55, %v4833_v3  ;;  %v2458_v54 = vsub.f32 %v4814_v22, %v4833_v3 }
 0x2d2   : > { %6672 = vst [vmem:[#allocation64_spill] sm:$0xff] %v4870_v31  ;;  %v4877_v59 = vpop.eup %3801  ;;  %v2580_v2 = vadd.f32 %v4853_v4, %v2388_v29  ;;  %v2197_v8 = vadd.f32 %v4870_v31, %v4860_v56  ;;  %3827 = vpow2.f32 %v1951_v19  ;;  %v2495_v9 = vmul.f32 1.442695, %v2456_v57  ;;  %v4895_v19 = vpop.f32.mrf.mxu1  ;;  %v6724_v56 = vld [vmem:[#allocation38_spill] sm:$0xff] }
 0x2d3   : > { %6673 = vst [vmem:[#allocation65_spill] sm:$0xff] %v4877_v59  ;;  %v4882_v18 = vpop.eup %3803  ;;  %3829 = vpow2.f32 %v2111_v17  ;;  %v1953_v52 = vmul.f32 1.442695, %v1913_v12  ;;  %v1914_v28 = vsub.f32 %v4605_v34, %v4833_v3  ;;  %v4890_v27 = vmax.f32 %v1545_v7, %v4840_v61 }
 0x2d4   : > { %6674 = vst [vmem:[#allocation66_spill] sm:$0xff] %v4882_v18  ;;  %v4886_v55 = vpop.eup %3805  ;;  %3831 = vrcp.f32 %v2580_v2  ;;  %v2389_v22 = vadd.f32 %v4877_v59, %v2197_v8  ;;  %v4893_v29 = vmax.f32 %v1546_v63, %v4868_v24  ;;  %v2113_v17 = vmul.f32 1.442695, %v2073_v10  ;;  %v4907_v8 = vpop.f32.mrf.mxu0 }
 0x2d5   : > { %6675 = vst [vmem:[#allocation67_spill] sm:$0xff] %v4886_v55  ;;  %v4897_v57 = vpop.eup %3807  ;;  %3833 = vpow2.f32 %v2303_v6  ;;  %v2305_v12 = vmul.f32 1.442695, %v2265_v32  ;;  %v4900_v34 = vmax.f32 %v1547_v62, %v4895_v19  ;;  %v2497_v7 = vmul.f32 1.442695, %v2457_v16 }
 0x2d6   : > { %6676 = vst [vmem:[#allocation68_spill] sm:$0xff] %v4897_v57  ;;  %v4902_v4 = vpop.eup %3809  ;;  %v2581_v2 = vadd.f32 %v4882_v18, %v2389_v22  ;;  %3835 = vpow2.f32 %v2495_v9  ;;  %v2074_v63 = vsub.f32 %v4603_v33, %v4833_v3  ;;  %v2267_v32 = vsub.f32 %v4794_v30, %v4890_v27  ;;  %v6704_v57 = vld [vmem:[#allocation27_spill] sm:$0xff] }
 0x2d7   : > { %6677 = vst [vmem:[#allocation69_spill] sm:$0xff] %v4902_v4  ;;  %v4909_v58 = vpop.eup %3811  ;;  %v2198_v10 = vadd.f32 %v4902_v4, %v4886_v55  ;;  %3837 = vpow2.f32 %v1953_v52  ;;  %v2459_v6 = vsub.f32 %v4840_v61, %v4890_v27  ;;  %v1955_v16 = vmul.f32 1.442695, %v1914_v28  ;;  %v4930_v28 = vpop.f32.mrf.mxu0 }
 0x2d8   : > { %6678 = vst [vmem:[#allocation70_spill] sm:$0xff] %v4909_v58  ;;  %v4917_v62 = vpop.eup %3813  ;;  %3839 = vrcp.f32 %v2581_v2  ;;  %v1243_v33 = vmax.f32 %v4625_v44, %v4623_v43  ;;  %v1915_v52 = vsub.f32 %v4609_v36, %v4890_v27  ;;  %v2115_v30 = vmul.f32 1.442695, %v2074_v63 }
 0x2d9   : > { %6679 = vst [vmem:[#allocation71_spill] sm:$0xff] %v4917_v62  ;;  %v4919_v9 = vpop.eup %3815  ;;  %v2390_v3 = vadd.f32 %v4909_v58, %v2198_v10  ;;  %3841 = vpow2.f32 %v2113_v17  ;;  %v2307_v61 = vmul.f32 1.442695, %v2266_v5  ;;  %v2268_v2 = vsub.f32 %v4822_v13, %v4893_v29 }
 0x2da   : > { %6680 = vst [vmem:[#allocation72_spill] sm:$0xff] %v4919_v9  ;;  %v4926_v22 = vpop.eup %3817  ;;  %3843 = vpow2.f32 %v2305_v12  ;;  %v2075_v17 = vsub.f32 %v4607_v35, %v4890_v27  ;;  %v2460_v36 = vsub.f32 %v4868_v24, %v4893_v29  ;;  %v1242_v5 = vmax.f32 %v4621_v42, %v4619_v41  ;;  %v4950_v24 = vpop.f32.mrf.mxu1 }
 0x2db   : > { %6681 = vst [vmem:[#allocation73_spill] sm:$0xff] %v4926_v22  ;;  %v4932_v18 = vpop.eup %3819  ;;  %v2582_v14 = vadd.f32 %v4917_v62, %v2390_v3  ;;  %3845 = vpow2.f32 %v2497_v7  ;;  %v2499_v12 = vmul.f32 1.442695, %v2458_v54  ;;  %v1957_v7 = vmul.f32 1.442695, %v1915_v52 }
 0x2dc   : > { %6682 = vst [vmem:[#allocation74_spill] sm:$0xff] %v4932_v18  ;;  %v4939_v10 = vpop.eup %3821  ;;  %v2199_v13 = vadd.f32 %v4932_v18, %v4926_v22  ;;  %3847 = vpow2.f32 %v1955_v16  ;;  %v1916_v35 = vsub.f32 %v4613_v38, %v4893_v29  ;;  %v1549_v27 = vmax.f32 %v1243_v33, %v4930_v28  ;;  %v6720_v18 = vld [vmem:[#allocation35_spill] sm:$0xff] }
 0x2dd   : > { %6683 = vst [vmem:[#allocation75_spill] sm:$0xff] %v4939_v10  ;;  %v4945_v63 = vpop.eup %3823  ;;  %3849 = vrcp.f32 %v2582_v14  ;;  %v2269_v16 = vsub.f32 %v4845_v21, %v4900_v34  ;;  %v2117_v52 = vmul.f32 1.442695, %v2075_v17  ;;  %v1548_v38 = vmax.f32 %v1242_v5, %v4907_v8  ;;  %v4973_v5 = vpop.f32.mrf.mxu1 }
 0x2de   : > { %6684 = vst [vmem:[#allocation76_spill] sm:$0xff] %v4945_v63  ;;  %v4952_v3 = vpop.eup %3825  ;;  %v2391_v62 = vadd.f32 %v4939_v10, %v2199_v13  ;;  %3851 = vpow2.f32 %v2115_v30  ;;  %v2309_v23 = vmul.f32 1.442695, %v2267_v32  ;;  %v2076_v30 = vsub.f32 %v4611_v37, %v4893_v29  ;;  %v6702_v63 = vld [vmem:[#allocation26_spill] sm:$0xff] }
 0x2df   : > { %6685 = vst [vmem:[#allocation77_spill] sm:$0xff] %v4952_v3  ;;  %v4959_v14 = vpop.eup %3827  ;;  %3853 = vpow2.f32 %v2307_v61  ;;  %v1244_v21 = vmax.f32 %v4629_v46, %v4627_v45  ;;  %v2501_v17 = vmul.f32 1.442695, %v2459_v6  ;;  %v4980_v37 = vmax.f32 %v1549_v27, %v4973_v5 }
 0x2e0   : > { %6686 = vst [vmem:[#allocation78_spill] sm:$0xff] %v4959_v14  ;;  %v4962_v33 = vpop.eup %3829  ;;  %v2583_v20 = vadd.f32 %v4952_v3, %v2391_v62  ;;  %3855 = vpow2.f32 %v2499_v12  ;;  %v1959_v62 = vmul.f32 1.442695, %v1916_v35  ;;  %v1917_v6 = vsub.f32 %v4617_v40, %v4900_v34 }
 0x2e1   : > { %6687 = vst [vmem:[#allocation79_spill] sm:$0xff] %v4962_v33  ;;  %v4967_v13 = vpop.eup %3831  ;;  %v2200_v61 = vadd.f32 %v4962_v33, %v4959_v14  ;;  %3857 = vpow2.f32 %v1957_v7  ;;  %v2119_v32 = vmul.f32 1.442695, %v2076_v30  ;;  %v4994_v35 = vmax.f32 %v1548_v38, %v4950_v24  ;;  %v6699_v30 = vld [vmem:[#allocation23_spill] sm:$0xff] }
 0x2e2   : > { %6688 = vst [vmem:[#allocation80_spill] sm:$0xff] %v4967_v13  ;;  %v4975_v54 = vpop.eup %3833  ;;  %3859 = vrcp.f32 %v2583_v20  ;;  %v2077_v20 = vsub.f32 %v4615_v39, %v4900_v34  ;;  %v2503_v10 = vmul.f32 1.442695, %v2460_v36  ;;  %v5005_v39 = vpop.f32.mrf.mxu0  ;;  %v6705_v36 = vld [vmem:[#allocation28_spill] sm:$0xff]  ;;  %v6718_v13 = vld [vmem:[#allocation34_spill] sm:$0xff]  ;;  %v6728_v22 = vsub.f32 %v4930_v28, %v4980_v37 }
 0x2e3   : > { %6689 = vst [vmem:[#allocation81_spill] sm:$0xff] %v4975_v54  ;;  %v4982_v29 = vpop.eup %3835  ;;  %v2392_v7 = vadd.f32 %v4975_v54, %v2200_v61  ;;  %3861 = vpow2.f32 %v2117_v52  ;;  %v2311_v61 = vmul.f32 1.442695, %v2268_v2  ;;  %v1918_v38 = vsub.f32 %v4621_v42, %v4994_v35 }
 0x2e4   : > { %6690 = vst [vmem:[#allocation82_spill] sm:$0xff] %v4982_v29  ;;  %v4989_v3 = vpop.eup %3837  ;;  %3863 = vpow2.f32 %v2309_v23  ;;  %v6694_v23 = vld [vmem:[#allocation20_spill] sm:$0xff]  ;;  %v2121_v58 = vmul.f32 1.442695, %v2077_v20  ;;  %v2313_v20 = vmul.f32 1.442695, %v2269_v16  ;;  %v1550_v42 = vmax.f32 %v1244_v21, %v5005_v39  ;;  %v5033_v60 = vpop.f32.mrf.mxu0 }
 0x2e5   : > { %6691 = vst [vmem:[#allocation83_spill] sm:$0xff] %v4989_v3  ;;  %v4996_v27 = vpop.eup %3839  ;;  %v2584_v12 = vadd.f32 %v4982_v29, %v2392_v7  ;;  %3865 = vpow2.f32 %v2501_v17  ;;  %v6696_v7 = vld [vmem:[#allocation21_spill] sm:$0xff]  ;;  %v6697_v17 = vld [vmem:[#allocation22_spill] sm:$0xff]  ;;  %v1961_v29 = vmul.f32 1.442695, %v1917_v6  ;;  %v2078_v6 = vsub.f32 %v4619_v41, %v4994_v35 }
 0x2e6   : > { %6692 = vst [vmem:[#allocation84_spill] sm:$0xff] %v4996_v27  ;;  %v5001_v40 = vpop.eup %3841  ;;  %3867 = vpow2.f32 %v1959_v62  ;;  %v6700_v62 = vld [vmem:[#allocation24_spill] sm:$0xff]  ;;  %v1963_v16 = vmul.f32 1.442695, %v1918_v38  ;;  %v2462_v21 = vsub.f32 %v4950_v24, %v4994_v35  ;;  %v2079_v24 = vsub.f32 %v4623_v43, %v4980_v37  ;;  %v5065_v38 = vpop.f32.mrf.mxu0  ;;  %v6717_v43 = vld [vmem:[#allocation33_spill] sm:$0xff] }
 0x2e7   : > { %6693 = vst [vmem:[#allocation85_spill] sm:$0xff] %v5001_v40  ;;  %v5009_v59 = vpop.eup %3843  ;;  %3869 = vrcp.f32 %v2584_v12  ;;  %v2201_v52 = vadd.f32 %v5001_v40, %v4989_v3  ;;  %v6723_v27 = vld [vmem:[#allocation37_spill] sm:$0xff]  ;;  %v2317_v33 = vmul.f32 1.442695, %v6728_v22 }
 0x2e8   : > { %6695 = vst [vmem:[#allocation20_spill] sm:$0xff] %v5009_v59  ;;  %v5015_v54 = vpop.eup %3845  ;;  %3871 = vpow2.f32 %v2119_v32  ;;  %v2507_v9 = vmul.f32 1.442695, %v2462_v21 }
 0x2e9   : > { %6698 = vst [vmem:[#allocation21_spill] sm:$0xff] %v5015_v54  ;;  %v5021_v0 = vpop.eup %3847  ;;  %v2393_v12 = vadd.f32 %v5009_v59, %v2201_v52  ;;  %3873 = vpow2.f32 %v2311_v61  ;;  %v6706_v61 = vsub.f32 %v4895_v19, %v4900_v34  ;;  %v2270_v52 = vsub.f32 %v4907_v8, %v4994_v35  ;;  %v5055_v8 = vpop.f32.mrf.mxu1 }
 0x2ea   : > { %v5028_v1 = vpop.eup %3849  ;;  %3875 = vpow2.f32 %v2503_v10  ;;  %v2123_v19 = vmul.f32 1.442695, %v2078_v6  ;;  %v1919_v34 = vsub.f32 %v4625_v44, %v4980_v37  ;;  %v5063_v35 = vmax.f32 %v1550_v42, %v5055_v8  ;;  %v6713_v6 = vld [vmem:[#allocation31_spill] sm:$0xff]  ;;  %v6721_v44 = vld [vmem:[#allocation36_spill] sm:$0xff] }
 0x2eb   : > { %6703 = vst [vmem:[#allocation22_spill] sm:$0xff] %v5028_v1  ;;  %v5035_v11 = vpop.eup %3851  ;;  %v2585_v2 = vadd.f32 %v5015_v54, %v2393_v12  ;;  %3877 = vpow2.f32 %v1961_v29  ;;  %v2505_v41 = vmul.f32 1.442695, %v6706_v61  ;;  %v6709_v29 = vld [vmem:[#allocation29_spill] sm:$0xff]  ;;  %v6710_v12 = vld [vmem:[#allocation30_spill] sm:$0xff]  ;;  %v6714_v54 = vld [vmem:[#allocation32_spill] sm:$0xff]  ;;  %v5092_v21 = vpop.f32.mrf.mxu1 }
 0x2ec   : > { %v5043_v59 = vpop.eup %3853  ;;  %v2202_v10 = vadd.f32 %v5035_v11, %v5021_v0  ;;  %3879 = vpow2.f32 %v2121_v58  ;;  %v2315_v15 = vmul.f32 1.442695, %v2270_v52  ;;  %v1965_v31 = vmul.f32 1.442695, %v1919_v34 }
 0x2ed   : > { %6707 = vst [vmem:[#allocation23_spill] sm:$0xff] %v5043_v59  ;;  %v5049_v32 = vpop.eup %3855  ;;  %3881 = vrcp.f32 %v2585_v2  ;;  %v2125_v42 = vmul.f32 1.442695, %v2079_v24  ;;  %v6726_v24 = vld [vmem:[#allocation39_spill] sm:$0xff] }
 0x2ee   : > { %6708 = vst [vmem:[#allocation24_spill] sm:$0xff] %v5049_v32  ;;  %v5057_v61 = vpop.eup %3857  ;;  %v2394_v58 = vadd.f32 %v5043_v59, %v2202_v10  ;;  %3883 = vpow2.f32 %v2313_v20  ;;  %v6715_v10 = vmax.f32 %v4633_v48, %v4631_v47 }
 0x2ef   : > { %6711 = vst [vmem:[#allocation25_spill] sm:$0xff] %v5057_v61  ;;  %v5067_v2 = vpop.eup %3859  ;;  %3885 = vpow2.f32 %v2505_v41 }
 0x2f0   : > { %6712 = vst [vmem:[#allocation26_spill] sm:$0xff] %v5067_v2  ;;  %v1551_v20 = vmax.f32 %v6715_v10, %v5033_v60  ;;  %v5075_v59 = vpop.eup %3861  ;;  %v2586_v26 = vadd.f32 %v5049_v32, %v2394_v58  ;;  %3887 = vpow2.f32 %v1963_v16  ;;  %v1920_v16 = vsub.f32 %v4629_v46, %v5063_v35  ;;  %v5094_v58 = vpop.f32.mrf.mxu0  ;;  %v6727_v2 = vld [vmem:[#allocation40_spill] sm:$0xff] }
 0x2f1   : > { %6716 = vst [vmem:[#allocation27_spill] sm:$0xff] %v5075_v59  ;;  %v5080_v53 = vpop.eup %3863  ;;  %v2203_v52 = vadd.f32 %v5075_v59, %v5057_v61  ;;  %3889 = vpow2.f32 %v2123_v19  ;;  %v2080_v19 = vsub.f32 %v4627_v45, %v5063_v35 }
 0x2f2   : > { %6719 = vst [vmem:[#allocation28_spill] sm:$0xff] %v5080_v53  ;;  %v5086_v10 = vpop.eup %3865  ;;  %3891 = vrcp.f32 %v2586_v26  ;;  %v5102_v34 = vmax.f32 %v1551_v20, %v5092_v21  ;;  %v6730_v20 = vsub.f32 %v4973_v5, %v4980_v37  ;;  %v1967_v28 = vmul.f32 1.442695, %v1920_v16  ;;  %v5129_v1 = vpop.f32.mrf.mxu0  ;;  %v6734_v5 = vld [vmem:[#allocation42_spill] sm:$0xff] }
 0x2f3   : > { %6722 = vst [vmem:[#allocation29_spill] sm:$0xff] %v5086_v10  ;;  %v5096_v41 = vpop.eup %3867  ;;  %v2395_v32 = vadd.f32 %v5080_v53, %v2203_v52  ;;  %3893 = vpow2.f32 %v2315_v15  ;;  %v6729_v15 = vmax.f32 %v4637_v50, %v4635_v49 }
 0x2f4   : > { %v5104_v26 = vpop.eup %3869  ;;  %3895 = vpow2.f32 %v2507_v9  ;;  %v2509_v4 = vmul.f32 1.442695, %v6730_v20  ;;  %v2272_v9 = vsub.f32 %v5005_v39, %v5063_v35  ;;  %v2127_v20 = vmul.f32 1.442695, %v2080_v19 }
 0x2f5   : > { %6725 = vst [vmem:[#allocation30_spill] sm:$0xff] %v5104_v26  ;;  %v1552_v52 = vmax.f32 %v6729_v15, %v5065_v38  ;;  %v5115_v53 = vpop.eup %3871  ;;  %v2587_v45 = vadd.f32 %v5086_v10, %v2395_v32  ;;  %3897 = vpow2.f32 %v1965_v31  ;;  %v2464_v15 = vsub.f32 %v5055_v8, %v5063_v35  ;;  %v6733_v32 = vld [vmem:[#allocation41_spill] sm:$0xff]  ;;  %v5137_v10 = vpop.f32.mrf.mxu1 }
 0x2f6   : > { %v5123_v46 = vpop.eup %3873  ;;  %v2204_v22 = vadd.f32 %v5115_v53, %v5096_v41  ;;  %3899 = vpow2.f32 %v2125_v42  ;;  %v1921_v39 = vsub.f32 %v4633_v48, %v5102_v34  ;;  %v6735_v8 = vmax.f32 %v6694_v23, %v4639_v51 }
 0x2f7   : > { %6731 = vst [vmem:[#allocation31_spill] sm:$0xff] %v5123_v46  ;;  %v5131_v31 = vpop.eup %3875  ;;  %3901 = vrcp.f32 %v2587_v45  ;;  %v5147_v16 = vmax.f32 %v1552_v52, %v5137_v10  ;;  %v2319_v19 = vmul.f32 1.442695, %v2272_v9  ;;  %v2081_v48 = vsub.f32 %v4631_v47, %v5102_v34  ;;  %v6739_v9 = vld [vmem:[#allocation44_spill] sm:$0xff]  ;;  %v5168_v59 = vpop.f32.mrf.mxu1 }
 0x2f8   : > { %6732 = vst [vmem:[#allocation32_spill] sm:$0xff] %v5131_v31  ;;  %v5139_v55 = vpop.eup %3877  ;;  %v2396_v42 = vadd.f32 %v5123_v46, %v2204_v22  ;;  %3903 = vpow2.f32 %v2317_v33  ;;  %v1553_v35 = vmax.f32 %v6735_v8, %v5094_v58  ;;  %v2273_v37 = vsub.f32 %v5033_v60, %v5102_v34  ;;  %v5160_v46 = vpop.f32.mrf.mxu0 }
 0x2f9   : > { %v5149_v45 = vpop.eup %3879  ;;  %3905 = vpow2.f32 %v2509_v4  ;;  %v2511_v52 = vmul.f32 1.442695, %v2464_v15  ;;  %v6738_v4 = vld [vmem:[#allocation43_spill] sm:$0xff]  ;;  %v1969_v47 = vmul.f32 1.442695, %v1921_v39  ;;  %v2465_v60 = vsub.f32 %v5092_v21, %v5102_v34 }
 0x2fa   : > { %v5155_v22 = vpop.eup %3881  ;;  %v2588_v33 = vadd.f32 %v5131_v31, %v2396_v42  ;;  %v2205_v8 = vadd.f32 %v5149_v45, %v5139_v55  ;;  %3907 = vpow2.f32 %v1967_v28  ;;  %v1922_v15 = vsub.f32 %v4637_v50, %v5147_v16 }
 0x2fb   : > { %6736 = vst [vmem:[#allocation33_spill] sm:$0xff] %v5155_v22  ;;  %v5162_v26 = vpop.eup %3883  ;;  %3909 = vpow2.f32 %v2127_v20  ;;  %v1859_v31 = vmax.f32 %v1553_v35, %v5168_v59  ;;  %v2129_v20 = vmul.f32 1.442695, %v2081_v48  ;;  %v2321_v39 = vmul.f32 1.442695, %v2273_v37 }
 0x2fc   : > { %6737 = vst [vmem:[#allocation34_spill] sm:$0xff] %v5162_v26  ;;  %v5170_v42 = vpop.eup %3885  ;;  %3911 = vrcp.f32 %v2588_v33  ;;  %v2397_v28 = vadd.f32 %v5162_v26, %v2205_v8  ;;  %v6742_v21 = vmax.f32 %v6697_v17, %v6696_v7  ;;  %v2082_v50 = vsub.f32 %v4635_v49, %v5147_v16  ;;  %v5189_v8 = vpop.f32.mrf.mxu0 }
 0x2fd   : > { %6740 = vst [vmem:[#allocation35_spill] sm:$0xff] %v5170_v42  ;;  %v5176_v40 = vpop.eup %3887  ;;  %3913 = vpow2.f32 %v2319_v19  ;;  %v2274_v35 = vsub.f32 %v5065_v38, %v5147_v16  ;;  %v2513_v48 = vmul.f32 1.442695, %v2465_v60  ;;  %v1971_v49 = vmul.f32 1.442695, %v1922_v15  ;;  %v6748_v15 = vld [vmem:[#allocation46_spill] sm:$0xff] }
 0x2fe   : > { %6741 = vst [vmem:[#allocation36_spill] sm:$0xff] %v5176_v40  ;;  %v1554_v34 = vmax.f32 %v6742_v21, %v5129_v1  ;;  %v5182_v14 = vpop.eup %3889  ;;  %v2589_v33 = vadd.f32 %v5170_v42, %v2397_v28  ;;  %3915 = vpow2.f32 %v2511_v52  ;;  %v2466_v21 = vsub.f32 %v5137_v10, %v5147_v16  ;;  %v5197_v28 = vpop.f32.mrf.mxu1 }
 0x2ff   : > { %6743 = vst [vmem:[#allocation37_spill] sm:$0xff] %v5182_v14  ;;  %v5191_v19 = vpop.eup %3891  ;;  %v2206_v37 = vadd.f32 %v5182_v14, %v5176_v40  ;;  %3917 = vpow2.f32 %v1969_v47  ;;  %v1923_v38 = vsub.f32 %v6694_v23, %v1859_v31  ;;  %v6745_v42 = vmax.f32 %v6700_v62, %v6699_v30  ;;  %v5215_v22 = vpop.f32.mrf.mxu0 }
 0x300   : > { %v5199_v52 = vpop.eup %3893  ;;  %3919 = vrcp.f32 %v2589_v33  ;;  %v2083_v10 = vsub.f32 %v4639_v51, %v1859_v31  ;;  %v1860_v16 = vmax.f32 %v1554_v34, %v5197_v28  ;;  %v6747_v33 = vld [vmem:[#allocation45_spill] sm:$0xff]  ;;  %v2131_v23 = vmul.f32 1.442695, %v2082_v50  ;;  %v5222_v34 = vpop.f32.mrf.mxu1 }
 0x301   : > { %6744 = vst [vmem:[#allocation38_spill] sm:$0xff] %v5199_v52  ;;  %v1555_v26 = vmax.f32 %v6745_v42, %v5160_v46  ;;  %v5206_v61 = vpop.eup %3895  ;;  %v2398_v47 = vadd.f32 %v5199_v52, %v2206_v37  ;;  %3921 = vpow2.f32 %v2129_v20  ;;  %v2323_v40 = vmul.f32 1.442695, %v2274_v35 }
 0x302   : > { %6746 = vst [vmem:[#allocation39_spill] sm:$0xff] %v5206_v61  ;;  %v5211_v60 = vpop.eup %3897  ;;  %3923 = vpow2.f32 %v2321_v39  ;;  %v2275_v20 = vsub.f32 %v5094_v58, %v1859_v31  ;;  %v2467_v51 = vsub.f32 %v5168_v59, %v1859_v31  ;;  %v2515_v50 = vmul.f32 1.442695, %v2466_v21 }
 0x303   : > { %v5217_v42 = vpop.eup %3899  ;;  %v2590_v3 = vadd.f32 %v5206_v61, %v2398_v47  ;;  %3925 = vpow2.f32 %v2513_v48  ;;  %v1861_v35 = vmax.f32 %v1555_v26, %v5222_v34  ;;  %v1973_v47 = vmul.f32 1.442695, %v1923_v38  ;;  %v5240_v26 = vpop.f32.mrf.mxu0 }
 0x304   : > { %v5224_v37 = vpop.eup %3901  ;;  %v2207_v39 = vadd.f32 %v5217_v42, %v5211_v60  ;;  %3927 = vpow2.f32 %v1971_v49  ;;  %v2133_v48 = vmul.f32 1.442695, %v2083_v10  ;;  %v1924_v58 = vsub.f32 %v6697_v17, %v1860_v16 }
 0x305   : > { %6749 = vst [vmem:[#allocation40_spill] sm:$0xff] %v5224_v37  ;;  %v5229_v14 = vpop.eup %3903  ;;  %3929 = vrcp.f32 %v2590_v3  ;;  %v2084_v31 = vsub.f32 %v6696_v7, %v1860_v16  ;;  %v6752_v21 = vmax.f32 %v6702_v63, %v6701_v25  ;;  %v2325_v3 = vmul.f32 1.442695, %v2275_v20 }
 0x306   : > { %6750 = vst [vmem:[#allocation41_spill] sm:$0xff] %v5229_v14  ;;  %v5232_v61 = vpop.eup %3905  ;;  %v2399_v59 = vadd.f32 %v5229_v14, %v2207_v39  ;;  %3931 = vpow2.f32 %v2131_v23  ;;  %v2517_v38 = vmul.f32 1.442695, %v2467_v51  ;;  %v2276_v17 = vsub.f32 %v5129_v1, %v1860_v16  ;;  %v5250_v14 = vpop.f32.mrf.mxu1 }
 0x307   : > { %6751 = vst [vmem:[#allocation42_spill] sm:$0xff] %v5232_v61  ;;  %v1556_v49 = vmax.f32 %v6752_v21, %v5189_v8  ;;  %v5242_v52 = vpop.eup %3907  ;;  %3933 = vpow2.f32 %v2323_v40  ;;  %v2468_v7 = vsub.f32 %v5197_v28, %v1860_v16  ;;  %v1925_v39 = vsub.f32 %v6700_v62, %v1861_v35 }
 0x308   : > { %6753 = vst [vmem:[#allocation43_spill] sm:$0xff] %v5242_v52  ;;  %v5245_v10 = vpop.eup %3909  ;;  %v2591_v23 = vadd.f32 %v5232_v61, %v2399_v59  ;;  %3935 = vpow2.f32 %v2515_v50  ;;  %v1975_v20 = vmul.f32 1.442695, %v1924_v58  ;;  %v6755_v1 = vmax.f32 %v6705_v36, %v6704_v57  ;;  %v5264_v50 = vpop.f32.mrf.mxu0 }
 0x309   : > { %6754 = vst [vmem:[#allocation44_spill] sm:$0xff] %v5245_v10  ;;  %v5252_v21 = vpop.eup %3911  ;;  %v2208_v40 = vadd.f32 %v5245_v10, %v5242_v52  ;;  %3937 = vpow2.f32 %v1973_v47  ;;  %v2135_v28 = vmul.f32 1.442695, %v2084_v31  ;;  %v2085_v62 = vsub.f32 %v6699_v30, %v1861_v35  ;;  %v1779_v30 = vpop.f32.mrf.mxu1 }
 0x30a   : > { %v1557_v51 = vmax.f32 %v6755_v1, %v5215_v22  ;;  %v5260_v59 = vpop.eup %3913  ;;  %3939 = vrcp.f32 %v2591_v23  ;;  %v1862_v16 = vmax.f32 %v1556_v49, %v5250_v14  ;;  %v2277_v58 = vsub.f32 %v5160_v46, %v1861_v35 }
 0x30b   : > { %6756 = vst [vmem:[#allocation45_spill] sm:$0xff] %v5260_v59  ;;  %v5266_v61 = vpop.eup %3915  ;;  %v2400_v47 = vadd.f32 %v5260_v59, %v2208_v40  ;;  %3941 = vpow2.f32 %v2133_v48  ;;  %v2469_v10 = vsub.f32 %v5222_v34, %v1861_v35  ;;  %v2327_v23 = vmul.f32 1.442695, %v2276_v17  ;;  %v5284_v17 = vpop.f32.mrf.mxu0 }
 0x30c   : > { %6757 = vst [vmem:[#allocation46_spill] sm:$0xff] %v5266_v61  ;;  %v5271_v1 = vpop.eup %3917  ;;  %3943 = vpow2.f32 %v2325_v3  ;;  %v2519_v31 = vmul.f32 1.442695, %v2468_v7  ;;  %v1977_v52 = vmul.f32 1.442695, %v1925_v39  ;;  %v6759_v48 = vmax.f32 %v6710_v12, %v6709_v29 }
 0x30d   : > { %6758 = vst [vmem:[#allocation86_spill] sm:$0xff] %v5271_v1  ;;  %v5273_v37 = vpop.eup %3919  ;;  %v2592_v49 = vadd.f32 %v5266_v61, %v2400_v47  ;;  %3945 = vpow2.f32 %v2517_v38  ;;  %v1863_v46 = vmax.f32 %v1557_v51, %v1779_v30  ;;  %v2137_v34 = vmul.f32 1.442695, %v2085_v62  ;;  %v5298_v62 = vpop.f32.mrf.mxu1 }
 0x30e   : > { %v1558_v40 = vmax.f32 %v6759_v48, %v5240_v26  ;;  %v5280_v59 = vpop.eup %3921  ;;  %3947 = vpow2.f32 %v1975_v20  ;;  %v1926_v35 = vsub.f32 %v6702_v63, %v1862_v16  ;;  %v2086_v3 = vsub.f32 %v6701_v25, %v1862_v16 }
 0x30f   : > { %6760 = vst [vmem:[#allocation87_spill] sm:$0xff] %v5280_v59  ;;  %v5286_v7 = vpop.eup %3923  ;;  %3949 = vrcp.f32 %v2592_v49  ;;  %v2209_v38 = vadd.f32 %v5280_v59, %v5271_v1  ;;  %v2329_v39 = vmul.f32 1.442695, %v2277_v58  ;;  %v2521_v47 = vmul.f32 1.442695, %v2469_v10  ;;  %v5308_v1 = vpop.f32.mrf.mxu0 }
 0x310   : > { %v5290_v48 = vpop.eup %3925  ;;  %3951 = vpow2.f32 %v2135_v28  ;;  %v2278_v20 = vsub.f32 %v5189_v8, %v1862_v16  ;;  %v2470_v51 = vsub.f32 %v5250_v14, %v1862_v16  ;;  %v6762_v25 = vmax.f32 %v6714_v54, %v6713_v6 }
 0x311   : > { %6761 = vst [vmem:[#allocation88_spill] sm:$0xff] %v5290_v48  ;;  %v5300_v49 = vpop.eup %3927  ;;  %v2401_v59 = vadd.f32 %v5286_v7, %v2209_v38  ;;  %3953 = vpow2.f32 %v2327_v23  ;;  %v1927_v10 = vsub.f32 %v6705_v36, %v1863_v46  ;;  %v1864_v28 = vmax.f32 %v1558_v40, %v5298_v62 }
 0x312   : > { %v1559_v63 = vmax.f32 %v6762_v25, %v5264_v50  ;;  %6763 = vst [vmem:[#allocation89_spill] sm:$0xff] %v5300_v49  ;;  %v5305_v58 = vpop.eup %3929  ;;  %3955 = vpow2.f32 %v2519_v31  ;;  %v1979_v14 = vmul.f32 1.442695, %v1926_v35  ;;  %v2139_v8 = vmul.f32 1.442695, %v2086_v3  ;;  %v5318_v3 = vpop.f32.mrf.mxu1 }
 0x313   : > { %6764 = vst [vmem:[#allocation90_spill] sm:$0xff] %v5305_v58  ;;  %v2087_v16 = vsub.f32 %v6704_v57, %v1863_v46  ;;  %v5310_v25 = vpop.eup %3931  ;;  %v2593_v61 = vadd.f32 %v5290_v48, %v2401_v59  ;;  %3957 = vpow2.f32 %v1977_v52  ;;  %v2279_v23 = vsub.f32 %v5215_v22, %v1863_v46 }
 0x314   : > { %6765 = vst [vmem:[#allocation91_spill] sm:$0xff] %v5310_v25  ;;  %v2471_v38 = vsub.f32 %v1779_v30, %v1863_v46  ;;  %v5314_v36 = vpop.eup %3933  ;;  %v2210_v40 = vadd.f32 %v5310_v25, %v5300_v49  ;;  %3959 = vpow2.f32 %v2137_v34  ;;  %v2331_v31 = vmul.f32 1.442695, %v2278_v20  ;;  %v5328_v20 = vpop.f32.mrf.mxu0 }
 0x315   : > { %v2523_v35 = vmul.f32 1.442695, %v2470_v51  ;;  %v5320_v57 = vpop.eup %3935  ;;  %3961 = vrcp.f32 %v2593_v61  ;;  %v1981_v58 = vmul.f32 1.442695, %v1927_v10  ;;  %v1928_v59 = vsub.f32 %v6710_v12, %v1864_v28 }
 0x316   : > { %6766 = vst [vmem:[#allocation92_spill] sm:$0xff] %v5320_v57  ;;  %v1865_v52 = vmax.f32 %v1559_v63, %v5318_v3  ;;  %v5324_v22 = vpop.eup %3937  ;;  %v2402_v30 = vadd.f32 %v5314_v36, %v2210_v40  ;;  %3963 = vpow2.f32 %v2329_v39  ;;  %v2141_v46 = vmul.f32 1.442695, %v2087_v16  ;;  %v5350_v48 = vpop.f32.mrf.mxu0 }
 0x317   : > { %6767 = vst [vmem:[#allocation93_spill] sm:$0xff] %v5324_v22  ;;  %v2088_v34 = vsub.f32 %v6709_v29, %v1864_v28  ;;  %v5330_v51 = vpop.eup %3939  ;;  %3965 = vpow2.f32 %v2521_v47  ;;  %v2333_v25 = vmul.f32 1.442695, %v2279_v23  ;;  %v2525_v61 = vmul.f32 1.442695, %v2471_v38 }
 0x318   : > { %v6768_v12 = vmax.f32 %v6718_v13, %v6717_v43  ;;  %v5336_v10 = vpop.eup %3941  ;;  %v2594_v40 = vadd.f32 %v5320_v57, %v2402_v30  ;;  %3967 = vpow2.f32 %v1979_v14  ;;  %v2280_v39 = vsub.f32 %v5240_v26, %v1864_v28 }
 0x319   : > { %6769 = vst [vmem:[#allocation94_spill] sm:$0xff] %v5336_v10  ;;  %v2472_v29 = vsub.f32 %v5298_v62, %v1864_v28  ;;  %v5341_v16 = vpop.eup %3943  ;;  %v2211_v47 = vadd.f32 %v5336_v10, %v5324_v22  ;;  %3969 = vpow2.f32 %v2139_v8  ;;  %v1929_v23 = vsub.f32 %v6714_v54, %v1865_v52 }
 0x31a   : > { %v1560_v63 = vmax.f32 %v6768_v12, %v5284_v17  ;;  %6770 = vst [vmem:[#allocation95_spill] sm:$0xff] %v5341_v16  ;;  %v2089_v38 = vsub.f32 %v6713_v6, %v1865_v52  ;;  %v1787_v12 = vpop.f32.mrf.mxu1  ;;  %v5347_v49 = vpop.eup %3945  ;;  %3971 = vrcp.f32 %v2594_v40  ;;  %v1983_v30 = vmul.f32 1.442695, %v1928_v59 }
 0x31b   : > { %6771 = vst [vmem:[#allocation96_spill] sm:$0xff] %v5347_v49  ;;  %v2143_v14 = vmul.f32 1.442695, %v2088_v34  ;;  %v2281_v26 = vsub.f32 %v5264_v50, %v1865_v52  ;;  %v5352_v62 = vpop.eup %3947  ;;  %v2403_v28 = vadd.f32 %v5341_v16, %v2211_v47  ;;  %3973 = vpow2.f32 %v2331_v31 }
 0x31c   : > { %6772 = vst [vmem:[#allocation97_spill] sm:$0xff] %v5352_v62  ;;  %v6773_v54 = vmax.f32 %v6721_v44, %v6720_v18  ;;  %v1866_v8 = vmax.f32 %v1560_v63, %v1787_v12  ;;  %v5359_v10 = vpop.eup %3949  ;;  %3975 = vpow2.f32 %v2523_v35  ;;  %v2335_v59 = vmul.f32 1.442695, %v2280_v39  ;;  %v5367_v57 = vpop.f32.mrf.mxu1 }
 0x31d   : > { %6774 = vst [vmem:[#allocation98_spill] sm:$0xff] %v5359_v10  ;;  %v2527_v34 = vmul.f32 1.442695, %v2472_v29  ;;  %v2473_v50 = vsub.f32 %v5318_v3, %v1865_v52  ;;  %v5362_v40 = vpop.eup %3951  ;;  %v2595_v22 = vadd.f32 %v5347_v49, %v2403_v28  ;;  %3977 = vpow2.f32 %v1981_v58  ;;  %v5377_v39 = vpop.f32.mrf.mxu0 }
 0x31e   : > { %v1561_v6 = vmax.f32 %v6773_v54, %v5308_v1  ;;  %6775 = vst [vmem:[#allocation99_spill] sm:$0xff] %v5362_v40  ;;  %v1985_v47 = vmul.f32 1.442695, %v1929_v23  ;;  %v5365_v31 = vmul.f32 1.442695, %v2089_v38  ;;  %v5369_v16 = vpop.eup %3953  ;;  %v2212_v63 = vadd.f32 %v5362_v40, %v5352_v62 }
 0x31f   : > { %3979 = vpow2.f32 %v2141_v46  ;;  %v2337_v35 = vmul.f32 1.442695, %v2281_v26  ;;  %v6776_v3 = vmax.f32 %v6724_v56, %v6723_v27  ;;  %v5379_v58 = vpop.eup %3955  ;;  %v1930_v29 = vsub.f32 %v6718_v13, %v1866_v8 }
 0x320   : > { %6777 = vst [vmem:[#allocation100_spill] sm:$0xff] %v5379_v58  ;;  %3981 = vrcp.f32 %v2595_v22  ;;  %v2090_v23 = vsub.f32 %v6717_v43, %v1866_v8  ;;  %v1867_v38 = vmax.f32 %v1561_v6, %v5367_v57  ;;  %v5384_v28 = vpop.eup %3957  ;;  %v2404_v46 = vadd.f32 %v5369_v16, %v2212_v63  ;;  %v1793_v43 = vpop.f32.mrf.mxu1 }
 0x321   : > { %v1562_v52 = vmax.f32 %v6776_v3, %v5328_v20  ;;  %6778 = vst [vmem:[#allocation101_spill] sm:$0xff] %v5384_v28  ;;  %3983 = vpow2.f32 %v2333_v25  ;;  %v2529_v26 = vmul.f32 1.442695, %v2473_v50  ;;  %v2282_v54 = vsub.f32 %v5284_v17, %v1866_v8  ;;  %v5388_v3 = vpop.eup %3959 }
 0x322   : > { %6779 = vst [vmem:[#allocation102_spill] sm:$0xff] %v5388_v3  ;;  %3985 = vpow2.f32 %v2525_v61  ;;  %v2474_v40 = vsub.f32 %v1787_v12, %v1866_v8  ;;  %v6780_v13 = vmax.f32 %v6727_v2, %v6726_v24  ;;  %v6781_v6 = vmax.f32 %v6734_v5, %v6733_v32  ;;  %v5398_v63 = vpop.eup %3961 }
 0x323   : > { %v2596_v25 = vadd.f32 %v5379_v58, %v2404_v46  ;;  %v2213_v17 = vadd.f32 %v5388_v3, %v5384_v28  ;;  %3987 = vpow2.f32 %v1983_v30  ;;  %v1868_v61 = vmax.f32 %v1562_v52, %v1793_v43  ;;  %v5403_v12 = vpop.eup %3963 }
 0x324   : > { %v1563_v22 = vmax.f32 %v6780_v13, %v5350_v48  ;;  %v1564_v62 = vmax.f32 %v6781_v6, %v5377_v39  ;;  %3989 = vpow2.f32 %v2143_v14  ;;  %v1987_v8 = vmul.f32 1.442695, %v1930_v29  ;;  %v5406_v49 = vpop.eup %3965  ;;  %v5414_v29 = vpop.f32.mrf.mxu1 }
 0x325   : > { %v2147_v50 = vmul.f32 1.442695, %v2090_v23  ;;  %v1931_v13 = vsub.f32 %v6721_v44, %v1867_v38  ;;  %3991 = vrcp.f32 %v2596_v25  ;;  %v2405_v6 = vadd.f32 %v5403_v12, %v2213_v17  ;;  %v5410_v58 = vpop.eup %3967 }
 0x326   : > { %v2339_v10 = vmul.f32 1.442695, %v2282_v54  ;;  %v2091_v46 = vsub.f32 %v6720_v18, %v1867_v38  ;;  %6782 = vst [vmem:[#allocation103_spill] sm:$0xff] %v5410_v58  ;;  %3993 = vpow2.f32 %v2335_v59  ;;  %v2531_v30 = vmul.f32 1.442695, %v2474_v40  ;;  %v5416_v23 = vpop.eup %3969  ;;  %v5428_v40 = vpop.f32.mrf.mxu0 }
 0x327   : > { %v2283_v52 = vsub.f32 %v5308_v1, %v1867_v38  ;;  %v2475_v14 = vsub.f32 %v5367_v57, %v1867_v38  ;;  %6783 = vst [vmem:[#allocation104_spill] sm:$0xff] %v5416_v23  ;;  %v2597_v44 = vadd.f32 %v5406_v49, %v2405_v6  ;;  %3995 = vpow2.f32 %v2527_v34  ;;  %v5423_v18 = vpop.eup %3971 }
 0x328   : > { %v1932_v25 = vsub.f32 %v6724_v56, %v1868_v61  ;;  %v5421_v54 = vmax.f32 %v1563_v22, %v5414_v29  ;;  %v2214_v59 = vadd.f32 %v5416_v23, %v5410_v58  ;;  %3997 = vpow2.f32 %v1985_v47  ;;  %v5430_v38 = vpop.eup %3973 }
 0x329   : > { %v1989_v1 = vmul.f32 1.442695, %v1931_v13  ;;  %v2092_v57 = vsub.f32 %v6723_v27, %v1868_v61  ;;  %3999 = vrcp.f32 %v2597_v44  ;;  %v2149_v34 = vmul.f32 1.442695, %v2091_v46  ;;  %v5433_v22 = vpop.eup %3975  ;;  %v1799_v13 = vpop.f32.mrf.mxu1 }
 0x32a   : > { %v2284_v56 = vsub.f32 %v5328_v20, %v1868_v61  ;;  %v2476_v17 = vsub.f32 %v1793_v43, %v1868_v61  ;;  %v2406_v6 = vadd.f32 %v5430_v38, %v2214_v59  ;;  %4001 = vpow2.f32 %v5365_v31  ;;  %v5437_v28 = vpop.eup %3977 }
 0x32b   : > { %v2341_v3 = vmul.f32 1.442695, %v2283_v52  ;;  %v2533_v47 = vmul.f32 1.442695, %v2475_v14  ;;  %6784 = vst [vmem:[#allocation105_spill] sm:$0xff] %v5437_v28  ;;  %4003 = vpow2.f32 %v2337_v35  ;;  %v1933_v44 = vsub.f32 %v6727_v2, %v5421_v54  ;;  %v5450_v52 = vpop.f32.mrf.mxu0 }
 0x32c   : > { %v1991_v27 = vmul.f32 1.442695, %v1932_v25  ;;  %v1870_v46 = vmax.f32 %v1564_v62, %v1799_v13  ;;  %v5441_v23 = vpop.eup %3979  ;;  %v2598_v20 = vadd.f32 %v5433_v22, %v2406_v6  ;;  %4005 = vpow2.f32 %v2529_v26  ;;  %v5468_v6 = vpop.f32.mrf.mxu1 }
 0x32d   : > { %6785 = vst [vmem:[#allocation106_spill] sm:$0xff] %v5441_v23  ;;  %v5444_v43 = vmul.f32 1.442695, %v2092_v57  ;;  %v6786_v31 = vmax.f32 %v6739_v9, %v6738_v4  ;;  %v5452_v35 = vpop.eup %3981  ;;  %v2215_v2 = vadd.f32 %v5441_v23, %v5437_v28  ;;  %4007 = vpow2.f32 %v1987_v8 }
 0x32e   : > { %v5456_v62 = vmul.f32 1.442695, %v2284_v56  ;;  %v5458_v14 = vmul.f32 1.442695, %v2476_v17  ;;  %v5460_v26 = vpop.eup %3983  ;;  %4009 = vrcp.f32 %v2598_v20  ;;  %v2093_v25 = vsub.f32 %v6726_v24, %v5421_v54 }
 0x32f   : > { %v1565_v61 = vmax.f32 %v6786_v31, %v5428_v40  ;;  %v2285_v59 = vsub.f32 %v5350_v48, %v5421_v54  ;;  %v2477_v57 = vsub.f32 %v5414_v29, %v5421_v54  ;;  %v5470_v31 = vpop.eup %3985  ;;  %v2407_v8 = vadd.f32 %v5460_v26, %v2215_v2 }
 0x330   : > { %4011 = vpow2.f32 %v2147_v50  ;;  %v1934_v56 = vsub.f32 %v6734_v5, %v1870_v46  ;;  %v6787_v17 = vmax.f32 %v6748_v15, %v6747_v33  ;;  %v5478_v20 = vpop.eup %3987  ;;  %v1993_v48 = vmul.f32 1.442695, %v1933_v44 }
 0x331   : > { %6788 = vst [vmem:[#allocation107_spill] sm:$0xff] %v5478_v20  ;;  %4013 = vpow2.f32 %v2339_v10  ;;  %v2094_v29 = vsub.f32 %v6733_v32, %v1870_v46  ;;  %v5482_v54 = vmax.f32 %v1565_v61, %v5468_v6  ;;  %v5484_v23 = vpop.eup %3989  ;;  %v2599_v50 = vadd.f32 %v5470_v31, %v2407_v8  ;;  %v5494_v32 = vpop.f32.mrf.mxu1 }
 0x332   : > { %v1566_v24 = vmax.f32 %v6787_v17, %v5450_v52  ;;  %6789 = vst [vmem:[#allocation108_spill] sm:$0xff] %v5484_v23  ;;  %4015 = vpow2.f32 %v2531_v30  ;;  %v2286_v5 = vsub.f32 %v5377_v39, %v1870_v46  ;;  %v2478_v2 = vsub.f32 %v1799_v13, %v1870_v46  ;;  %v5488_v28 = vpop.eup %3991 }
 0x333   : > { %v2216_v17 = vadd.f32 %v5484_v23, %v5478_v20  ;;  %4017 = vpow2.f32 %v1989_v1  ;;  %v2153_v10 = vmul.f32 1.442695, %v2093_v25  ;;  %v5492_v44 = vmul.f32 1.442695, %v2285_v59  ;;  %v5496_v61 = vpop.eup %3993  ;;  %v6836_v23 = vld [vmem:[#allocation59_spill] sm:$0xff]  ;;  %v6837_v20 = vld [vmem:[#allocation80_spill] sm:$0xff] }
 0x334   : > { %4019 = vrcp.f32 %v2599_v50  ;;  %v5498_v58 = vmul.f32 1.442695, %v2477_v57  ;;  %v5500_v30 = vmul.f32 1.442695, %v1934_v56  ;;  %v5503_v39 = vmax.f32 %v1566_v24, %v5494_v32  ;;  %v5505_v13 = vpop.eup %3995 }
 0x335   : > { %v2408_v46 = vadd.f32 %v5496_v61, %v2216_v17  ;;  %4021 = vpow2.f32 %v2149_v34  ;;  %v1935_v1 = vsub.f32 %v6739_v9, %v5482_v54  ;;  %v2095_v25 = vsub.f32 %v6738_v4, %v5482_v54  ;;  %v5512_v59 = vpop.eup %3997 }
 0x336   : > { %6790 = vst [vmem:[#allocation109_spill] sm:$0xff] %v5512_v59  ;;  %4023 = vpow2.f32 %v2341_v3  ;;  %v5514_v57 = vmul.f32 1.442695, %v2094_v29  ;;  %v5516_v8 = vmul.f32 1.442695, %v2286_v5  ;;  %v5520_v24 = vpop.eup %3999  ;;  %v2287_v9 = vsub.f32 %v5428_v40, %v5482_v54 }
 0x337   : > { %v5518_v56 = vmul.f32 1.442695, %v2478_v2  ;;  %v2600_v50 = vadd.f32 %v5505_v13, %v2408_v46  ;;  %4025 = vpow2.f32 %v2533_v47  ;;  %v2479_v4 = vsub.f32 %v5468_v6, %v5482_v54  ;;  %v5527_v34 = vpop.eup %4001 }
 0x338   : > { %6791 = vst [vmem:[#allocation110_spill] sm:$0xff] %v5527_v34  ;;  %4027 = vpow2.f32 %v1991_v27  ;;  %v1936_v3 = vsub.f32 %v6748_v15, %v5503_v39  ;;  %v5533_v29 = vmul.f32 %v5273_v37, %v5139_v55  ;;  %v5537_v5 = vmul.f32 %v5330_v51, %v5211_v60  ;;  %v5539_v47 = vpop.eup %4003  ;;  %v6811_v55 = vld [vmem:[#allocation78_spill] sm:$0xff] }
 0x339   : > { %4029 = vrcp.f32 %v2600_v50  ;;  %v2217_v40 = vadd.f32 %v5527_v34, %v5512_v59  ;;  %v5543_v6 = vmul.f32 1.442695, %v1935_v1  ;;  %v5545_v27 = vmul.f32 1.442695, %v2095_v25  ;;  %v5547_v54 = vpop.eup %4005  ;;  %v6800_v50 = vld [vmem:[#allocation83_spill] sm:$0xff] }
 0x33a   : > { %6792 = vst [vmem:[#allocation111_spill] sm:$0xff] %v5533_v29  ;;  %6793 = vst [vmem:[#allocation112_spill] sm:$0xff] %v5537_v5  ;;  %4031 = vpow2.f32 %v5444_v43  ;;  %v5554_v60 = vmul.f32 %v5273_v37, %v5149_v45  ;;  %v5558_v15 = vmul.f32 %v5330_v51, %v5217_v42  ;;  %v5560_v2 = vpop.eup %4007  ;;  %v5566_v43 = vmul.f32 %v5191_v19, %v5021_v0  ;;  %v6808_v29 = vld [vmem:[#allocation27_spill] sm:$0xff] }
 0x33b   : > { %v2409_v17 = vadd.f32 %v5539_v47, %v2217_v40  ;;  %4033 = vpow2.f32 %v5456_v62  ;;  %v5570_v46 = vmul.f32 %v5252_v21, %v5096_v41  ;;  %v5572_v45 = vpop.eup %4009  ;;  %v5579_v1 = vmul.f32 %v5191_v19, %v5035_v11 }
 0x33c   : > { %6794 = vst [vmem:[#allocation113_spill] sm:$0xff] %v5554_v60  ;;  %6795 = vst [vmem:[#allocation114_spill] sm:$0xff] %v5558_v15  ;;  %4035 = vpow2.f32 %v5458_v14  ;;  %v5583_v62 = vmul.f32 %v5252_v21, %v5115_v53  ;;  %v5588_v25 = vmul.f32 1.442695, %v2287_v9  ;;  %v6801_v14 = vld [vmem:[#allocation33_spill] sm:$0xff]  ;;  %v6804_v9 = vld [vmem:[#allocation40_spill] sm:$0xff] }
 0x33d   : > { %6796 = vst [vmem:[#allocation115_spill] sm:$0xff] %v5566_v43  ;;  %6797 = vst [vmem:[#allocation116_spill] sm:$0xff] %v5570_v46  ;;  %v5585_v0 = vpop.eup %4011  ;;  %v2601_v41 = vadd.f32 %v5547_v54, %v2409_v17  ;;  %4037 = vpow2.f32 %v1993_v48  ;;  %v5592_v40 = vmul.f32 %v6801_v14, %v6800_v50  ;;  %v6803_v48 = vld [vmem:[#allocation25_spill] sm:$0xff]  ;;  %v6815_v43 = vld [vmem:[#allocation22_spill] sm:$0xff] }
 0x33e   : > { %6798 = vst [vmem:[#allocation117_spill] sm:$0xff] %v5579_v1  ;;  %6799 = vst [vmem:[#allocation118_spill] sm:$0xff] %v5583_v62  ;;  %v5594_v42 = vpop.eup %4013  ;;  %v2218_v11 = vadd.f32 %v5585_v0, %v5560_v2  ;;  %4039 = vpow2.f32 %v2153_v10  ;;  %v5606_v60 = vmul.f32 %v6804_v9, %v6803_v48  ;;  %v6806_v50 = vld [vmem:[#allocation85_spill] sm:$0xff]  ;;  %v5614_v10 = vmul.f32 %v6804_v9, %v6808_v29  ;;  %v6812_v48 = vld [vmem:[#allocation30_spill] sm:$0xff] }
 0x33f   : > { %6802 = vst [vmem:[#allocation83_spill] sm:$0xff] %v5592_v40  ;;  %v5602_v17 = vpop.eup %4015  ;;  %4041 = vrcp.f32 %v2601_v41  ;;  %v5610_v15 = vmul.f32 %v6801_v14, %v6806_v50  ;;  %v2096_v41 = vsub.f32 %v6747_v33, %v5503_v39  ;;  %v5624_v1 = vmul.f32 %v6812_v48, %v6811_v55 }
 0x340   : > { %6805 = vst [vmem:[#allocation33_spill] sm:$0xff] %v5606_v60  ;;  %6809 = vst [vmem:[#allocation40_spill] sm:$0xff] %v5614_v10  ;;  %v5616_v5 = vpop.eup %4017  ;;  %v2410_v53 = vadd.f32 %v5594_v42, %v2218_v11  ;;  %4043 = vpow2.f32 %v5492_v44  ;;  %v6814_v11 = vld [vmem:[#allocation67_spill] sm:$0xff]  ;;  %v2288_v55 = vsub.f32 %v5450_v52, %v5503_v39  ;;  %v2541_v52 = vmul.f32 1.442695, %v2479_v4 }
 0x341   : > { %6807 = vst [vmem:[#allocation25_spill] sm:$0xff] %v5610_v15  ;;  %6810 = vst [vmem:[#allocation85_spill] sm:$0xff] %v5616_v5  ;;  %v5626_v62 = vpop.eup %4019  ;;  %4045 = vpow2.f32 %v5498_v58  ;;  %v5635_v44 = vmul.f32 %v6815_v43, %v6814_v11  ;;  %v6818_v58 = vld [vmem:[#allocation69_spill] sm:$0xff]  ;;  %v2480_v10 = vsub.f32 %v5494_v32, %v5503_v39  ;;  %v6825_v4 = vld [vmem:[#allocation63_spill] sm:$0xff] }
 0x342   : > { %6813 = vst [vmem:[#allocation27_spill] sm:$0xff] %v5624_v1  ;;  %v5637_v46 = vpop.eup %4021  ;;  %v2602_v33 = vadd.f32 %v5602_v17, %v2410_v53  ;;  %4047 = vpow2.f32 %v5500_v30  ;;  %v5645_v34 = vmul.f32 %v6815_v43, %v6818_v58  ;;  %v6820_v53 = vld [vmem:[#allocation79_spill] sm:$0xff]  ;;  %v1999_v58 = vmul.f32 1.442695, %v1936_v3  ;;  %v6822_v11 = vld [vmem:[#allocation73_spill] sm:$0xff]  ;;  %v6826_v3 = vld [vmem:[#allocation84_spill] sm:$0xff] }
 0x343   : > { %6816 = vst [vmem:[#allocation78_spill] sm:$0xff] %v5635_v44  ;;  %6817 = vst [vmem:[#allocation30_spill] sm:$0xff] %v5637_v46  ;;  %v5647_v29 = vpop.eup %4023  ;;  %v2219_v50 = vadd.f32 %v5637_v46, %v5616_v5  ;;  %4049 = vpow2.f32 %v5514_v57  ;;  %v5656_v30 = vmul.f32 %v6812_v48, %v6820_v53  ;;  %v6823_v53 = vld [vmem:[#allocation26_spill] sm:$0xff]  ;;  %v5677_v32 = vmul.f32 %v6826_v3, %v6825_v4  ;;  %v6828_v39 = vld [vmem:[#allocation64_spill] sm:$0xff] }
 0x344   : > { %6819 = vst [vmem:[#allocation67_spill] sm:$0xff] %v5645_v34  ;;  %v5658_v15 = vpop.eup %4025  ;;  %4051 = vrcp.f32 %v2602_v33  ;;  %v5670_v44 = vmul.f32 %v6823_v53, %v6822_v11  ;;  %v2159_v34 = vmul.f32 1.442695, %v2096_v41  ;;  %v6834_v41 = vld [vmem:[#allocation72_spill] sm:$0xff]  ;;  %v5708_v46 = vmul.f32 %v6837_v20, %v6836_v23 }
 0x345   : > { %6821 = vst [vmem:[#allocation22_spill] sm:$0xff] %v5656_v30  ;;  %v5662_v40 = vpop.eup %4027  ;;  %v2411_v60 = vadd.f32 %v5647_v29, %v2219_v50  ;;  %4053 = vpow2.f32 %v5516_v8  ;;  %6827 = vst [vmem:[#allocation79_spill] sm:$0xff] %v5677_v32  ;;  %v5681_v50 = vmul.f32 %v6826_v3, %v6828_v39  ;;  %v6830_v8 = vld [vmem:[#allocation74_spill] sm:$0xff]  ;;  %v6840_v39 = vld [vmem:[#allocation52_spill] sm:$0xff] }
 0x346   : > { %6824 = vst [vmem:[#allocation69_spill] sm:$0xff] %v5670_v44  ;;  %v5672_v1 = vpop.eup %4029  ;;  %4055 = vpow2.f32 %v5518_v56  ;;  %v5685_v33 = vmul.f32 %v6823_v53, %v6830_v8  ;;  %v2351_v56 = vmul.f32 1.442695, %v2288_v55  ;;  %6838 = vst [vmem:[#allocation64_spill] sm:$0xff] %v5708_v46  ;;  %v5716_v8 = vmul.f32 %v6834_v41, %v6840_v39  ;;  %v6851_v46 = vld [vmem:[#allocation48_spill] sm:$0xff] }
 0x347   : > { %6829 = vst [vmem:[#allocation73_spill] sm:$0xff] %v5681_v50  ;;  %v5687_v57 = vpop.eup %4031  ;;  %v2603_v11 = vadd.f32 %v5658_v15, %v2411_v60  ;;  %4057 = vpow2.f32 %v5543_v6  ;;  %v2543_v60 = vmul.f32 1.442695, %v2480_v10  ;;  %v6833_v6 = vld [vmem:[#allocation51_spill] sm:$0xff] }
 0x348   : > { %6831 = vst [vmem:[#allocation26_spill] sm:$0xff] %v5685_v33  ;;  %6832 = vst [vmem:[#allocation63_spill] sm:$0xff] %v5687_v57  ;;  %v5691_v30 = vpop.eup %4033  ;;  %v2220_v4 = vadd.f32 %v5687_v57, %v5662_v40  ;;  %4059 = vpow2.f32 %v5545_v27  ;;  %v5704_v55 = vmul.f32 %v6834_v41, %v6833_v6  ;;  %v6845_v50 = vld [vmem:[#allocation47_spill] sm:$0xff]  ;;  %v6846_v33 = vld [vmem:[#allocation68_spill] sm:$0xff] }
 0x349   : > { %v5700_v59 = vpop.eup %4035  ;;  %4061 = vrcp.f32 %v2603_v11  ;;  %6841 = vst [vmem:[#allocation51_spill] sm:$0xff] %v5716_v8  ;;  %v6842_v11 = vld [vmem:[#allocation60_spill] sm:$0xff]  ;;  %v5728_v32 = vmul.f32 %v6846_v33, %v6845_v50 }
 0x34a   : > { %6835 = vst [vmem:[#allocation84_spill] sm:$0xff] %v5704_v55  ;;  %v5710_v5 = vpop.eup %4037  ;;  %v2412_v27 = vadd.f32 %v5691_v30, %v2220_v4  ;;  %4063 = vpow2.f32 %v5588_v25  ;;  %v5720_v10 = vmul.f32 %v6837_v20, %v6842_v11  ;;  %v6848_v4 = vld [vmem:[#allocation55_spill] sm:$0xff]  ;;  %v6849_v25 = vld [vmem:[#allocation76_spill] sm:$0xff] }
 0x34b   : > { %6839 = vst [vmem:[#allocation74_spill] sm:$0xff] %v5710_v5  ;;  %v5722_v6 = vpop.eup %4039  ;;  %4065 = vpow2.f32 %v2541_v52  ;;  %6847 = vst [vmem:[#allocation52_spill] sm:$0xff] %v5728_v32  ;;  %v5732_v44 = vmul.f32 %v6849_v25, %v6848_v4  ;;  %v5787_v32 = vmul.f32 %v5626_v62, %v5460_v26  ;;  %v5806_v26 = vmul.f32 %v5488_v28, %v5369_v16  ;;  %v6873_v16 = vld [vmem:[#allocation34_spill] sm:$0xff] }
 0x34c   : > { %6843 = vst [vmem:[#allocation59_spill] sm:$0xff] %v5720_v10  ;;  %6844 = vst [vmem:[#allocation80_spill] sm:$0xff] %v5722_v6  ;;  %v5734_v39 = vpop.eup %4041  ;;  %v2604_v57 = vadd.f32 %v5700_v59, %v2412_v27  ;;  %v2221_v11 = vadd.f32 %v5722_v6, %v5710_v5  ;;  %4067 = vpow2.f32 %v1999_v58  ;;  %v5750_v27 = vmul.f32 %v6846_v33, %v6851_v46  ;;  %v6853_v6 = vld [vmem:[#allocation56_spill] sm:$0xff]  ;;  %v6876_v10 = vld [vmem:[#allocation41_spill] sm:$0xff] }
 0x34d   : > { %6850 = vst [vmem:[#allocation60_spill] sm:$0xff] %v5732_v44  ;;  %v5741_v23 = vpop.eup %4043  ;;  %4069 = vpow2.f32 %v2159_v34  ;;  %v5754_v58 = vmul.f32 %v6849_v25, %v6853_v6  ;;  %v5760_v34 = vmul.f32 %v5734_v39, %v5539_v47  ;;  %v5777_v47 = vmul.f32 %v5520_v24, %v5403_v12  ;;  %6861 = vst [vmem:[#allocation121_spill] sm:$0xff] %v5787_v32  ;;  %v6870_v44 = vld [vmem:[#allocation45_spill] sm:$0xff] }
 0x34e   : > { %v5745_v55 = vpop.eup %4045  ;;  %4071 = vrcp.f32 %v2604_v57  ;;  %v2413_v4 = vadd.f32 %v5741_v23, %v2221_v11  ;;  %6852 = vst [vmem:[#allocation47_spill] sm:$0xff] %v5750_v27  ;;  %v5764_v57 = vmul.f32 %v5572_v45, %v5430_v38  ;;  %v5768_v11 = vmul.f32 %v5672_v1, %v5496_v61  ;;  %6863 = vst [vmem:[#allocation123_spill] sm:$0xff] %v5806_v26  ;;  %v6871_v61 = vld [vmem:[#allocation98_spill] sm:$0xff] }
 0x34f   : > { %6854 = vst [vmem:[#allocation68_spill] sm:$0xff] %v5754_v58  ;;  %v5756_v52 = vpop.eup %4047  ;;  %4073 = vpow2.f32 %v2351_v56  ;;  %6856 = vst [vmem:[#allocation76_spill] sm:$0xff] %v5760_v34  ;;  %v6868_v58 = vld [vmem:[#allocation90_spill] sm:$0xff]  ;;  %v5828_v32 = vmul.f32 %v5273_v37, %v6873_v16  ;;  %v5837_v5 = vmul.f32 %v5330_v51, %v6876_v10 }
 0x350   : > { %6855 = vst [vmem:[#allocation55_spill] sm:$0xff] %v5756_v52  ;;  %6857 = vst [vmem:[#allocation48_spill] sm:$0xff] %v5764_v57  ;;  %v5770_v46 = vpop.eup %4049  ;;  %v2605_v6 = vadd.f32 %v5745_v55, %v2413_v4  ;;  %4075 = vpow2.f32 %v2543_v60  ;;  %v5791_v60 = vmul.f32 %v5423_v18, %v5314_v36  ;;  %v5810_v36 = vmul.f32 %v5398_v63, %v5286_v7  ;;  %v6865_v57 = vld [vmem:[#allocation95_spill] sm:$0xff] }
 0x351   : > { %6858 = vst [vmem:[#allocation56_spill] sm:$0xff] %v5768_v11  ;;  %6859 = vst [vmem:[#allocation119_spill] sm:$0xff] %v5770_v46  ;;  %v5779_v50 = vpop.eup %4051  ;;  %v2222_v38 = vadd.f32 %v5770_v46, %v5756_v52  ;;  %v6867_v11 = vld [vmem:[#allocation38_spill] sm:$0xff] }
 0x352   : > { %6860 = vst [vmem:[#allocation120_spill] sm:$0xff] %v5777_v47  ;;  %6862 = vst [vmem:[#allocation122_spill] sm:$0xff] %v5791_v60  ;;  %v5793_v4 = vpop.eup %4053  ;;  %4077 = vrcp.f32 %v2605_v6  ;;  %v5797_v12 = vmul.f32 %v5779_v50, %v5594_v42  ;;  %v5816_v42 = vmul.f32 %v5452_v35, %v6865_v57  ;;  %v5824_v47 = vmul.f32 %v6871_v61, %v6870_v44  ;;  %v6880_v57 = vld [vmem:[#allocation31_spill] sm:$0xff] }
 0x353   : > { %v5799_v56 = vpop.eup %4055  ;;  %v2414_v27 = vadd.f32 %v5793_v4, %v2222_v38  ;;  %6864 = vst [vmem:[#allocation124_spill] sm:$0xff] %v5810_v36  ;;  %v5820_v38 = vmul.f32 %v6868_v58, %v6867_v11  ;;  %6874 = vst [vmem:[#allocation45_spill] sm:$0xff] %v5828_v32  ;;  %v6878_v11 = vld [vmem:[#allocation23_spill] sm:$0xff]  ;;  %v5853_v60 = vmul.f32 %v5252_v21, %v6880_v57  ;;  %v6889_v32 = vld [vmem:[#allocation70_spill] sm:$0xff] }
 0x354   : > { %v5812_v6 = vpop.eup %4057  ;;  %6866 = vst [vmem:[#allocation95_spill] sm:$0xff] %v5816_v42  ;;  %6872 = vst [vmem:[#allocation90_spill] sm:$0xff] %v5824_v47  ;;  %v5841_v46 = vmul.f32 %v5191_v19, %v6878_v11 }
 0x355   : > { %6869 = vst [vmem:[#allocation38_spill] sm:$0xff] %v5820_v38  ;;  %v5830_v7 = vpop.eup %4059  ;;  %v2606_v8 = vadd.f32 %v5799_v56, %v2414_v27  ;;  %6877 = vst [vmem:[#allocation34_spill] sm:$0xff] %v5837_v5  ;;  %v5885_v27 = vmul.f32 %v6815_v43, %v6889_v32  ;;  %v6892_v5 = vld [vmem:[#allocation65_spill] sm:$0xff] }
 0x356   : > { %6875 = vst [vmem:[#allocation98_spill] sm:$0xff] %v5830_v7  ;;  %6879 = vst [vmem:[#allocation41_spill] sm:$0xff] %v5841_v46  ;;  %v5843_v44 = vpop.eup %4061  ;;  %v2223_v16 = vadd.f32 %v5830_v7, %v5812_v6  ;;  %v6891_v46 = vld [vmem:[#allocation81_spill] sm:$0xff]  ;;  %v5899_v42 = vmul.f32 %v6826_v3, %v6892_v5 }
 0x357   : > { %6881 = vst [vmem:[#allocation23_spill] sm:$0xff] %v5853_v60  ;;  %v5855_v10 = vpop.eup %4063  ;;  %4079 = vrcp.f32 %v2606_v8  ;;  %v5859_v11 = vmul.f32 %v5843_v44, %v5647_v29  ;;  %v6884_v8 = vld [vmem:[#allocation20_spill] sm:$0xff]  ;;  %6890 = vst [vmem:[#allocation70_spill] sm:$0xff] %v5885_v27  ;;  %v5889_v60 = vmul.f32 %v6812_v48, %v6891_v46  ;;  %v6899_v27 = vld [vmem:[#allocation57_spill] sm:$0xff] }
 0x358   : > { %v5861_v26 = vpop.eup %4065  ;;  %v2415_v7 = vadd.f32 %v5855_v10, %v2223_v16  ;;  %v5874_v47 = vmul.f32 %v6801_v14, %v6884_v8  ;;  %v6886_v29 = vld [vmem:[#allocation28_spill] sm:$0xff] }
 0x359   : > { %6882 = vst [vmem:[#allocation31_spill] sm:$0xff] %v5859_v11  ;;  %v5868_v38 = vpop.eup %4067  ;;  %v5878_v36 = vmul.f32 %v6804_v9, %v6886_v29  ;;  %v6894_v11 = vld [vmem:[#allocation53_spill] sm:$0xff] }
 0x35a   : > { %6883 = vst [vmem:[#allocation125_spill] sm:$0xff] %v5868_v38  ;;  %6885 = vst [vmem:[#allocation20_spill] sm:$0xff] %v5874_v47  ;;  %v5880_v16 = vpop.eup %4069  ;;  %v2607_v52 = vadd.f32 %v5861_v26, %v2415_v7  ;;  %v6893_v7 = vld [vmem:[#allocation75_spill] sm:$0xff] }
 0x35b   : > { %6887 = vst [vmem:[#allocation28_spill] sm:$0xff] %v5878_v36  ;;  %6888 = vst [vmem:[#allocation126_spill] sm:$0xff] %v5880_v16  ;;  %v5891_v57 = vpop.eup %4071  ;;  %v2224_v8 = vadd.f32 %v5880_v16, %v5868_v38  ;;  %v5903_v32 = vmul.f32 %v6823_v53, %v6893_v7  ;;  %v5913_v16 = vmul.f32 %v6834_v41, %v6894_v11  ;;  %v6896_v36 = vld [vmem:[#allocation61_spill] sm:$0xff] }
 0x35c   : > { %v5905_v34 = vpop.eup %4073  ;;  %4081 = vrcp.f32 %v2607_v52  ;;  %v5909_v46 = vmul.f32 %v5891_v57, %v5691_v30  ;;  %v5924_v52 = vmul.f32 %v6837_v20, %v6896_v36  ;;  %v6897_v38 = vld [vmem:[#allocation49_spill] sm:$0xff]  ;;  %v5939_v7 = vmul.f32 %v6849_v25, %v6899_v27 }
 0x35d   : > { %6895 = vst [vmem:[#allocation81_spill] sm:$0xff] %v5913_v16  ;;  %v5915_v29 = vpop.eup %4075  ;;  %v2416_v5 = vadd.f32 %v5905_v34, %v2224_v8  ;;  %v5930_v11 = vmul.f32 %v6846_v33, %v6897_v38  ;;  %v5943_v36 = vmul.f32 %v5779_v50, %v5602_v17  ;;  %v5957_v27 = vmul.f32 %v5891_v57, %v5700_v59 }
 0x35e   : > { %6900 = vst [vmem:[#allocation75_spill] sm:$0xff] %v5939_v7  ;;  %v5961_v17 = vmul.f32 %v5734_v39, %v5547_v54  ;;  %v5977_v59 = vmul.f32 %v5520_v24, %v5406_v49  ;;  %v6908_v54 = vld [vmem:[#allocation88_spill] sm:$0xff]  ;;  %v2902_v7 = vmul.f32 %v5779_v50, %v5585_v0 }
 0x35f   : > { %6898 = vst [vmem:[#allocation65_spill] sm:$0xff] %v5930_v11  ;;  %v5932_v41 = vpop.eup %4077  ;;  %v2608_v8 = vadd.f32 %v5915_v29, %v2416_v5  ;;  %6901 = vst [vmem:[#allocation53_spill] sm:$0xff] %v5943_v36  ;;  %v5983_v5 = vmul.f32 %v5626_v62, %v5470_v31  ;;  %v5999_v36 = vmul.f32 %v5398_v63, %v6908_v54  ;;  %v6910_v31 = vld [vmem:[#allocation96_spill] sm:$0xff] }
 0x360   : > { %v5947_v30 = vmul.f32 %v5932_v41, %v5741_v23  ;;  %v5951_v38 = vmul.f32 %v5932_v41, %v5745_v55  ;;  %6902 = vst [vmem:[#allocation61_spill] sm:$0xff] %v5957_v27  ;;  %v5965_v23 = vmul.f32 %v5843_v44, %v5658_v15  ;;  %v5969_v55 = vmul.f32 %v5572_v45, %v5433_v22  ;;  %v6905_v15 = vld [vmem:[#allocation92_spill] sm:$0xff] }
 0x361   : > { %4083 = vrcp.f32 %v2608_v8  ;;  %v5973_v8 = vmul.f32 %v5672_v1, %v5505_v13  ;;  %v5987_v47 = vmul.f32 %v5423_v18, %v6905_v15  ;;  %v6907_v22 = vld [vmem:[#allocation100_spill] sm:$0xff]  ;;  %v6003_v27 = vmul.f32 %v5452_v35, %v6910_v31 }
 0x362   : > { %6903 = vst [vmem:[#allocation49_spill] sm:$0xff] %v5969_v55  ;;  %v5991_v11 = vmul.f32 %v5488_v28, %v6907_v22  ;;  %6909 = vst [vmem:[#allocation100_spill] sm:$0xff] %v5999_v36  ;;  %v2705_v15 = vmul.f32 %v5779_v50, %v5560_v2  ;;  %v6912_v55 = vld [vmem:[#allocation39_spill] sm:$0xff]  ;;  %v6916_v50 = vld [vmem:[#allocation42_spill] sm:$0xff] }
 0x363   : > { %6904 = vst [vmem:[#allocation57_spill] sm:$0xff] %v5973_v8  ;;  %6906 = vst [vmem:[#allocation92_spill] sm:$0xff] %v5987_v47  ;;  %v6023_v2 = vmul.f32 %v6868_v58, %v6912_v55  ;;  %v6914_v8 = vld [vmem:[#allocation35_spill] sm:$0xff]  ;;  %v6035_v54 = vmul.f32 %v5330_v51, %v6916_v50  ;;  %v6917_v49 = vld [vmem:[#allocation24_spill] sm:$0xff] }
 0x364   : > { %v4080_v13 = vpop.eup %4079  ;;  %6911 = vst [vmem:[#allocation88_spill] sm:$0xff] %v6003_v27  ;;  %v6031_v0 = vmul.f32 %v5273_v37, %v6914_v8  ;;  %v6039_v47 = vmul.f32 %v5191_v19, %v6917_v49  ;;  %v6918_v31 = vld [vmem:[#allocation32_spill] sm:$0xff]  ;;  %v6919_v36 = vld [vmem:[#allocation21_spill] sm:$0xff]  ;;  %v6923_v49 = vld [vmem:[#allocation71_spill] sm:$0xff] }
 0x365   : > { %v6008_v22 = vmul.f32 %v4080_v13, %v5793_v4  ;;  %v6011_v16 = vmul.f32 %v4080_v13, %v5799_v56  ;;  %v6913_v4 = vld [vmem:[#allocation46_spill] sm:$0xff]  ;;  %v6043_v55 = vmul.f32 %v5252_v21, %v6918_v31  ;;  %v6921_v27 = vld [vmem:[#allocation29_spill] sm:$0xff]  ;;  %v6059_v50 = vmul.f32 %v6815_v43, %v6923_v49  ;;  %v6931_v51 = vld [vmem:[#allocation63_spill] sm:$0xff] }
 0x366   : > { %v6027_v56 = vmul.f32 %v6871_v61, %v6913_v4  ;;  %6915 = vst [vmem:[#allocation96_spill] sm:$0xff] %v6031_v0  ;;  %v6047_v4 = vmul.f32 %v6801_v14, %v6919_v36  ;;  %v6051_v37 = vmul.f32 %v6804_v9, %v6921_v27  ;;  %v6925_v21 = vld [vmem:[#allocation82_spill] sm:$0xff]  ;;  %v2707_v14 = vmul.f32 %v5891_v57, %v5662_v40  ;;  %v6929_v40 = vld [vmem:[#allocation77_spill] sm:$0xff]  ;;  %v6932_v43 = vld [vmem:[#allocation119_spill] sm:$0xff] }
 0x367   : > { %6924 = vst [vmem:[#allocation35_spill] sm:$0xff] %v6059_v50  ;;  %v6063_v31 = vmul.f32 %v6812_v48, %v6925_v21  ;;  %v6927_v27 = vld [vmem:[#allocation66_spill] sm:$0xff]  ;;  %v6930_v21 = vld [vmem:[#allocation55_spill] sm:$0xff]  ;;  %v2904_v0 = vmul.f32 %v5891_v57, %v6931_v51  ;;  %v2906_v48 = vmul.f32 %v4080_v13, %v6932_v43  ;;  %v6939_v43 = vld [vmem:[#allocation125_spill] sm:$0xff] }
 0x368   : > { %6920 = vst [vmem:[#allocation39_spill] sm:$0xff] %v6047_v4  ;;  %6922 = vst [vmem:[#allocation46_spill] sm:$0xff] %v6051_v37  ;;  %v6075_v19 = vmul.f32 %v6826_v3, %v6927_v27  ;;  %v6934_v50 = vld [vmem:[#allocation98_spill] sm:$0xff] }
 0x369   : > { %v4082_v8 = vpop.eup %4081  ;;  %6926 = vst [vmem:[#allocation42_spill] sm:$0xff] %v6063_v31  ;;  %v6935_v51 = vld [vmem:[#allocation54_spill] sm:$0xff]  ;;  %v6936_v31 = vld [vmem:[#allocation72_spill] sm:$0xff] }
 0x36a   : > { %v6068_v9 = vmul.f32 %v4082_v8, %v5855_v10  ;;  %v6071_v36 = vmul.f32 %v4082_v8, %v5861_v26  ;;  %6928 = vst [vmem:[#allocation24_spill] sm:$0xff] %v6075_v19  ;;  %v6085_v10 = vmul.f32 %v6823_v53, %v6929_v40  ;;  %v2709_v26 = vmul.f32 %v4080_v13, %v6930_v21  ;;  %v6933_v53 = vld [vmem:[#allocation62_spill] sm:$0xff] }
 0x36b   : > { %v2710_v4 = vmul.f32 %v4082_v8, %v5812_v6  ;;  %v6100_v40 = vmul.f32 %v6837_v20, %v6933_v53  ;;  %v2907_v57 = vmul.f32 %v4082_v8, %v6934_v50  ;;  %v6105_v3 = vmul.f32 %v6936_v31, %v6935_v51  ;;  %v6937_v37 = vld [vmem:[#allocation50_spill] sm:$0xff]  ;;  %v6942_v51 = vld [vmem:[#allocation80_spill] sm:$0xff] }
 0x36c   : > { %v6109_v27 = vmul.f32 %v6846_v33, %v6937_v37  ;;  %v6938_v13 = vld [vmem:[#allocation58_spill] sm:$0xff]  ;;  %v2905_v33 = vmul.f32 %v5932_v41, %v6942_v51  ;;  %v6943_v51 = vld [vmem:[#allocation85_spill] sm:$0xff] }
 0x36d   : > { %v6113_v6 = vmul.f32 %v6849_v25, %v6938_v13  ;;  %v6940_v19 = vld [vmem:[#allocation126_spill] sm:$0xff]  ;;  %v6946_v25 = vld [vmem:[#allocation108_spill] sm:$0xff] }
 0x36e   : > { %v4084_v21 = vpop.eup %4083  ;;  %v6941_v50 = vld [vmem:[#allocation74_spill] sm:$0xff] }
 0x36f   : > { %v2711_v49 = vmul.f32 %v4084_v21, %v6939_v43  ;;  %v2908_v20 = vmul.f32 %v4084_v21, %v6940_v19  ;;  %v6118_v53 = vmul.f32 %v4084_v21, %v5905_v34  ;;  %v6121_v8 = vmul.f32 %v4084_v21, %v5915_v29 }
 0x370   : > { %v2708_v31 = vmul.f32 %v5932_v41, %v6941_v50  ;;  %v2923_v43 = vpack.c.bf16 %v2907_v57, %v2905_v33  ;;  %v2725_v50 = vpack.c.bf16 %v2707_v14, %v2705_v15  ;;  %v2922_v41 = vpack.c.bf16 %v2904_v0, %v2902_v7  ;;  %v6947_v57 = vld [vmem:[#allocation109_spill] sm:$0xff]  ;;  %v6948_v7 = vld [vmem:[#allocation110_spill] sm:$0xff]  ;;  %v6949_v14 = vld [vmem:[#allocation103_spill] sm:$0xff] }
 0x371   : > { %v2727_v13 = vpack.c.bf16 %v2711_v49, %v2709_v26  ;;  %v2924_v19 = vpack.c.bf16 %v2908_v20, %v2906_v48  ;;  %v3121_v34 = vpack.c.bf16 %v6118_v53, %v6008_v22  ;;  %v3318_v29 = vpack.c.bf16 %v6121_v8, %v6011_v16  ;;  %v6944_v48 = vld [vmem:[#allocation30_spill] sm:$0xff]  ;;  %v6945_v20 = vld [vmem:[#allocation107_spill] sm:$0xff]  ;;  %v6950_v33 = vld [vmem:[#allocation104_spill] sm:$0xff] }
 0x372   : > { %v2726_v21 = vpack.c.bf16 %v2710_v4, %v2708_v31  ;;  %v2706_v49 = vmul.f32 %v5843_v44, %v6943_v51  ;;  %v2903_v26 = vmul.f32 %v5843_v44, %v6944_v48  ;;  %v2703_v37 = vmul.f32 %v5672_v1, %v6945_v20  ;;  %v6954_v48 = vld [vmem:[#allocation99_spill] sm:$0xff]  ;;  %v7020_v22 = vld [vmem:[#allocation56_spill] sm:$0xff] }
 0x373   : > { %2730 = vmatprep.subr.bf16.mxu0 %v2727_v13  ;;  %2927 = vmatprep.subr.bf16.mxu1 %v2924_v19  ;;  %v2900_v4 = vmul.f32 %v5672_v1, %v6946_v25  ;;  %v2704_v15 = vmul.f32 %v5734_v39, %v6947_v57  ;;  %v2901_v0 = vmul.f32 %v5734_v39, %v6948_v7  ;;  %v6951_v1 = vld [vmem:[#allocation105_spill] sm:$0xff]  ;;  %v7021_v53 = vld [vmem:[#allocation48_spill] sm:$0xff] }
 0x374   : > { %2731 = vmatpush1.bf16.xpose.msra.mxu0 %v2726_v21  ;;  %2928 = vmatpush1.bf16.xpose.msra.mxu1 %v2923_v43  ;;  %v2701_v31 = vmul.f32 %v5572_v45, %v6949_v14  ;;  %v2898_v13 = vmul.f32 %v5572_v45, %v6950_v33  ;;  %v2702_v25 = vmul.f32 %v5626_v62, %v6951_v1  ;;  %v7065_v8 = vld [vmem:[#allocation88_spill] sm:$0xff] }
 0x375   : > { %2732 = vmatprep.subr.bf16.mxu0 %v2725_v50  ;;  %2929 = vmatprep.subr.bf16.mxu1 %v2922_v41  ;;  %v2724_v19 = vpack.c.bf16 %v2706_v49, %v2704_v15  ;;  %v2921_v44 = vpack.c.bf16 %v2903_v26, %v2901_v0  ;;  %v6952_v50 = vld [vmem:[#allocation106_spill] sm:$0xff]  ;;  %v6953_v41 = vld [vmem:[#allocation97_spill] sm:$0xff]  ;;  %v2896_v45 = vmul.f32 %v5488_v28, %v6954_v48  ;;  %v6958_v15 = vld [vmem:[#allocation91_spill] sm:$0xff] }
 0x376   : > { %v2723_v21 = vpack.c.bf16 %v2703_v37, %v2701_v31  ;;  %v2920_v43 = vpack.c.bf16 %v2900_v4, %v2898_v13  ;;  %v2899_v39 = vmul.f32 %v5626_v62, %v6952_v50  ;;  %v2699_v51 = vmul.f32 %v5488_v28, %v6953_v41  ;;  %v6955_v49 = vld [vmem:[#allocation101_spill] sm:$0xff]  ;;  %v6956_v26 = vld [vmem:[#allocation102_spill] sm:$0xff] }
 0x377   : > { %v2700_v37 = vmul.f32 %v5520_v24, %v6955_v49  ;;  %v2897_v20 = vmul.f32 %v5520_v24, %v6956_v26  ;;  %v6957_v4 = vld [vmem:[#allocation89_spill] sm:$0xff]  ;;  %v2894_v7 = vmul.f32 %v5423_v18, %v6958_v15  ;;  %v6960_v13 = vld [vmem:[#allocation94_spill] sm:$0xff]  ;;  %v6968_v26 = vld [vmem:[#allocation111_spill] sm:$0xff]  ;;  %v7062_v16 = vpack.c.bf16 %v5983_v5, %v5977_v59 }
 0x378   : > { %v2697_v57 = vmul.f32 %v5423_v18, %v6957_v4  ;;  %v6959_v28 = vld [vmem:[#allocation93_spill] sm:$0xff]  ;;  %v2895_v24 = vmul.f32 %v5452_v35, %v6960_v13  ;;  %v6970_v4 = vld [vmem:[#allocation114_spill] sm:$0xff]  ;;  %v6973_v15 = vld [vmem:[#allocation116_spill] sm:$0xff]  ;;  %v7071_v5 = vpack.c.bf16 %v6043_v55, %v6039_v47  ;;  %v7081_v47 = vpack.c.bf16 %v6113_v6, %v6109_v27 }
 0x379   : > { %v2722_v0 = vpack.c.bf16 %v2702_v25, %v2700_v37  ;;  %v2919_v62 = vpack.c.bf16 %v2899_v39, %v2897_v20  ;;  %v2918_v31 = vpack.c.bf16 %v2896_v45, %v2894_v7  ;;  %v2698_v33 = vmul.f32 %v5452_v35, %v6959_v28  ;;  %v6964_v25 = vld [vmem:[#allocation87_spill] sm:$0xff]  ;;  %v6965_v39 = vld [vmem:[#allocation36_spill] sm:$0xff]  ;;  %v7072_v59 = vld [vmem:[#allocation46_spill] sm:$0xff] }
 0x37a   : > { %v2721_v14 = vpack.c.bf16 %v2699_v51, %v2697_v57  ;;  %v2893_v50 = vmul.f32 %v5398_v63, %v6964_v25  ;;  %v2693_v41 = vmul.f32 %v6868_v58, %v6965_v39  ;;  %v6966_v51 = vld [vmem:[#allocation37_spill] sm:$0xff]  ;;  %v6974_v7 = vld [vmem:[#allocation115_spill] sm:$0xff]  ;;  %v6982_v13 = vld [vmem:[#allocation40_spill] sm:$0xff] }
 0x37b   : > { %v2890_v48 = vmul.f32 %v6868_v58, %v6966_v51  ;;  %v6976_v58 = vld [vmem:[#allocation118_spill] sm:$0xff]  ;;  %v6980_v28 = vld [vmem:[#allocation83_spill] sm:$0xff] }
 0x37c   : > { %2733 = vmatpush1.bf16.xpose.msra.mxu0 %v2724_v19  ;;  %2930 = vmatpush1.bf16.xpose.msra.mxu1 %v2921_v44  ;;  %v6961_v19 = vld [vmem:[#allocation43_spill] sm:$0xff]  ;;  %v2917_v35 = vpack.c.bf16 %v2895_v24, %v2893_v50  ;;  %v6983_v24 = vld [vmem:[#allocation25_spill] sm:$0xff]  ;;  %v6994_v51 = vld [vmem:[#allocation26_spill] sm:$0xff] }
 0x37d   : > { %2734 = vmatprep.subr.bf16.mxu0 %v2723_v21  ;;  %2931 = vmatprep.subr.bf16.mxu1 %v2920_v43  ;;  %v2695_v44 = vmul.f32 %v6871_v61, %v6961_v19  ;;  %v6962_v21 = vld [vmem:[#allocation44_spill] sm:$0xff]  ;;  %v6963_v43 = vld [vmem:[#allocation86_spill] sm:$0xff]  ;;  %v6984_v19 = vpack.c.bf16 %v6982_v13, %v6983_v24  ;;  %v6991_v50 = vld [vmem:[#allocation69_spill] sm:$0xff]  ;;  %v7013_v13 = vmov 0.0  }
 0x37e   : > { %v2892_v18 = vmul.f32 %v6871_v61, %v6962_v21  ;;  %v2696_v1 = vmul.f32 %v5398_v63, %v6963_v43  ;;  %v6967_v61 = vld [vmem:[#allocation112_spill] sm:$0xff]  ;;  %v6971_v63 = vld [vmem:[#allocation113_spill] sm:$0xff]  ;;  %v6986_v21 = vld [vmem:[#allocation78_spill] sm:$0xff] }
 0x37f   : > { %v2719_v49 = vpack.c.bf16 %v2695_v44, %v2693_v41  ;;  %v6969_v20 = vpack.c.bf16 %v6967_v61, %v6968_v26  ;;  %v6972_v57 = vpack.c.bf16 %v6970_v4, %v6971_v63  ;;  %v6985_v44 = vld [vmem:[#allocation27_spill] sm:$0xff]  ;;  %v6988_v43 = vld [vmem:[#allocation22_spill] sm:$0xff]  ;;  %v7003_v4 = vld [vmem:[#allocation60_spill] sm:$0xff] }
 0x380   : > { %v2720_v45 = vpack.c.bf16 %v2698_v33, %v2696_v1  ;;  %v2916_v37 = vpack.c.bf16 %v2892_v18, %v2890_v48  ;;  %v6987_v18 = vpack.c.bf16 %v6985_v44, %v6986_v21  ;;  %v6989_v1 = vld [vmem:[#allocation67_spill] sm:$0xff]  ;;  %v6995_v48 = vld [vmem:[#allocation73_spill] sm:$0xff]  ;;  %v7004_v63 = vld [vmem:[#allocation52_spill] sm:$0xff]  ;;  %v2968_v21 = vpop.permute.xlu1 %2967 }
 0x381   : > { %v6990_v25 = vpack.c.bf16 %v6988_v43, %v6989_v1  ;;  %v6992_v39 = vld [vmem:[#allocation79_spill] sm:$0xff] }
 0x382   : > { %v6993_v41 = vpack.c.bf16 %v6991_v50, %v6992_v39  ;;  %v7000_v61 = vld [vmem:[#allocation59_spill] sm:$0xff] }
 0x383   : > { %v7001_v26 = vld [vmem:[#allocation51_spill] sm:$0xff] }
 0x384   : > { %2735 = vmatpush1.bf16.xpose.msra.mxu0 %v2722_v0  ;;  %2932 = vmatpush1.bf16.xpose.msra.mxu1 %v2919_v62  ;;  %v6975_v0 = vpack.c.bf16 %v6973_v15, %v6974_v7  ;;  %v6977_v62 = vld [vmem:[#allocation117_spill] sm:$0xff]  ;;  %v7006_v15 = vld [vmem:[#allocation68_spill] sm:$0xff]  ;;  %v7007_v7 = vld [vmem:[#allocation47_spill] sm:$0xff] }
 0x385   : > { %2736 = vmatprep.subr.bf16.mxu0 %v2721_v14  ;;  %2933 = vmatprep.subr.bf16.mxu1 %v2918_v31  ;;  %v6978_v14 = vpack.c.bf16 %v6976_v58, %v6977_v62  ;;  %v6979_v31 = vld [vmem:[#allocation33_spill] sm:$0xff]  ;;  %v7009_v58 = vld [vmem:[#allocation18_spill] sm:$0xff]  ;;  %v4085_v44 = vld [vmem:[%s6407_s6] sm:$0xf] }
 0x386   : > { %v6981_v33 = vpack.c.bf16 %v6979_v31, %v6980_v28  ;;  %v7010_v62 = vld [vmem:[#allocation13_spill] sm:$0xff]  ;;  %v7011_v31 = vld [vmem:[#allocation19_spill] sm:$0xff]  ;;  %v7012_v28 = vld [vmem:[#allocation12_spill] sm:$0xff]  ;;  %3164 = vrot.lane.b32.xlu0 %v4085_v44, %s4185_s22 }
 0x38a   : > { %3361 = vrot.lane.b32.xlu0 %v4085_v44, %s4186_s10 }
 0x38c   : > { %2737 = vmatpush1.bf16.xpose.msra.mxu0 %v2720_v45  ;;  %2934 = vmatpush1.bf16.xpose.msra.mxu1 %v2917_v35  ;;  %v6996_v45 = vpack.c.bf16 %v6994_v51, %v6995_v48  ;;  %v6997_v35 = vld [vmem:[#allocation64_spill] sm:$0xff] }
 0x38d   : > { %2738 = vmatprep.subr.bf16.mxu0 %v2719_v49  ;;  %2935 = vmatprep.subr.bf16.mxu1 %v2916_v37  ;;  %v6998_v49 = vld [vmem:[#allocation84_spill] sm:$0xff] }
 0x38e   : > { %v6999_v37 = vpack.c.bf16 %v6997_v35, %v6998_v49 }
 0x394   : > { %2739 = vmatpush1.bf16.xpose.msra.mxu0 %v6969_v20  ;;  %2936 = vmatpush1.bf16.xpose.msra.mxu1 %v6972_v57  ;;  %v7002_v20 = vpack.c.bf16 %v7000_v61, %v7001_v26  ;;  %v7005_v57 = vpack.c.bf16 %v7003_v4, %v7004_v63  ;;  %v7016_v61 = vpack.c.bf16 %v5909_v46, %v5797_v12  ;;  %v7017_v26 = vld [vmem:[#allocation31_spill] sm:$0xff]  ;;  %v7023_v63 = vld [vmem:[#allocation121_spill] sm:$0xff]  ;;  %v7032_v46 = vld [vmem:[#allocation90_spill] sm:$0xff] }
 0x395   : > { %2740 = vmatprep.subr.bf16.mxu0 %v6975_v0  ;;  %2937 = vmatprep.subr.bf16.mxu1 %v6978_v14  ;;  %v7008_v0 = vpack.c.bf16 %v7006_v15, %v7007_v7  ;;  %v665_v14 = vadd.f32 %v7010_v62, %v7009_v58  ;;  %v7026_v7 = vld [vmem:[#allocation123_spill] sm:$0xff]  ;;  %v7030_v58 = vld [vmem:[#allocation124_spill] sm:$0xff]  ;;  %v7033_v62 = vld [vmem:[#allocation38_spill] sm:$0xff] }
 0x397   : > { %v2925_v24 = vpack.c.bf16 %v665_v14, %v665_v14  ;;  %v7034_v14 = vpack.c.bf16 %v7032_v46, %v7033_v62  ;;  %v7058_v62 = vpack.c.bf16 %v5965_v23, %v5961_v17  ;;  %v7068_v17 = vpack.c.bf16 %v6027_v56, %v6023_v2  ;;  %v7069_v23 = vld [vmem:[#allocation96_spill] sm:$0xff] }
 0x398   : > { %v7082_v56 = vld [vmem:[#allocation16_spill] sm:$0xff] }
 0x39c   : > { %2741 = vmatpush1.bf16.xpose.msra.mxu0 %v6981_v33  ;;  %2938 = vmatpush1.bf16.xpose.msra.mxu1 %v6984_v19  ;;  %v659_v33 = vadd.f32 %v7012_v28, %v7011_v31  ;;  %v7035_v31 = vld [vmem:[#allocation34_spill] sm:$0xff]  ;;  %v7036_v28 = vld [vmem:[#allocation45_spill] sm:$0xff] }
 0x39d   : > { %2742 = vmatprep.subr.bf16.mxu0 %v6987_v18  ;;  %2939 = vmatprep.subr.bf16.mxu1 %v6990_v25  ;;  %v531_v18 = vpop.permute.xlu1 %530  ;;  %v7014_v25 = vld [vmem:[#allocation15_spill] sm:$0xff] }
 0x39e   : > { %v2728_v19 = vpack.c.bf16 %v659_v33, %v659_v33  ;;  %v673_v50 = vadd.f32 %v7014_v25, %v531_v18  ;;  %v7037_v33 = vpack.c.bf16 %v7035_v31, %v7036_v28  ;;  %v7060_v31 = vld [vmem:[#allocation49_spill] sm:$0xff] }
 0x3a4   : > { %2743 = vmatpush1.bf16.xpose.msra.mxu0 %v6993_v41  ;;  %2940 = vmatpush1.bf16.xpose.msra.mxu1 %v6996_v45  ;;  %v3123_v45 = vpack.c.bf16 %v673_v50, %v673_v50  ;;  %v7044_v50 = vld [vmem:[#allocation70_spill] sm:$0xff] }
 0x3a5   : > { %2744 = vmatprep.subr.bf16.mxu0 %v6999_v37  ;;  %2941 = vmatprep.subr.bf16.mxu1 %v7002_v20  ;;  %v7015_v37 = vpack.c.bf16 %v6068_v9, %v5947_v30  ;;  %v7018_v20 = vld [vmem:[#allocation76_spill] sm:$0xff]  ;;  %v7027_v30 = vld [vmem:[#allocation122_spill] sm:$0xff] }
 0x3a6   : > { %v7019_v4 = vpack.c.bf16 %v7017_v26, %v7018_v20  ;;  %v7028_v9 = vpack.c.bf16 %v7026_v7, %v7027_v30  ;;  %v4086_v20 = vld [vmem:[%s4331_s14] sm:$0xf]  ;;  %s333_s14 = sand.u32 1, %s4155_s28  }
 0x3a7   : > { %s3548_s11 = sshll.u32 %s333_s14, 2  ;;  %s3438_s16 = scalar_lea.sflag [#allocation4], %s333_s14 }
 0x3a8   : > { %s335_s25 = scalar_lea.vmem [#allocation3], %s3548_s11 }
 0x3a9   : > { %s3453_s26 = sshll.u32 %s335_s25, 4  ;;  %s3454_s26 = int_to_ptr.vmem [resolvable:$true] %s3453_s26 }
 0x3aa   : > { %s4087_s17 = scalar_lea.vmem %s3454_s26, 64  ;;  %p4094_p4 = scmp.lt.s32.totalorder %s3454_s26, %s4092_s9 }
 0x3ab   : > { %p4088_p0 = scmp.ne.s32.totalorder %s3454_s26, %s4087_s17  ;;  %p4095_p5 = scmp.lt.s32.totalorder %s4093_s15, %s4087_s17 }
 0x3ac   : > { %2745 = vmatpush1.bf16.xpose.msra.mxu0 %v7005_v57  ;;  %2942 = vmatpush1.bf16.xpose.msra.mxu1 %v7008_v0  ;;  %v7024_v57 = vld [vmem:[#allocation120_spill] sm:$0xff]  ;;  %v7029_v0 = vld [vmem:[#allocation95_spill] sm:$0xff] }
 0x3ad   : > { %3663 = vmatprep.subr.mxu0 %v7013_v13  ;;  %3673 = vmatprep.subr.mxu1 %v7013_v13  ;;  %v7025_v15 = vpack.c.bf16 %v7023_v63, %v7024_v57  ;;  %v7031_v12 = vpack.c.bf16 %v7029_v0, %v7030_v58  ;;  %v7056_v58 = vld [vmem:[#allocation53_spill] sm:$0xff]  ;;  %p4089_p1 = pnand %p4088_p0, %p4284_p3  ;;  %p4096_p6 = por %p4095_p5, %p4094_p4 }
 0x3af   : > { %p4090_p2 = pneg %p4089_p1 }
 0x3b1   : > { %p4097_p7 = pnand %p4096_p6, %p4090_p2 }
 0x3b3   : > { %2763 = vmatmul.mubr.bf16.vlgmr.msra.gmra.mxu0 %v2728_v19  ;;  %2960 = vmatmul.mubr.bf16.vlgmr.msra.gmra.mxu1 %v2925_v24  ;;  %v7038_v24 = vld [vmem:[#allocation23_spill] sm:$0xff]  ;;  %v7039_v19 = vld [vmem:[#allocation41_spill] sm:$0xff] }
 0x3b4   : > { %3665 = vmatprep.mubr.msk.f32.mxu0 %vm4184_vm3, %v7013_v13  ;;  %3675 = vmatprep.mubr.msk.f32.mxu1 %vm4184_vm3, %v7013_v13 }
 0x473   : > { %v2764_v43 = vpop.f32.mrf.mxu0  ;;  %v2961_v1 = vpop.f32.mrf.mxu1 }
 0x474   : > { %3664 = vmatpush3.msra.mxu0 %v2764_v43  ;;  %v7041_v43 = vld [vmem:[#allocation28_spill] sm:$0xff] }
 0x475   : > { %v2766_v39 = vpop.f32.mrf.mxu0  ;;  %3666 = vmatmul.mubr.msk.f32.vlgmr.msra.gmra.mxu0 %vm713_vm2, %v4085_v44  ;;  %v2963_v41 = vpop.f32.mrf.mxu1  ;;  %3668 = vmatprep.subr.mxu0 %v7013_v13  ;;  %v7055_v44 = vld [vmem:[#allocation61_spill] sm:$0xff] }
 0x476   : > { %3669 = vmatpush3.msra.mxu0 %v2961_v1  ;;  %3670 = vmatprep.mubr.msk.f32.mxu0 %vm4184_vm3, %v7013_v13  ;;  %v7042_v1 = vld [vmem:[#allocation20_spill] sm:$0xff]  ;;  %v7045_v39 = vpack.c.bf16 %v5889_v60, %v7044_v50  ;;  %v7046_v41 = vpack.c.bf16 %v5903_v32, %v5899_v42  ;;  %v536_v60 = vpop.permute.xlu1 %535 }
 0x477   : > { %v2767_v51 = vpop.f32.mrf.mxu0  ;;  %v2964_v48 = vpop.f32.mrf.mxu1  ;;  %3124 = vmatprep.subr.bf16.mxu0 %v3121_v34  ;;  %v7022_v34 = vpack.c.bf16 %v7020_v22, %v7021_v53  ;;  %v7043_v25 = vpack.c.bf16 %v7041_v43, %v7042_v1  ;;  %v7076_v43 = vld [vmem:[#allocation35_spill] sm:$0xff]  ;;  %v677_v55 = vadd.f32 %v7082_v56, %v536_v60 }
 0x478   : > { %v7047_v51 = vld [vmem:[#allocation81_spill] sm:$0xff] }
 0x479   : > { %v2768_v35 = vpop.f32.mrf.mxu0  ;;  %v2965_v49 = vpop.f32.mrf.mxu1  ;;  %3671 = vmatmul.mubr.msk.f32.vlgmr.msra.gmra.mxu0 %vm713_vm2, %v2968_v21  ;;  %v7040_v21 = vpack.c.bf16 %v7038_v24, %v7039_v19  ;;  %v7048_v48 = vpack.c.bf16 %v5924_v52, %v7047_v51  ;;  %v7070_v24 = vpack.c.bf16 %v6035_v54, %v7069_v23  ;;  %v7073_v19 = vld [vmem:[#allocation39_spill] sm:$0xff]  ;;  %v7080_v54 = vpack.c.bf16 %v6100_v40, %v6105_v3 }
 0x47a   : > { %3125 = vmatpush1.bf16.xpose.msra.mxu0 %v7015_v37  ;;  %3156 = vmatprep.mubr.bf16.mxu0 %v3123_v45  ;;  %v7049_v45 = vld [vmem:[#allocation75_spill] sm:$0xff]  ;;  %v7050_v35 = vld [vmem:[#allocation65_spill] sm:$0xff]  ;;  %v7052_v37 = vld [vmem:[#allocation14_spill] sm:$0xff]  ;;  %v2645_v42 = vpop.permute.xlu1 %2644  ;;  %v3319_v50 = vpack.c.bf16 %v677_v55, %v677_v55 }
 0x47b   : > { %3126 = vmatprep.subr.bf16.mxu0 %v7016_v61  ;;  %v7051_v49 = vpack.c.bf16 %v7049_v45, %v7050_v35  ;;  %v671_v61 = vadd.f32 %v7052_v37, %v531_v18  ;;  %v7053_v18 = vld [vmem:[#allocation17_spill] sm:$0xff] }
 0x47c   : > { %v679_v57 = vadd.f32 %v7053_v18, %v536_v60 }
 0x47d   : > { %v3122_v26 = vpack.c.bf16 %v671_v61, %v671_v61 }
 0x47e   : > { %v3320_v30 = vpack.c.bf16 %v679_v57, %v679_v57 }
 0x482   : > { %3127 = vmatpush1.bf16.xpose.msra.mxu0 %v7019_v4  ;;  %v2647_v4 = vadd.f32 %v4086_v20, %v2645_v42 }
 0x483   : > { %3128 = vmatprep.subr.bf16.mxu0 %v7022_v34 }
 0x48a   : > { %3129 = vmatpush1.bf16.xpose.msra.mxu0 %v7025_v15  ;;  %v3165_v15 = vpop.permute.xlu0 %3164 }
 0x48b   : > { %3130 = vmatprep.subr.bf16.mxu0 %v7028_v9 }
 0x492   : > { %3131 = vmatpush1.bf16.xpose.msra.mxu0 %v7031_v12  ;;  %v7057_v12 = vpack.c.bf16 %v7055_v44, %v7056_v58 }
 0x493   : > { %3132 = vmatprep.subr.bf16.mxu0 %v7034_v14  ;;  %v7059_v14 = vld [vmem:[#allocation57_spill] sm:$0xff] }
 0x494   : > { %v7061_v28 = vpack.c.bf16 %v7059_v14, %v7060_v31 }
 0x49a   : > { %3133 = vmatpush1.bf16.xpose.msra.mxu0 %v7037_v33 }
 0x49b   : > { %3134 = vmatprep.subr.bf16.mxu0 %v7040_v21  ;;  %v7075_v21 = vld [vmem:[#allocation42_spill] sm:$0xff] }
 0x49c   : > { %v7077_v1 = vpack.c.bf16 %v7075_v21, %v7076_v43 }
 0x4a2   : > { %3135 = vmatpush1.bf16.xpose.msra.mxu0 %v7043_v25  ;;  %v7078_v25 = vld [vmem:[#allocation24_spill] sm:$0xff] }
 0x4a3   : > { %3136 = vmatprep.subr.bf16.mxu0 %v7045_v39  ;;  %v7079_v2 = vpack.c.bf16 %v6085_v10, %v7078_v25  ;;  %v3362_v10 = vpop.permute.xlu0 %3361 }
 0x4aa   : > { %3137 = vmatpush1.bf16.xpose.msra.mxu0 %v7046_v41 }
 0x4ab   : > { %3138 = vmatprep.subr.bf16.mxu0 %v7048_v48 }
 0x4b2   : > { %3139 = vmatpush1.bf16.xpose.msra.mxu0 %v7051_v49 }
 0x4b3   : > { %3678 = vmatprep.subr.mxu0 %v7013_v13 }
 0x4b9   : > { %3157 = vmatmul.mubr.bf16.vlgmr.msra.gmra.mxu0 %v3122_v26 }
 0x4ba   : > { %3680 = vmatprep.mubr.msk.f32.mxu0 %vm4184_vm3, %v7013_v13  ;;  %v7054_v13 = vpack.c.bf16 %v6071_v36, %v5951_v38  ;;  %v7063_v38 = vld [vmem:[#allocation92_spill] sm:$0xff] }
 0x4bb   : > { %v7064_v36 = vpack.c.bf16 %v5991_v11, %v7063_v38  ;;  %v7074_v11 = vpack.c.bf16 %v7072_v59, %v7073_v19 }
 0x535   : > { %v2840_v32 = vpop.f32.mrf.mxu0 }
 0x536   : > { %v2844_v22 = vadd.f32 %v2840_v32, %v2647_v4 }
 0x537   : > { %v3667_v52 = vpop.f32.mrf.mxu0 }
 0x539   : > { %v3037_v53 = vpop.f32.mrf.mxu0 }
 0x53a   : > { %v3041_v34 = vadd.f32 %v3037_v53, %v2844_v22 }
 0x53b   : > { %v3672_v63 = vpop.f32.mrf.mxu0 }
 0x579   : > { %v3158_v7 = vpop.f32.mrf.mxu0 }
 0x57a   : > { %3674 = vmatpush3.msra.mxu1 %v3158_v7 }
 0x57b   : > { %v3160_v9 = vpop.f32.mrf.mxu0  ;;  %3676 = vmatmul.mubr.msk.f32.vlgmr.msra.gmra.mxu1 %vm713_vm2, %v3165_v15  ;;  %3321 = vmatprep.subr.bf16.mxu1 %v3318_v29  ;;  %v7066_v29 = vld [vmem:[#allocation100_spill] sm:$0xff] }
 0x57c   : > { %3322 = vmatpush1.bf16.xpose.msra.mxu1 %v7054_v13  ;;  %3353 = vmatprep.mubr.bf16.mxu1 %v3320_v30  ;;  %v7067_v33 = vpack.c.bf16 %v7065_v8, %v7066_v29 }
 0x57d   : > { %v3161_v0 = vpop.f32.mrf.mxu0  ;;  %3323 = vmatprep.subr.bf16.mxu1 %v7057_v12 }
 0x57f   : > { %v3162_v46 = vpop.f32.mrf.mxu0 }
 0x584   : > { %3324 = vmatpush1.bf16.xpose.msra.mxu1 %v7058_v62 }
 0x585   : > { %3325 = vmatprep.subr.bf16.mxu1 %v7061_v28 }
 0x58c   : > { %3326 = vmatpush1.bf16.xpose.msra.mxu1 %v7062_v16 }
 0x58d   : > { %3327 = vmatprep.subr.bf16.mxu1 %v7064_v36 }
 0x594   : > { %3328 = vmatpush1.bf16.xpose.msra.mxu1 %v7067_v33 }
 0x595   : > { %3329 = vmatprep.subr.bf16.mxu1 %v7068_v17 }
 0x59c   : > { %3330 = vmatpush1.bf16.xpose.msra.mxu1 %v7070_v24 }
 0x59d   : > { %3331 = vmatprep.subr.bf16.mxu1 %v7071_v5 }
 0x5a4   : > { %3332 = vmatpush1.bf16.xpose.msra.mxu1 %v7074_v11 }
 0x5a5   : > { %3333 = vmatprep.subr.bf16.mxu1 %v7077_v1 }
 0x5ac   : > { %3334 = vmatpush1.bf16.xpose.msra.mxu1 %v7079_v2 }
 0x5ad   : > { %3335 = vmatprep.subr.bf16.mxu1 %v7080_v54 }
 0x5b4   : > { %3336 = vmatpush1.bf16.xpose.msra.mxu1 %v7081_v47 }
 0x5bb   : > { %3354 = vmatmul.mubr.bf16.vlgmr.msra.gmra.mxu1 %v3319_v50 }
 0x63b   : > { %v3234_v39 = vpop.f32.mrf.mxu1 }
 0x63c   : > { %v3238_v41 = vadd.f32 %v3234_v39, %v3041_v34 }
 0x63d   : > { %v3677_v51 = vpop.f32.mrf.mxu1 }
 0x67b   : > { %v3355_v48 = vpop.f32.mrf.mxu1 }
 0x67c   : > { %3679 = vmatpush3.msra.mxu0 %v3355_v48 }
 0x67d   : > { %v3357_v45 = vpop.f32.mrf.mxu1  ;;  %3681 = vmatmul.mubr.msk.f32.vlgmr.msra.gmra.mxu0 %vm713_vm2, %v3362_v10 }
 0x67f   : > { %v3358_v3 = vpop.f32.mrf.mxu1 }
 0x681   : > { %v3359_v40 = vpop.f32.mrf.mxu1 }
 0x73d   : > { %v3431_v27 = vpop.f32.mrf.mxu0 }
 0x73e   : > { %v3435_v6 = vadd.f32 %v3431_v27, %v3238_v41 }
 0x73f   : > { %v3682_v35 = vpop.f32.mrf.mxu0 }
 0x740   : > { %3436 = vst [vmem:[%s335_s25] sm:$0xf] %v3435_v6 }
 0x741   : > { %4100 = shalt.err (!%p4097_p7)
}
 0x742   : > { %s4101_s22 = scalar_lea.hbm %s6355_s21, 64  ;;  %s4105_s11 = scalar_lea.hbm %s6409_s8, 256 }
 0x743   : > { %p4102_p9 = scmp.ne.s32.totalorder %s6355_s21, %s4101_s22  ;;  %p4106_p12 = scmp.lt.s32.totalorder %s6355_s21, %s6409_s8 }
 0x744   : > { %p4107_p13 = scmp.lt.s32.totalorder %s4105_s11, %s4101_s22 }
 0x745   : > { %p4103_p10 = pnand %p4102_p9, %p4284_p3 }
 0x746   : > { %p4108_p0 = por %p4107_p13, %p4106_p12 }
 0x747   : > { %p4104_p11 = pneg %p4103_p10 }
 0x749   : > { %p4109_p1 = pnand %p4108_p0, %p4104_p11 }
 0x74b   : > { %4112 = shalt.err (!%p4109_p1)
}
 0x74c   : > { %3685 = dma.vmem_to_hbm [thread:$0]  (%p4284_p3), %s3454_s26, 64, %s6355_s21, %s3438_s16  }
 0x74d PF: > { %p3691_p2 = scmp.ge.s32.totalorder %s4179_s12, 2  ;;  %s3465_s24 = sand.u32 1, %s4151_s27  }
 0x74e   : > { %s3466_s25 = scalar_lea.sflag [#allocation4], %s3465_s24 }
 0x74f   : > { %p3688_p4 = pnand %p3691_p2, %p4293_p8 }
 0x751   : > { %p3689_p5 = pneg %p3688_p4 }
 0x753   : > { %4146 = dma.done.wait (%p3689_p5), %s3466_s25, 64  }
 0x754   : > { %4148 = vsyncadd (%p3689_p5), %s3466_s25, 4294967232  ;;  %s21_s12 = sadd.s32 1, %s4179_s12   ;;  %s7083_s13 = sld [smem:[#allocation6_spill]] }
 0x755   : > { %p18_p6 = scmp.ge.s32.totalorder %s21_s12, 6   ;;  %s7084_s29 = sld [smem:[#allocation11_spill]] }
 0x756   : > { %s7085_s30 = sld [smem:[#allocation7_spill]]  ;;  %s7089_s27 = smov %s4155_s28 }
 0x757   : > { %s7086_s9 = sld [smem:[#allocation8_spill]]  ;;  %20 = sbr.rel (!%p18_p6) target bundleno = 5 (0x5), region = 93 }
 0x758   : > { %s7087_s10 = sld [smem:[#allocation9_spill]] }
 0x759   : > { %s7088_s11 = sld [smem:[#allocation10_spill]] }
 0x75a   : > { %s7090_s28 = smov %s7083_s13 }
 0x75c   :  { %3471 = vsyncpa [#allocation4], 1 }
 0x75d   :  { %3473 = vsyncpa [#allocation4 + $0x1], 1 }

</bundles_post_ra>
